<compile_context>
chip_gen: v6e
topology: v6e:2x2x1
jax: 0.10.0
libtpu: 0.0.40
codegen_flags: <defaults>
</compile_context>

<pallas_src>
import jax
import jax.numpy as jnp
from jax.experimental import pallas as pl
from jax.experimental.pallas import tpu as pltpu

# Natural (PyTorch) dims.
D_IN, D_H, D_Z = 784, 400, 256
# Lane-aligned padded dims (multiples of 128).
D_IN_P, D_H_P = 896, 512
D_ML = 2 * D_Z                      # fused fc21 || fc22 output width (already aligned)
LN_HALF = -0.6931471805599453       # ln(0.5)


def vae_kernel(x_ref, eps_ref,
               w1_ref, b1_ref, wml_ref, bml_ref,
               w3_ref, b3_ref, w4_ref, b4_ref,
               recon_ref, ml_ref):
    # ---- encode ----  (bf16 operands into the MXU, f32 accumulation)
    h1 = jnp.maximum(
        jnp.dot(x_ref[...], w1_ref[...], preferred_element_type=jnp.float32)
        + b1_ref[...],
        0.0)

    # fused fc21/fc22: one (512 x 512) matmul; mu / logvar are lane-aligned slices.
    ml = (jnp.dot(h1.astype(jnp.bfloat16), wml_ref[...],
                  preferred_element_type=jnp.float32) + bml_ref[...])
    mu = ml[:, :D_Z]
    logvar = ml[:, D_Z:]

    # ---- reparameterize ----  (f32 elementwise)
    # Reproduces the reference exactly: std = torch.exp(0.5 ** logvar)
    # (a *power*): 0.5 ** logvar == exp(logvar * ln(0.5))
    std = jnp.exp(jnp.exp(logvar * LN_HALF))
    z = mu + eps_ref[...] * std

    # ---- decode ----
    h3 = jnp.maximum(
        jnp.dot(z.astype(jnp.bfloat16), w3_ref[...],
                preferred_element_type=jnp.float32) + b3_ref[...],
        0.0)
    recon = jnp.maximum(
        jnp.dot(h3.astype(jnp.bfloat16), w4_ref[...],
                preferred_element_type=jnp.float32) + b4_ref[...],
        0.0)

    recon_ref[...] = recon.astype(recon_ref.dtype)   # bf16 writeback
    ml_ref[...] = ml                                 # fused mu||logvar, f32


def init_params(key):
    """Deterministic PyTorch-style uniform(-1/sqrt(fan_in), 1/sqrt(fan_in)) init.

    Weights stored transposed, i.e. (in_features, out_features), at natural shapes.
    """
    def linear(k, fan_in, fan_out):
        kw, kb = jax.random.split(k)
        bound = 1.0 / (fan_in ** 0.5)
        w = jax.random.uniform(kw, (fan_in, fan_out), jnp.float32, -bound, bound)
        b = jax.random.uniform(kb, (fan_out,), jnp.float32, -bound, bound)
        return w, b

    keys = jax.random.split(key, 5)
    w1, b1 = linear(keys[0], D_IN, D_H)     # fc1 : 784 -> 400
    w21, b21 = linear(keys[1], D_H, D_Z)    # fc21: 400 -> 256
    w22, b22 = linear(keys[2], D_H, D_Z)    # fc22: 400 -> 256
    w3, b3 = linear(keys[3], D_Z, D_H)      # fc3 : 256 -> 400
    w4, b4 = linear(keys[4], D_H, D_IN)     # fc4 : 400 -> 784
    return (w1, b1, w21, b21, w22, b22, w3, b3, w4, b4)


def _prepare_params(params):
    """Pad to lane-aligned shapes, fuse fc21||fc22, cast weights to bf16."""
    w1, b1, w21, b21, w22, b22, w3, b3, w4, b4 = params

    def pad_w(w, rows, cols):
        return jnp.zeros((rows, cols), jnp.float32).at[:w.shape[0], :w.shape[1]].set(w)

    def pad_b(b, cols):
        return jnp.zeros((1, cols), jnp.float32).at[0, :b.shape[0]].set(b)

    w1p = pad_w(w1, D_IN_P, D_H_P).astype(jnp.bfloat16)                               # (896, 512)
    b1p = pad_b(b1, D_H_P)                                                            # (1, 512)
    wml = pad_w(jnp.concatenate([w21, w22], axis=1), D_H_P, D_ML).astype(jnp.bfloat16)  # (512, 512)
    bml = pad_b(jnp.concatenate([b21, b22], axis=0), D_ML)                            # (1, 512)
    w3p = pad_w(w3, D_Z, D_H_P).astype(jnp.bfloat16)                                  # (256, 512)
    b3p = pad_b(b3, D_H_P)                                                            # (1, 512)
    w4p = pad_w(w4, D_H_P, D_IN_P).astype(jnp.bfloat16)                               # (512, 896)
    b4p = pad_b(b4, D_IN_P)                                                           # (1, 896)
    return (w1p, b1p, wml, bml, w3p, b3p, w4p, b4p)


def _choose_tb(B):
    """Batch tile size.

    Small batches run as one tile (rounded to a sublane multiple).  Large batches use
    the biggest tile (amortizes ~0.35 us/step grid overhead) that (a) wastes <= ~15%
    of rows on batch padding and (b) leaves >= 2 grid steps so both v7x TensorCores
    get work under dimension_semantics=("parallel",).  Harmless on v5e/v6e.
    """
    if B <= 128:
        return max(8, ((B + 7) // 8) * 8)
    for tb in (512, 384, 256, 128):
        steps = pl.cdiv(B, tb)
        if steps >= 2 and steps * tb <= int(B * 1.15) + 1:
            return tb
    return 128


def vae_forward(x, eps, params, *, single_buffer_weights=True):
    prepped = _prepare_params(params)

    # x.view(-1, 784) equivalent.
    x2d = x.reshape(-1, D_IN)
    B = x2d.shape[0]
    TB = _choose_tb(B)
    Bp = pl.cdiv(B, TB) * TB

    # bf16 input (halves the dominant per-step input DMA); features zero-padded 784->896.
    xp = jnp.zeros((Bp, D_IN_P), jnp.bfloat16).at[:B, :D_IN].set(
        x2d.astype(jnp.bfloat16))
    # eps stays f32 (small, feeds the f32 elementwise reparameterization).
    epsp = jnp.zeros((Bp, D_Z), jnp.float32).at[:B].set(eps.astype(jnp.float32))

    def batch_spec(width):
        return pl.BlockSpec((TB, width), lambda i: (i, 0))

    def weight_spec(w):
        # Constant block index -> weights are DMA'd once and stay resident across the
        # whole batch grid.  Single-buffering them saves ~2.6 MiB of VMEM.
        if single_buffer_weights:
            return pl.BlockSpec(w.shape, lambda i: (0, 0),
                                pipeline_mode=pl.Buffered(1))
        return pl.BlockSpec(w.shape, lambda i: (0, 0))

    recon, ml = pl.pallas_call(
        vae_kernel,
        out_shape=(
            jax.ShapeDtypeStruct((Bp, D_IN_P), jnp.bfloat16),   # recon (bf16 writeback)
            jax.ShapeDtypeStruct((Bp, D_ML), jnp.float32),      # fused mu || logvar
        ),
        grid=(Bp // TB,),
        in_specs=[batch_spec(D_IN_P), batch_spec(D_Z)]
                 + [weight_spec(w) for w in prepped],
        out_specs=(batch_spec(D_IN_P), batch_spec(D_ML)),
        compiler_params=pltpu.CompilerParams(
            dimension_semantics=("parallel",),
            vmem_limit_bytes=32 << 20,
        ),
    )(xp, epsp, *prepped)

    # Slice padding back off; split the fused mu/logvar block on the host.
    recon = recon[:B, :D_IN].astype(jnp.float32)
    mu = ml[:B, :D_Z]
    logvar = ml[:B, D_Z:]
    return recon, mu, logvar


def vae_reference(x, eps, params):
    """Pure-JAX f32 reference mirroring the PyTorch module."""
    w1, b1, w21, b21, w22, b22, w3, b3, w4, b4 = params
    x2d = x.reshape(-1, D_IN).astype(jnp.float32)
    h1 = jnp.maximum(x2d @ w1 + b1, 0.0)
    mu = h1 @ w21 + b21
    logvar = h1 @ w22 + b22
    std = jnp.exp(jnp.exp(logvar * LN_HALF))   # exp(0.5 ** logvar)
    z = mu + eps * std
    h3 = jnp.maximum(z @ w3 + b3, 0.0)
    recon = jnp.maximum(h3 @ w4 + b4, 0.0)
    return recon, mu, logvar


if __name__ == "__main__":
    key = jax.random.PRNGKey(0)
    k_params, k_x, k_eps = jax.random.split(key, 3)

    params = init_params(k_params)

    B = 8
    # MNIST-like input; forward flattens it to (B, 784)
    x = jax.random.uniform(k_x, (B, 1, 28, 28), jnp.float32)
    # eps plays the role of torch.randn_like(std); generated deterministically on host
    # TODO(synk): in-kernel pltpu.prng_* could generate eps on-chip, but explicit eps
    # keeps the kernel deterministic and testable against the f32 reference.
    eps = jax.random.normal(k_eps, (B, D_Z), jnp.float32)

    fwd = jax.jit(vae_forward, static_argnames=("single_buffer_weights",))
    try:
        recon, mu, logvar = fwd(x, eps, params, single_buffer_weights=True)
        jax.block_until_ready((recon, mu, logvar))
    except Exception:
        # Fallback: if this JAX build rejects single-buffered (Buffered(1)) resident
        # weights, default double-buffering is functionally identical.
        recon, mu, logvar = fwd(x, eps, params, single_buffer_weights=False)
        jax.block_until_ready((recon, mu, logvar))

    assert recon.shape == (B, D_IN)
    assert mu.shape == (B, D_Z)
    assert logvar.shape == (B, D_Z)
    assert bool(jnp.all(jnp.isfinite(recon)))

    # Tolerant check vs f32 reference (bf16 matmul operands / bf16 recon writeback).
    r_ref, m_ref, lv_ref = vae_reference(x, eps, params)
    assert bool(jnp.allclose(mu, m_ref, atol=1e-1, rtol=1e-1))
    assert bool(jnp.allclose(logvar, lv_ref, atol=1e-1, rtol=1e-1))
    assert bool(jnp.allclose(recon, r_ref, atol=1e-1, rtol=1e-1))

    print("KERNEL_OK")
</pallas_src>

<mosaic_0001>
module attributes {stable_mosaic.version = 11 : i64} {
  func.func @vae_kernel(%arg0: i32, %arg1: memref<8x896xbf16, #tpu.memory_space<vmem>>, %arg2: memref<8x256xf32, #tpu.memory_space<vmem>>, %arg3: memref<896x512xbf16, #tpu.memory_space<vmem>>, %arg4: memref<1x512xf32, #tpu.memory_space<vmem>>, %arg5: memref<512x512xbf16, #tpu.memory_space<vmem>>, %arg6: memref<1x512xf32, #tpu.memory_space<vmem>>, %arg7: memref<256x512xbf16, #tpu.memory_space<vmem>>, %arg8: memref<1x512xf32, #tpu.memory_space<vmem>>, %arg9: memref<512x896xbf16, #tpu.memory_space<vmem>>, %arg10: memref<1x896xf32, #tpu.memory_space<vmem>>, %arg11: memref<8x896xbf16, #tpu.memory_space<vmem>>, %arg12: memref<8x512xf32, #tpu.memory_space<vmem>>) attributes {dimension_semantics = [#tpu.dimension_semantics<parallel>], iteration_bounds = array<i64: 1>, scalar_prefetch = 0 : i64, scratch_operands = 0 : i64, tpu.core_type = #tpu.core_type<tc>, window_params = [{transform_indices = @transform_0, window_bounds = array<i64: 8, 896>}, {transform_indices = @transform_1, window_bounds = array<i64: 8, 256>}, {pipeline_mode = #tpu.pipeline_mode<synchronous>, transform_indices = @transform_2, window_bounds = array<i64: 896, 512>}, {pipeline_mode = #tpu.pipeline_mode<synchronous>, transform_indices = @transform_3, window_bounds = array<i64: 1, 512>}, {pipeline_mode = #tpu.pipeline_mode<synchronous>, transform_indices = @transform_4, window_bounds = array<i64: 512, 512>}, {pipeline_mode = #tpu.pipeline_mode<synchronous>, transform_indices = @transform_5, window_bounds = array<i64: 1, 512>}, {pipeline_mode = #tpu.pipeline_mode<synchronous>, transform_indices = @transform_6, window_bounds = array<i64: 256, 512>}, {pipeline_mode = #tpu.pipeline_mode<synchronous>, transform_indices = @transform_7, window_bounds = array<i64: 1, 512>}, {pipeline_mode = #tpu.pipeline_mode<synchronous>, transform_indices = @transform_8, window_bounds = array<i64: 512, 896>}, {pipeline_mode = #tpu.pipeline_mode<synchronous>, transform_indices = @transform_9, window_bounds = array<i64: 1, 896>}, {transform_indices = @transform_10, window_bounds = array<i64: 8, 896>}, {transform_indices = @transform_11, window_bounds = array<i64: 8, 512>}]} {
    %c0 = arith.constant 0 : index
    %c0_0 = arith.constant 0 : index
    %0 = vector.load %arg1[%c0, %c0_0] : memref<8x896xbf16, #tpu.memory_space<vmem>>, vector<8x896xbf16>
    %c0_1 = arith.constant 0 : index
    %c0_2 = arith.constant 0 : index
    %1 = vector.load %arg3[%c0_1, %c0_2] : memref<896x512xbf16, #tpu.memory_space<vmem>>, vector<896x512xbf16>
    %cst = arith.constant dense<0.000000e+00> : vector<8x512xf32>
    %2 = tpu.matmul %0, %1, %cst {dimension_numbers = #tpu.dot_dimension_numbers<[1], [0], [0], [1], [0, 0, 1, 1], [], []>} : vector<8x896xbf16>, vector<896x512xbf16>, vector<8x512xf32> -> vector<8x512xf32>
    %c0_3 = arith.constant 0 : index
    %c0_4 = arith.constant 0 : index
    %3 = vector.load %arg4[%c0_3, %c0_4] : memref<1x512xf32, #tpu.memory_space<vmem>>, vector<1x512xf32>
    %4 = vector.broadcast %3 : vector<1x512xf32> to vector<8x512xf32>
    %5 = arith.addf %2, %4 : vector<8x512xf32>
    %cst_5 = arith.constant 0.000000e+00 : f32
    %6 = vector.broadcast %cst_5 : f32 to vector<8x512xf32>
    %7 = arith.maximumf %5, %6 : vector<8x512xf32>
    %8 = arith.truncf %7 : vector<8x512xf32> to vector<8x512xbf16>
    %c0_6 = arith.constant 0 : index
    %c0_7 = arith.constant 0 : index
    %9 = vector.load %arg5[%c0_6, %c0_7] : memref<512x512xbf16, #tpu.memory_space<vmem>>, vector<512x512xbf16>
    %cst_8 = arith.constant dense<0.000000e+00> : vector<8x512xf32>
    %10 = tpu.matmul %8, %9, %cst_8 {dimension_numbers = #tpu.dot_dimension_numbers<[1], [0], [0], [1], [0, 0, 1, 1], [], []>} : vector<8x512xbf16>, vector<512x512xbf16>, vector<8x512xf32> -> vector<8x512xf32>
    %c0_9 = arith.constant 0 : index
    %c0_10 = arith.constant 0 : index
    %11 = vector.load %arg6[%c0_9, %c0_10] : memref<1x512xf32, #tpu.memory_space<vmem>>, vector<1x512xf32>
    %12 = vector.broadcast %11 : vector<1x512xf32> to vector<8x512xf32>
    %13 = arith.addf %10, %12 : vector<8x512xf32>
    %14 = vector.extract_strided_slice %13 {offsets = [0, 0], sizes = [8, 256], strides = [1, 1]} : vector<8x512xf32> to vector<8x256xf32>
    %15 = vector.extract_strided_slice %13 {offsets = [0, 256], sizes = [8, 256], strides = [1, 1]} : vector<8x512xf32> to vector<8x256xf32>
    %cst_11 = arith.constant -0.693147182 : f32
    %16 = vector.broadcast %cst_11 : f32 to vector<8x256xf32>
    %17 = arith.mulf %15, %16 : vector<8x256xf32>
    %18 = math.exp %17 : vector<8x256xf32>
    %19 = math.exp %18 : vector<8x256xf32>
    %c0_12 = arith.constant 0 : index
    %c0_13 = arith.constant 0 : index
    %20 = vector.load %arg2[%c0_12, %c0_13] : memref<8x256xf32, #tpu.memory_space<vmem>>, vector<8x256xf32>
    %21 = arith.mulf %20, %19 : vector<8x256xf32>
    %22 = arith.addf %14, %21 : vector<8x256xf32>
    %23 = arith.truncf %22 : vector<8x256xf32> to vector<8x256xbf16>
    %c0_14 = arith.constant 0 : index
    %c0_15 = arith.constant 0 : index
    %24 = vector.load %arg7[%c0_14, %c0_15] : memref<256x512xbf16, #tpu.memory_space<vmem>>, vector<256x512xbf16>
    %cst_16 = arith.constant dense<0.000000e+00> : vector<8x512xf32>
    %25 = tpu.matmul %23, %24, %cst_16 {dimension_numbers = #tpu.dot_dimension_numbers<[1], [0], [0], [1], [0, 0, 1, 1], [], []>} : vector<8x256xbf16>, vector<256x512xbf16>, vector<8x512xf32> -> vector<8x512xf32>
    %c0_17 = arith.constant 0 : index
    %c0_18 = arith.constant 0 : index
    %26 = vector.load %arg8[%c0_17, %c0_18] : memref<1x512xf32, #tpu.memory_space<vmem>>, vector<1x512xf32>
    %27 = vector.broadcast %26 : vector<1x512xf32> to vector<8x512xf32>
    %28 = arith.addf %25, %27 : vector<8x512xf32>
    %cst_19 = arith.constant 0.000000e+00 : f32
    %29 = vector.broadcast %cst_19 : f32 to vector<8x512xf32>
    %30 = arith.maximumf %28, %29 : vector<8x512xf32>
    %31 = arith.truncf %30 : vector<8x512xf32> to vector<8x512xbf16>
    %c0_20 = arith.constant 0 : index
    %c0_21 = arith.constant 0 : index
    %32 = vector.load %arg9[%c0_20, %c0_21] : memref<512x896xbf16, #tpu.memory_space<vmem>>, vector<512x896xbf16>
    %cst_22 = arith.constant dense<0.000000e+00> : vector<8x896xf32>
    %33 = tpu.matmul %31, %32, %cst_22 {dimension_numbers = #tpu.dot_dimension_numbers<[1], [0], [0], [1], [0, 0, 1, 1], [], []>} : vector<8x512xbf16>, vector<512x896xbf16>, vector<8x896xf32> -> vector<8x896xf32>
    %c0_23 = arith.constant 0 : index
    %c0_24 = arith.constant 0 : index
    %34 = vector.load %arg10[%c0_23, %c0_24] : memref<1x896xf32, #tpu.memory_space<vmem>>, vector<1x896xf32>
    %35 = vector.broadcast %34 : vector<1x896xf32> to vector<8x896xf32>
    %36 = arith.addf %33, %35 : vector<8x896xf32>
    %cst_25 = arith.constant 0.000000e+00 : f32
    %37 = vector.broadcast %cst_25 : f32 to vector<8x896xf32>
    %38 = arith.maximumf %36, %37 : vector<8x896xf32>
    %39 = arith.truncf %38 : vector<8x896xf32> to vector<8x896xbf16>
    %c0_26 = arith.constant 0 : index
    %c0_27 = arith.constant 0 : index
    %40 = vector.load %arg11[%c0_26, %c0_27] : memref<8x896xbf16, #tpu.memory_space<vmem>>, vector<8x896xbf16>
    tpu.vector_store %arg11[%c0_26, %c0_27], %39 {strides = array<i32>} : memref<8x896xbf16, #tpu.memory_space<vmem>>, vector<8x896xbf16>,
    %c0_28 = arith.constant 0 : index
    %c0_29 = arith.constant 0 : index
    %41 = vector.load %arg12[%c0_28, %c0_29] : memref<8x512xf32, #tpu.memory_space<vmem>>, vector<8x512xf32>
    tpu.vector_store %arg12[%c0_28, %c0_29], %13 {strides = array<i32>} : memref<8x512xf32, #tpu.memory_space<vmem>>, vector<8x512xf32>,
    return
  }
  func.func @transform_0(%arg0: i32) -> (i32, i32) {
    %c0_i32 = arith.constant 0 : i32
    %c0_i32_0 = arith.constant 0 : i32
    return %arg0, %c0_i32 : i32, i32
  }
  func.func @transform_1(%arg0: i32) -> (i32, i32) {
    %c0_i32 = arith.constant 0 : i32
    %c0_i32_0 = arith.constant 0 : i32
    return %arg0, %c0_i32 : i32, i32
  }
  func.func @transform_2(%arg0: i32) -> (i32, i32) {
    %c0_i32 = arith.constant 0 : i32
    %c0_i32_0 = arith.constant 0 : i32
    %c0_i32_1 = arith.constant 0 : i32
    return %c0_i32, %c0_i32_0 : i32, i32
  }
  func.func @transform_3(%arg0: i32) -> (i32, i32) {
    %c0_i32 = arith.constant 0 : i32
    %c0_i32_0 = arith.constant 0 : i32
    %c0_i32_1 = arith.constant 0 : i32
    return %c0_i32, %c0_i32_0 : i32, i32
  }
  func.func @transform_4(%arg0: i32) -> (i32, i32) {
    %c0_i32 = arith.constant 0 : i32
    %c0_i32_0 = arith.constant 0 : i32
    %c0_i32_1 = arith.constant 0 : i32
    return %c0_i32, %c0_i32_0 : i32, i32
  }
  func.func @transform_5(%arg0: i32) -> (i32, i32) {
    %c0_i32 = arith.constant 0 : i32
    %c0_i32_0 = arith.constant 0 : i32
    %c0_i32_1 = arith.constant 0 : i32
    return %c0_i32, %c0_i32_0 : i32, i32
  }
  func.func @transform_6(%arg0: i32) -> (i32, i32) {
    %c0_i32 = arith.constant 0 : i32
    %c0_i32_0 = arith.constant 0 : i32
    %c0_i32_1 = arith.constant 0 : i32
    return %c0_i32, %c0_i32_0 : i32, i32
  }
  func.func @transform_7(%arg0: i32) -> (i32, i32) {
    %c0_i32 = arith.constant 0 : i32
    %c0_i32_0 = arith.constant 0 : i32
    %c0_i32_1 = arith.constant 0 : i32
    return %c0_i32, %c0_i32_0 : i32, i32
  }
  func.func @transform_8(%arg0: i32) -> (i32, i32) {
    %c0_i32 = arith.constant 0 : i32
    %c0_i32_0 = arith.constant 0 : i32
    %c0_i32_1 = arith.constant 0 : i32
    return %c0_i32, %c0_i32_0 : i32, i32
  }
  func.func @transform_9(%arg0: i32) -> (i32, i32) {
    %c0_i32 = arith.constant 0 : i32
    %c0_i32_0 = arith.constant 0 : i32
    %c0_i32_1 = arith.constant 0 : i32
    return %c0_i32, %c0_i32_0 : i32, i32
  }
  func.func @transform_10(%arg0: i32) -> (i32, i32) {
    %c0_i32 = arith.constant 0 : i32
    %c0_i32_0 = arith.constant 0 : i32
    return %arg0, %c0_i32 : i32, i32
  }
  func.func @transform_11(%arg0: i32) -> (i32, i32) {
    %c0_i32 = arith.constant 0 : i32
    %c0_i32_0 = arith.constant 0 : i32
    return %arg0, %c0_i32 : i32, i32
  }
}

module attributes {stable_mosaic.version = 11 : i64} {
  func.func @vae_kernel(%arg0: i32, %arg1: memref<8x896xbf16, #tpu.memory_space<vmem>>, %arg2: memref<8x256xf32, #tpu.memory_space<vmem>>, %arg3: memref<896x512xbf16, #tpu.memory_space<vmem>>, %arg4: memref<1x512xf32, #tpu.memory_space<vmem>>, %arg5: memref<512x512xbf16, #tpu.memory_space<vmem>>, %arg6: memref<1x512xf32, #tpu.memory_space<vmem>>, %arg7: memref<256x512xbf16, #tpu.memory_space<vmem>>, %arg8: memref<1x512xf32, #tpu.memory_space<vmem>>, %arg9: memref<512x896xbf16, #tpu.memory_space<vmem>>, %arg10: memref<1x896xf32, #tpu.memory_space<vmem>>, %arg11: memref<8x896xbf16, #tpu.memory_space<vmem>>, %arg12: memref<8x512xf32, #tpu.memory_space<vmem>>) attributes {dimension_semantics = [#tpu.dimension_semantics<parallel>], iteration_bounds = array<i64: 1>, scalar_prefetch = 0 : i64, scratch_operands = 0 : i64, tpu.core_type = #tpu.core_type<tc>, window_params = [{transform_indices = @transform_0, window_bounds = array<i64: 8, 896>}, {transform_indices = @transform_1, window_bounds = array<i64: 8, 256>}, {pipeline_mode = #tpu.pipeline_mode<synchronous>, transform_indices = @transform_2, window_bounds = array<i64: 896, 512>}, {pipeline_mode = #tpu.pipeline_mode<synchronous>, transform_indices = @transform_3, window_bounds = array<i64: 1, 512>}, {pipeline_mode = #tpu.pipeline_mode<synchronous>, transform_indices = @transform_4, window_bounds = array<i64: 512, 512>}, {pipeline_mode = #tpu.pipeline_mode<synchronous>, transform_indices = @transform_5, window_bounds = array<i64: 1, 512>}, {pipeline_mode = #tpu.pipeline_mode<synchronous>, transform_indices = @transform_6, window_bounds = array<i64: 256, 512>}, {pipeline_mode = #tpu.pipeline_mode<synchronous>, transform_indices = @transform_7, window_bounds = array<i64: 1, 512>}, {pipeline_mode = #tpu.pipeline_mode<synchronous>, transform_indices = @transform_8, window_bounds = array<i64: 512, 896>}, {pipeline_mode = #tpu.pipeline_mode<synchronous>, transform_indices = @transform_9, window_bounds = array<i64: 1, 896>}, {transform_indices = @transform_10, window_bounds = array<i64: 8, 896>}, {transform_indices = @transform_11, window_bounds = array<i64: 8, 512>}]} {
    %c0 = arith.constant 0 : index
    %c0_0 = arith.constant 0 : index
    %0 = vector.load %arg1[%c0, %c0_0] : memref<8x896xbf16, #tpu.memory_space<vmem>>, vector<8x896xbf16>
    %c0_1 = arith.constant 0 : index
    %c0_2 = arith.constant 0 : index
    %1 = vector.load %arg3[%c0_1, %c0_2] : memref<896x512xbf16, #tpu.memory_space<vmem>>, vector<896x512xbf16>
    %cst = arith.constant dense<0.000000e+00> : vector<8x512xf32>
    %2 = tpu.matmul %0, %1, %cst {dimension_numbers = #tpu.dot_dimension_numbers<[1], [0], [0], [1], [0, 0, 1, 1], [], []>} : vector<8x896xbf16>, vector<896x512xbf16>, vector<8x512xf32> -> vector<8x512xf32>
    %c0_3 = arith.constant 0 : index
    %c0_4 = arith.constant 0 : index
    %3 = vector.load %arg4[%c0_3, %c0_4] : memref<1x512xf32, #tpu.memory_space<vmem>>, vector<1x512xf32>
    %4 = vector.broadcast %3 : vector<1x512xf32> to vector<8x512xf32>
    %5 = arith.addf %2, %4 : vector<8x512xf32>
    %cst_5 = arith.constant 0.000000e+00 : f32
    %6 = vector.broadcast %cst_5 : f32 to vector<8x512xf32>
    %7 = arith.maximumf %5, %6 : vector<8x512xf32>
    %8 = arith.truncf %7 : vector<8x512xf32> to vector<8x512xbf16>
    %c0_6 = arith.constant 0 : index
    %c0_7 = arith.constant 0 : index
    %9 = vector.load %arg5[%c0_6, %c0_7] : memref<512x512xbf16, #tpu.memory_space<vmem>>, vector<512x512xbf16>
    %cst_8 = arith.constant dense<0.000000e+00> : vector<8x512xf32>
    %10 = tpu.matmul %8, %9, %cst_8 {dimension_numbers = #tpu.dot_dimension_numbers<[1], [0], [0], [1], [0, 0, 1, 1], [], []>} : vector<8x512xbf16>, vector<512x512xbf16>, vector<8x512xf32> -> vector<8x512xf32>
    %c0_9 = arith.constant 0 : index
    %c0_10 = arith.constant 0 : index
    %11 = vector.load %arg6[%c0_9, %c0_10] : memref<1x512xf32, #tpu.memory_space<vmem>>, vector<1x512xf32>
    %12 = vector.broadcast %11 : vector<1x512xf32> to vector<8x512xf32>
    %13 = arith.addf %10, %12 : vector<8x512xf32>
    %14 = vector.extract_strided_slice %13 {offsets = [0, 0], sizes = [8, 256], strides = [1, 1]} : vector<8x512xf32> to vector<8x256xf32>
    %15 = vector.extract_strided_slice %13 {offsets = [0, 256], sizes = [8, 256], strides = [1, 1]} : vector<8x512xf32> to vector<8x256xf32>
    %cst_11 = arith.constant -0.693147182 : f32
    %16 = vector.broadcast %cst_11 : f32 to vector<8x256xf32>
    %17 = arith.mulf %15, %16 : vector<8x256xf32>
    %18 = math.exp %17 : vector<8x256xf32>
    %19 = math.exp %18 : vector<8x256xf32>
    %c0_12 = arith.constant 0 : index
    %c0_13 = arith.constant 0 : index
    %20 = vector.load %arg2[%c0_12, %c0_13] : memref<8x256xf32, #tpu.memory_space<vmem>>, vector<8x256xf32>
    %21 = arith.mulf %20, %19 : vector<8x256xf32>
    %22 = arith.addf %14, %21 : vector<8x256xf32>
    %23 = arith.truncf %22 : vector<8x256xf32> to vector<8x256xbf16>
    %c0_14 = arith.constant 0 : index
    %c0_15 = arith.constant 0 : index
    %24 = vector.load %arg7[%c0_14, %c0_15] : memref<256x512xbf16, #tpu.memory_space<vmem>>, vector<256x512xbf16>
    %cst_16 = arith.constant dense<0.000000e+00> : vector<8x512xf32>
    %25 = tpu.matmul %23, %24, %cst_16 {dimension_numbers = #tpu.dot_dimension_numbers<[1], [0], [0], [1], [0, 0, 1, 1], [], []>} : vector<8x256xbf16>, vector<256x512xbf16>, vector<8x512xf32> -> vector<8x512xf32>
    %c0_17 = arith.constant 0 : index
    %c0_18 = arith.constant 0 : index
    %26 = vector.load %arg8[%c0_17, %c0_18] : memref<1x512xf32, #tpu.memory_space<vmem>>, vector<1x512xf32>
    %27 = vector.broadcast %26 : vector<1x512xf32> to vector<8x512xf32>
    %28 = arith.addf %25, %27 : vector<8x512xf32>
    %cst_19 = arith.constant 0.000000e+00 : f32
    %29 = vector.broadcast %cst_19 : f32 to vector<8x512xf32>
    %30 = arith.maximumf %28, %29 : vector<8x512xf32>
    %31 = arith.truncf %30 : vector<8x512xf32> to vector<8x512xbf16>
    %c0_20 = arith.constant 0 : index
    %c0_21 = arith.constant 0 : index
    %32 = vector.load %arg9[%c0_20, %c0_21] : memref<512x896xbf16, #tpu.memory_space<vmem>>, vector<512x896xbf16>
    %cst_22 = arith.constant dense<0.000000e+00> : vector<8x896xf32>
    %33 = tpu.matmul %31, %32, %cst_22 {dimension_numbers = #tpu.dot_dimension_numbers<[1], [0], [0], [1], [0, 0, 1, 1], [], []>} : vector<8x512xbf16>, vector<512x896xbf16>, vector<8x896xf32> -> vector<8x896xf32>
    %c0_23 = arith.constant 0 : index
    %c0_24 = arith.constant 0 : index
    %34 = vector.load %arg10[%c0_23, %c0_24] : memref<1x896xf32, #tpu.memory_space<vmem>>, vector<1x896xf32>
    %35 = vector.broadcast %34 : vector<1x896xf32> to vector<8x896xf32>
    %36 = arith.addf %33, %35 : vector<8x896xf32>
    %cst_25 = arith.constant 0.000000e+00 : f32
    %37 = vector.broadcast %cst_25 : f32 to vector<8x896xf32>
    %38 = arith.maximumf %36, %37 : vector<8x896xf32>
    %39 = arith.truncf %38 : vector<8x896xf32> to vector<8x896xbf16>
    %c0_26 = arith.constant 0 : index
    %c0_27 = arith.constant 0 : index
    %40 = vector.load %arg11[%c0_26, %c0_27] : memref<8x896xbf16, #tpu.memory_space<vmem>>, vector<8x896xbf16>
    tpu.vector_store %arg11[%c0_26, %c0_27], %39 {strides = array<i32>} : memref<8x896xbf16, #tpu.memory_space<vmem>>, vector<8x896xbf16>,
    %c0_28 = arith.constant 0 : index
    %c0_29 = arith.constant 0 : index
    %41 = vector.load %arg12[%c0_28, %c0_29] : memref<8x512xf32, #tpu.memory_space<vmem>>, vector<8x512xf32>
    tpu.vector_store %arg12[%c0_28, %c0_29], %13 {strides = array<i32>} : memref<8x512xf32, #tpu.memory_space<vmem>>, vector<8x512xf32>,
    return
  }
  func.func @transform_0(%arg0: i32) -> (i32, i32) {
    %c0_i32 = arith.constant 0 : i32
    %c0_i32_0 = arith.constant 0 : i32
    return %arg0, %c0_i32 : i32, i32
  }
  func.func @transform_1(%arg0: i32) -> (i32, i32) {
    %c0_i32 = arith.constant 0 : i32
    %c0_i32_0 = arith.constant 0 : i32
    return %arg0, %c0_i32 : i32, i32
  }
  func.func @transform_2(%arg0: i32) -> (i32, i32) {
    %c0_i32 = arith.constant 0 : i32
    %c0_i32_0 = arith.constant 0 : i32
    %c0_i32_1 = arith.constant 0 : i32
    return %c0_i32, %c0_i32_0 : i32, i32
  }
  func.func @transform_3(%arg0: i32) -> (i32, i32) {
    %c0_i32 = arith.constant 0 : i32
    %c0_i32_0 = arith.constant 0 : i32
    %c0_i32_1 = arith.constant 0 : i32
    return %c0_i32, %c0_i32_0 : i32, i32
  }
  func.func @transform_4(%arg0: i32) -> (i32, i32) {
    %c0_i32 = arith.constant 0 : i32
    %c0_i32_0 = arith.constant 0 : i32
    %c0_i32_1 = arith.constant 0 : i32
    return %c0_i32, %c0_i32_0 : i32, i32
  }
  func.func @transform_5(%arg0: i32) -> (i32, i32) {
    %c0_i32 = arith.constant 0 : i32
    %c0_i32_0 = arith.constant 0 : i32
    %c0_i32_1 = arith.constant 0 : i32
    return %c0_i32, %c0_i32_0 : i32, i32
  }
  func.func @transform_6(%arg0: i32) -> (i32, i32) {
    %c0_i32 = arith.constant 0 : i32
    %c0_i32_0 = arith.constant 0 : i32
    %c0_i32_1 = arith.constant 0 : i32
    return %c0_i32, %c0_i32_0 : i32, i32
  }
  func.func @transform_7(%arg0: i32) -> (i32, i32) {
    %c0_i32 = arith.constant 0 : i32
    %c0_i32_0 = arith.constant 0 : i32
    %c0_i32_1 = arith.constant 0 : i32
    return %c0_i32, %c0_i32_0 : i32, i32
  }
  func.func @transform_8(%arg0: i32) -> (i32, i32) {
    %c0_i32 = arith.constant 0 : i32
    %c0_i32_0 = arith.constant 0 : i32
    %c0_i32_1 = arith.constant 0 : i32
    return %c0_i32, %c0_i32_0 : i32, i32
  }
  func.func @transform_9(%arg0: i32) -> (i32, i32) {
    %c0_i32 = arith.constant 0 : i32
    %c0_i32_0 = arith.constant 0 : i32
    %c0_i32_1 = arith.constant 0 : i32
    return %c0_i32, %c0_i32_0 : i32, i32
  }
  func.func @transform_10(%arg0: i32) -> (i32, i32) {
    %c0_i32 = arith.constant 0 : i32
    %c0_i32_0 = arith.constant 0 : i32
    return %arg0, %c0_i32 : i32, i32
  }
  func.func @transform_11(%arg0: i32) -> (i32, i32) {
    %c0_i32 = arith.constant 0 : i32
    %c0_i32_0 = arith.constant 0 : i32
    return %arg0, %c0_i32 : i32, i32
  }
}

</mosaic_0001>

<bundles_post_ra>
// kernel: vae_forward.1
= control target key start
LH: loop header
LB: loop body
LE: loop exit
PB: predicated region body
PF: predicated region fallthrough
CT: control target
= control target key end

     0   :  { %s8879_s2 = inlined_call_operand.vmem [shape: bf16[896,512], index: 2, kind: input, shape index: {}]   ;;  %s8880_s0 = inlined_call_operand.vmem [shape: bf16[8,896], index: 0, kind: input, shape index: {}]   ;;  %s8881_s4 = inlined_call_operand.vmem [shape: bf16[512,512], index: 4, kind: input, shape index: {}]   ;;  %s8882_s3 = inlined_call_operand.vmem [shape: f32[1,512], index: 3, kind: input, shape index: {}]   ;;  %s8883_s6 = inlined_call_operand.vmem [shape: bf16[256,512], index: 6, kind: input, shape index: {}]   ;;  %s8884_s8 = inlined_call_operand.vmem [shape: bf16[512,896], index: 8, kind: input, shape index: {}]   ;;  %s8885_s5 = inlined_call_operand.vmem [shape: f32[1,512], index: 5, kind: input, shape index: {}]   ;;  %s8886_s11 = inlined_call_operand.vmem [shape: f32[8,512], index: 11, kind: output, shape index: {1}]   ;;  %s8887_s1 = inlined_call_operand.vmem [shape: f32[8,256], index: 1, kind: input, shape index: {}]   ;;  %s8888_s7 = inlined_call_operand.vmem [shape: f32[1,512], index: 7, kind: input, shape index: {}]   ;;  %s8889_s9 = inlined_call_operand.vmem [shape: f32[1,896], index: 9, kind: input, shape index: {}]   ;;  %s8890_s10 = inlined_call_operand.vmem [shape: bf16[8,896], index: 10, kind: output, shape index: {0}]  }
   0x1   :  { %v5760_v0 = vld [vmem:[%s8879_s2 + $0xe4] ss:$16 sps:$4 sm:$0xff]   ;;  %v5764_v2 = vld [vmem:[%s8879_s2 + $0xe0] ss:$16 sps:$4 sm:$0xff]   ;;  %v39_v48 = vld [vmem:[%s8880_s0 + $0x8] sm:$0xff] }
   0x2   :  { %v5762_v1 = vld [vmem:[%s8879_s2 + $0x2e4] ss:$16 sps:$4 sm:$0xff]   ;;  %1433 = vmatprep.subr.bf16.mxu0 %v5760_v0  ;;  %v5765_v3 = vld [vmem:[%s8879_s2 + $0x2e0] ss:$16 sps:$4 sm:$0xff]   ;;  %v6932_v51 = vcombine.high %v39_v48, %v39_v48 }
   0x3   :  { %1474 = vmatprep.subr.bf16.mxu1 %v5762_v1  ;;  %v5766_v4 = vld [vmem:[%s8879_s2 + $0xc4] ss:$16 sps:$4 sm:$0xff]   ;;  %1434 = vmatpush1.bf16.msra.mxu0 %v5764_v2  ;;  %v5770_v6 = vld [vmem:[%s8879_s2 + $0xc0] ss:$16 sps:$4 sm:$0xff]  }
   0x4   :  { %1475 = vmatpush1.bf16.msra.mxu1 %v5765_v3  ;;  %v5768_v5 = vld [vmem:[%s8879_s2 + $0x2c4] ss:$16 sps:$4 sm:$0xff]   ;;  %1435 = vmatprep.subr.bf16.mxu0 %v5766_v4  ;;  %v5771_v7 = vld [vmem:[%s8879_s2 + $0x2c0] ss:$16 sps:$4 sm:$0xff]  }
   0x5   :  { %1476 = vmatprep.subr.bf16.mxu1 %v5768_v5  ;;  %v5772_v8 = vld [vmem:[%s8879_s2 + $0xa4] ss:$16 sps:$4 sm:$0xff]   ;;  %v5776_v10 = vld [vmem:[%s8879_s2 + $0xa0] ss:$16 sps:$4 sm:$0xff]   ;;  %1506 = vmatprep.mubr.bf16.mxu1 %v6932_v51 }
   0x6   :  { %v5774_v9 = vld [vmem:[%s8879_s2 + $0x2a4] ss:$16 sps:$4 sm:$0xff]   ;;  %v5777_v11 = vld [vmem:[%s8879_s2 + $0x2a0] ss:$16 sps:$4 sm:$0xff]  }
   0x7   :  { %1436 = vmatpush1.bf16.msra.mxu0 %v5770_v6  ;;  %v5778_v12 = vld [vmem:[%s8879_s2 + $0x84] ss:$16 sps:$4 sm:$0xff]   ;;  %v5782_v14 = vld [vmem:[%s8879_s2 + $0x80] ss:$16 sps:$4 sm:$0xff]  }
   0x8   :  { %1477 = vmatpush1.bf16.msra.mxu1 %v5771_v7  ;;  %1437 = vmatprep.subr.bf16.mxu0 %v5772_v8  ;;  %v5780_v13 = vld [vmem:[%s8879_s2 + $0x284] ss:$16 sps:$4 sm:$0xff]   ;;  %v5783_v15 = vld [vmem:[%s8879_s2 + $0x280] ss:$16 sps:$4 sm:$0xff]   ;;  %v6992_v7 = vcombine.low %v39_v48, %v39_v48  ;;  %v5920_v48 = vld [vmem:[%s8879_s2 + $0xcc] ss:$16 sps:$4 sm:$0xff]  }
   0x9   :  { %1478 = vmatprep.subr.bf16.mxu1 %v5774_v9  ;;  %v5784_v16 = vld [vmem:[%s8879_s2 + $0x64] ss:$16 sps:$4 sm:$0xff]   ;;  %v5788_v18 = vld [vmem:[%s8879_s2 + $0x60] ss:$16 sps:$4 sm:$0xff]  }
   0xa   :  { %v5786_v17 = vld [vmem:[%s8879_s2 + $0x264] ss:$16 sps:$4 sm:$0xff]   ;;  %v5789_v19 = vld [vmem:[%s8879_s2 + $0x260] ss:$16 sps:$4 sm:$0xff]  }
   0xb   :  { %1438 = vmatpush1.bf16.msra.mxu0 %v5776_v10  ;;  %v5790_v20 = vld [vmem:[%s8879_s2 + $0x44] ss:$16 sps:$4 sm:$0xff]   ;;  %v5794_v22 = vld [vmem:[%s8879_s2 + $0x40] ss:$16 sps:$4 sm:$0xff]  }
   0xc   :  { %1479 = vmatpush1.bf16.msra.mxu1 %v5777_v11  ;;  %1439 = vmatprep.subr.bf16.mxu0 %v5778_v12  ;;  %v5792_v21 = vld [vmem:[%s8879_s2 + $0x244] ss:$16 sps:$4 sm:$0xff]   ;;  %v5795_v23 = vld [vmem:[%s8879_s2 + $0x240] ss:$16 sps:$4 sm:$0xff]  }
   0xd   :  { %1480 = vmatprep.subr.bf16.mxu1 %v5780_v13  ;;  %v5796_v24 = vld [vmem:[%s8879_s2 + $0x24] ss:$16 sps:$4 sm:$0xff]   ;;  %v5800_v26 = vld [vmem:[%s8879_s2 + $0x20] ss:$16 sps:$4 sm:$0xff]  }
   0xe   :  { %v5798_v25 = vld [vmem:[%s8879_s2 + $0x224] ss:$16 sps:$4 sm:$0xff]   ;;  %v5801_v27 = vld [vmem:[%s8879_s2 + $0x220] ss:$16 sps:$4 sm:$0xff]  }
   0xf   :  { %1440 = vmatpush1.bf16.msra.mxu0 %v5782_v14  ;;  %v5802_v28 = vld [vmem:[%s8879_s2 + $0x4] ss:$16 sps:$4 sm:$0xff]   ;;  %v5806_v30 = vld [vmem:[%s8879_s2] ss:$16 sps:$4 sm:$0xff]  }
  0x10   :  { %1481 = vmatpush1.bf16.msra.mxu1 %v5783_v15  ;;  %1441 = vmatprep.subr.bf16.mxu0 %v5784_v16  ;;  %v5804_v29 = vld [vmem:[%s8879_s2 + $0x204] ss:$16 sps:$4 sm:$0xff]   ;;  %v5807_v31 = vld [vmem:[%s8879_s2 + $0x200] ss:$16 sps:$4 sm:$0xff]   ;;  %v6719_v16 = vmov 0  }
  0x11   :  { %1482 = vmatprep.subr.bf16.mxu1 %v5786_v17  ;;  %v5808_v32 = vld [vmem:[%s8879_s2 + $0x1e4] ss:$16 sps:$4 sm:$0xff]   ;;  %v5812_v34 = vld [vmem:[%s8879_s2 + $0x1e0] ss:$16 sps:$4 sm:$0xff]  }
  0x12   :  { %v5810_v33 = vld [vmem:[%s8879_s2 + $0x3e4] ss:$16 sps:$4 sm:$0xff]   ;;  %v5813_v35 = vld [vmem:[%s8879_s2 + $0x3e0] ss:$16 sps:$4 sm:$0xff]  }
  0x13   :  { %1442 = vmatpush1.bf16.msra.mxu0 %v5788_v18  ;;  %v5814_v36 = vld [vmem:[%s8879_s2 + $0x1c4] ss:$16 sps:$4 sm:$0xff]   ;;  %v5818_v38 = vld [vmem:[%s8879_s2 + $0x1c0] ss:$16 sps:$4 sm:$0xff]  }
  0x14   :  { %1483 = vmatpush1.bf16.msra.mxu1 %v5789_v19  ;;  %1443 = vmatprep.subr.bf16.mxu0 %v5790_v20  ;;  %v5816_v37 = vld [vmem:[%s8879_s2 + $0x3c4] ss:$16 sps:$4 sm:$0xff]   ;;  %v5819_v39 = vld [vmem:[%s8879_s2 + $0x3c0] ss:$16 sps:$4 sm:$0xff]  }
  0x15   :  { %1484 = vmatprep.subr.bf16.mxu1 %v5792_v21  ;;  %v5820_v40 = vld [vmem:[%s8879_s2 + $0x1a4] ss:$16 sps:$4 sm:$0xff]   ;;  %v5824_v42 = vld [vmem:[%s8879_s2 + $0x1a0] ss:$16 sps:$4 sm:$0xff]  }
  0x16   :  { %v5822_v41 = vld [vmem:[%s8879_s2 + $0x3a4] ss:$16 sps:$4 sm:$0xff]   ;;  %v5825_v43 = vld [vmem:[%s8879_s2 + $0x3a0] ss:$16 sps:$4 sm:$0xff]  }
  0x17   :  { %1444 = vmatpush1.bf16.msra.mxu0 %v5794_v22  ;;  %v5826_v44 = vld [vmem:[%s8879_s2 + $0x184] ss:$16 sps:$4 sm:$0xff]   ;;  %v5830_v49 = vld [vmem:[%s8879_s2 + $0x180] ss:$16 sps:$4 sm:$0xff]  }
  0x18   :  { %1485 = vmatpush1.bf16.msra.mxu1 %v5795_v23  ;;  %1445 = vmatprep.subr.bf16.mxu0 %v5796_v24  ;;  %v5828_v45 = vld [vmem:[%s8879_s2 + $0x384] ss:$16 sps:$4 sm:$0xff]   ;;  %v5831_v50 = vld [vmem:[%s8879_s2 + $0x380] ss:$16 sps:$4 sm:$0xff]  }
  0x19   :  { %1486 = vmatprep.subr.bf16.mxu1 %v5798_v25  ;;  %v38_v46 = vld [vmem:[%s8880_s0] sm:$0xff] }
  0x1a   :  { %v6921_v47 = vcombine.high %v38_v46, %v38_v46  ;;  %v5832_v52 = vld [vmem:[%s8879_s2 + $0x164] ss:$16 sps:$4 sm:$0xff]   ;;  %v5836_v54 = vld [vmem:[%s8879_s2 + $0x160] ss:$16 sps:$4 sm:$0xff]   ;;  %v6990_v6 = vcombine.low %v38_v46, %v38_v46 }
  0x1b   :  { %1446 = vmatpush1.bf16.msra.mxu0 %v5800_v26  ;;  %v5834_v53 = vld [vmem:[%s8879_s2 + $0x364] ss:$16 sps:$4 sm:$0xff]   ;;  %v5837_v55 = vld [vmem:[%s8879_s2 + $0x360] ss:$16 sps:$4 sm:$0xff]  }
  0x1c   :  { %1487 = vmatpush1.bf16.msra.mxu1 %v5801_v27  ;;  %1447 = vmatprep.subr.bf16.mxu0 %v5802_v28  ;;  %v5838_v56 = vld [vmem:[%s8879_s2 + $0x144] ss:$16 sps:$4 sm:$0xff]   ;;  %v5842_v58 = vld [vmem:[%s8879_s2 + $0x140] ss:$16 sps:$4 sm:$0xff]  }
  0x1d   :  { %1488 = vmatprep.subr.bf16.mxu1 %v5804_v29  ;;  %1465 = vmatprep.mubr.bf16.mxu0 %v6921_v47  ;;  %v5840_v57 = vld [vmem:[%s8879_s2 + $0x344] ss:$16 sps:$4 sm:$0xff]   ;;  %v5843_v59 = vld [vmem:[%s8879_s2 + $0x340] ss:$16 sps:$4 sm:$0xff]  }
  0x1e   :  { %v5844_v60 = vld [vmem:[%s8879_s2 + $0x124] ss:$16 sps:$4 sm:$0xff]   ;;  %v5848_v62 = vld [vmem:[%s8879_s2 + $0x120] ss:$16 sps:$4 sm:$0xff]  }
  0x1f   :  { %1448 = vmatpush1.bf16.msra.mxu0 %v5806_v30  ;;  %v5846_v61 = vld [vmem:[%s8879_s2 + $0x324] ss:$16 sps:$4 sm:$0xff]   ;;  %v5849_v63 = vld [vmem:[%s8879_s2 + $0x320] ss:$16 sps:$4 sm:$0xff]  }
  0x20   :  { %1489 = vmatpush1.bf16.msra.mxu1 %v5807_v31  ;;  %1449 = vmatprep.subr.bf16.mxu0 %v5808_v32  ;;  %v5850_v0 = vld [vmem:[%s8879_s2 + $0x104] ss:$16 sps:$4 sm:$0xff]   ;;  %v5854_v2 = vld [vmem:[%s8879_s2 + $0x100] ss:$16 sps:$4 sm:$0xff]  }
  0x21   :  { %1490 = vmatprep.subr.bf16.mxu1 %v5810_v33  ;;  %v5852_v1 = vld [vmem:[%s8879_s2 + $0x304] ss:$16 sps:$4 sm:$0xff]   ;;  %v5855_v3 = vld [vmem:[%s8879_s2 + $0x300] ss:$16 sps:$4 sm:$0xff]  }
  0x22   :  { %v5862_v4 = vld [vmem:[%s8879_s2 + $0x4e4] ss:$16 sps:$4 sm:$0xff]   ;;  %v5860_v8 = vld [vmem:[%s8879_s2 + $0x4e0] ss:$16 sps:$4 sm:$0xff]  }
  0x23   :  { %1450 = vmatpush2.bf16.msra.mxu0 %v5812_v34  ;;  %v5865_v5 = vld [vmem:[%s8879_s2 + $0x6e4] ss:$16 sps:$4 sm:$0xff]   ;;  %v5863_v9 = vld [vmem:[%s8879_s2 + $0x6e0] ss:$16 sps:$4 sm:$0xff]  }
  0x24   :  { %1491 = vmatpush2.bf16.msra.mxu1 %v5813_v35  ;;  %1451 = vmatprep.subr.bf16.mxu0 %v5814_v36  ;;  %v5868_v10 = vld [vmem:[%s8879_s2 + $0x4c4] ss:$16 sps:$4 sm:$0xff]   ;;  %v5866_v12 = vld [vmem:[%s8879_s2 + $0x4c0] ss:$16 sps:$4 sm:$0xff]  }
  0x25   :  { %1492 = vmatprep.subr.bf16.mxu1 %v5816_v37  ;;  %v5871_v11 = vld [vmem:[%s8879_s2 + $0x6c4] ss:$16 sps:$4 sm:$0xff]   ;;  %v5869_v13 = vld [vmem:[%s8879_s2 + $0x6c0] ss:$16 sps:$4 sm:$0xff]  }
  0x26   :  { %v5874_v14 = vld [vmem:[%s8879_s2 + $0x4a4] ss:$16 sps:$4 sm:$0xff]   ;;  %v5872_v17 = vld [vmem:[%s8879_s2 + $0x4a0] ss:$16 sps:$4 sm:$0xff]  }
  0x27   :  { %1452 = vmatpush2.bf16.msra.mxu0 %v5818_v38  ;;  %v5877_v15 = vld [vmem:[%s8879_s2 + $0x6a4] ss:$16 sps:$4 sm:$0xff]   ;;  %v5875_v18 = vld [vmem:[%s8879_s2 + $0x6a0] ss:$16 sps:$4 sm:$0xff]  }
  0x28   :  { %1493 = vmatpush2.bf16.msra.mxu1 %v5819_v39  ;;  %1453 = vmatprep.subr.bf16.mxu0 %v5820_v40  ;;  %v5880_v19 = vld [vmem:[%s8879_s2 + $0x484] ss:$16 sps:$4 sm:$0xff]   ;;  %v5878_v21 = vld [vmem:[%s8879_s2 + $0x480] ss:$16 sps:$4 sm:$0xff]  }
  0x29   :  { %1494 = vmatprep.subr.bf16.mxu1 %v5822_v41  ;;  %v5883_v20 = vld [vmem:[%s8879_s2 + $0x684] ss:$16 sps:$4 sm:$0xff]   ;;  %v5881_v22 = vld [vmem:[%s8879_s2 + $0x680] ss:$16 sps:$4 sm:$0xff]  }
  0x2a   :  { %v5886_v23 = vld [vmem:[%s8879_s2 + $0x464] ss:$16 sps:$4 sm:$0xff]   ;;  %v5884_v25 = vld [vmem:[%s8879_s2 + $0x460] ss:$16 sps:$4 sm:$0xff]  }
  0x2b   :  { %1454 = vmatpush2.bf16.msra.mxu0 %v5824_v42  ;;  %v5889_v24 = vld [vmem:[%s8879_s2 + $0x664] ss:$16 sps:$4 sm:$0xff]   ;;  %v5887_v26 = vld [vmem:[%s8879_s2 + $0x660] ss:$16 sps:$4 sm:$0xff]   ;;  %v5914_v42 = vld [vmem:[%s8879_s2 + $0xec] ss:$16 sps:$4 sm:$0xff]  }
  0x2c   :  { %1495 = vmatpush2.bf16.msra.mxu1 %v5825_v43  ;;  %1455 = vmatprep.subr.bf16.mxu0 %v5826_v44  ;;  %v5892_v27 = vld [vmem:[%s8879_s2 + $0x444] ss:$16 sps:$4 sm:$0xff]   ;;  %v5890_v29 = vld [vmem:[%s8879_s2 + $0x440] ss:$16 sps:$4 sm:$0xff]   ;;  %v7109_v44 = vld [vmem:[%s8880_s0 + $0x18] ss:$0 sps:$4 sm:$0xff]  }
  0x2d   :  { %1496 = vmatprep.subr.bf16.mxu1 %v5828_v45  ;;  %v5895_v28 = vld [vmem:[%s8879_s2 + $0x644] ss:$16 sps:$4 sm:$0xff]   ;;  %v5893_v30 = vld [vmem:[%s8879_s2 + $0x640] ss:$16 sps:$4 sm:$0xff]   ;;  %v5912_v45 = vld [vmem:[%s8879_s2 + $0xe8] ss:$16 sps:$4 sm:$0xff]  }
  0x2e   :  { %v5898_v31 = vld [vmem:[%s8879_s2 + $0x424] ss:$16 sps:$4 sm:$0xff]   ;;  %v5896_v34 = vld [vmem:[%s8879_s2 + $0x420] ss:$16 sps:$4 sm:$0xff]  }
  0x2f   :  { %1456 = vmatpush2.bf16.msra.mxu0 %v5830_v49  ;;  %v5901_v32 = vld [vmem:[%s8879_s2 + $0x624] ss:$16 sps:$4 sm:$0xff]   ;;  %v5899_v36 = vld [vmem:[%s8879_s2 + $0x620] ss:$16 sps:$4 sm:$0xff]  }
  0x30   :  { %1497 = vmatpush2.bf16.msra.mxu1 %v5831_v50  ;;  %1457 = vmatprep.subr.bf16.mxu0 %v5832_v52  ;;  %v7072_v33 = vld [vmem:[%s8880_s0 + $0x10] sm:$0xff]  ;;  %v5918_v50 = vld [vmem:[%s8879_s2 + $0xc8] ss:$16 sps:$4 sm:$0xff]  }
  0x31   :  { %1498 = vmatprep.subr.bf16.mxu1 %v5834_v53  ;;  %v7079_v35 = vcombine.high %v7072_v33, %v7072_v33  ;;  %v5904_v37 = vld [vmem:[%s8879_s2 + $0x404] ss:$16 sps:$4 sm:$0xff]   ;;  %v5902_v39 = vld [vmem:[%s8879_s2 + $0x400] ss:$16 sps:$4 sm:$0xff]   ;;  %v5926_v53 = vld [vmem:[%s8879_s2 + $0xac] ss:$16 sps:$4 sm:$0xff]  }
  0x32   :  { %v5907_v38 = vld [vmem:[%s8879_s2 + $0x604] ss:$16 sps:$4 sm:$0xff]   ;;  %v5905_v40 = vld [vmem:[%s8879_s2 + $0x600] ss:$16 sps:$4 sm:$0xff]  }
  0x33   :  { %1458 = vmatpush2.bf16.msra.mxu0 %v5836_v54  ;;  %v5910_v41 = vld [vmem:[%s8879_s2 + $0x5e4] ss:$16 sps:$4 sm:$0xff]   ;;  %v5908_v43 = vld [vmem:[%s8879_s2 + $0x5e0] ss:$16 sps:$4 sm:$0xff]  }
  0x34   :  { %1499 = vmatpush2.bf16.msra.mxu1 %v5837_v55  ;;  %1459 = vmatprep.subr.bf16.mxu0 %v5838_v56  ;;  %v5917_v46 = vld [vmem:[%s8879_s2 + $0x5c4] ss:$16 sps:$4 sm:$0xff]   ;;  %v5915_v49 = vld [vmem:[%s8879_s2 + $0x5c0] ss:$16 sps:$4 sm:$0xff]   ;;  %v5924_v55 = vld [vmem:[%s8879_s2 + $0xa8] ss:$16 sps:$4 sm:$0xff]  }
  0x35   :  { %1500 = vmatprep.subr.bf16.mxu1 %v5840_v57  ;;  %v5923_v52 = vld [vmem:[%s8879_s2 + $0x5a4] ss:$16 sps:$4 sm:$0xff]   ;;  %v5921_v54 = vld [vmem:[%s8879_s2 + $0x5a0] ss:$16 sps:$4 sm:$0xff]  }
  0x36   :  { %v5929_v56 = vld [vmem:[%s8879_s2 + $0x584] ss:$16 sps:$4 sm:$0xff]   ;;  %v5927_v57 = vld [vmem:[%s8879_s2 + $0x580] ss:$16 sps:$4 sm:$0xff]  }
  0x37   :  { %1460 = vmatpush2.bf16.msra.mxu0 %v5842_v58  ;;  %v5930_v58 = vld [vmem:[%s8879_s2 + $0x88] ss:$16 sps:$4 sm:$0xff]  }
  0x38   :  { %1501 = vmatpush2.bf16.msra.mxu1 %v5843_v59  ;;  %1461 = vmatprep.subr.bf16.mxu0 %v5844_v60  ;;  %v5935_v59 = vld [vmem:[%s8879_s2 + $0x564] ss:$16 sps:$4 sm:$0xff]   ;;  %v5938_v60 = vld [vmem:[%s8879_s2 + $0x6c] ss:$16 sps:$4 sm:$0xff]  }
  0x39   :  { %1502 = vmatprep.subr.bf16.mxu1 %v5846_v61  ;;  %v5933_v61 = vld [vmem:[%s8879_s2 + $0x560] ss:$16 sps:$4 sm:$0xff]  }
  0x3b   :  { %1462 = vmatpush2.bf16.msra.mxu0 %v5848_v62  ;;  %v5936_v62 = vld [vmem:[%s8879_s2 + $0x68] ss:$16 sps:$4 sm:$0xff]  }
  0x3c   :  { %1503 = vmatpush2.bf16.msra.mxu1 %v5849_v63  ;;  %1463 = vmatprep.subr.bf16.mxu0 %v5850_v0  ;;  %v5941_v63 = vld [vmem:[%s8879_s2 + $0x544] ss:$16 sps:$4 sm:$0xff]   ;;  %v5944_v0 = vld [vmem:[%s8879_s2 + $0x4c] ss:$16 sps:$4 sm:$0xff]  }
  0x3d   :  { %1504 = vmatprep.subr.bf16.mxu1 %v5852_v1  ;;  %v5939_v1 = vld [vmem:[%s8879_s2 + $0x540] ss:$16 sps:$4 sm:$0xff]  }
  0x3f   :  { %1464 = vmatpush2.bf16.msra.mxu0 %v5854_v2  ;;  %v5942_v2 = vld [vmem:[%s8879_s2 + $0x48] ss:$16 sps:$4 sm:$0xff]  }
  0x40   :  { %1505 = vmatpush2.bf16.msra.mxu1 %v5855_v3  ;;  %1515 = vmatprep.subr.bf16.mxu0 %v5862_v4  ;;  %v5947_v3 = vld [vmem:[%s8879_s2 + $0x524] ss:$16 sps:$4 sm:$0xff]   ;;  %v5950_v4 = vld [vmem:[%s8879_s2 + $0x2c] ss:$16 sps:$4 sm:$0xff]  }
  0x41   :  { %1556 = vmatprep.subr.bf16.mxu1 %v5865_v5  ;;  %v5945_v5 = vld [vmem:[%s8879_s2 + $0x520] ss:$16 sps:$4 sm:$0xff]  }
  0x42   :  { %1466 = vmatmul.mubr.bf16.vlgmr.msra.gmra.mxu0 %v6990_v6 }
  0x43   :  { %1507 = vmatmul.mubr.bf16.vlgmr.msra.gmra.mxu1 %v6992_v7  ;;  %1516 = vmatpush1.bf16.msra.mxu0 %v5860_v8  ;;  %v5948_v8 = vld [vmem:[%s8879_s2 + $0x28] ss:$16 sps:$4 sm:$0xff]  }
  0x44   :  { %1557 = vmatpush1.bf16.msra.mxu1 %v5863_v9  ;;  %1517 = vmatprep.subr.bf16.mxu0 %v5868_v10  ;;  %v5953_v9 = vld [vmem:[%s8879_s2 + $0x504] ss:$16 sps:$4 sm:$0xff]   ;;  %v5956_v10 = vld [vmem:[%s8879_s2 + $0xc] ss:$16 sps:$4 sm:$0xff]  }
  0x45   :  { %1558 = vmatprep.subr.bf16.mxu1 %v5871_v11  ;;  %1588 = vmatprep.mubr.bf16.mxu1 %v6719_v16  ;;  %v5951_v11 = vld [vmem:[%s8879_s2 + $0x500] ss:$16 sps:$4 sm:$0xff]  }
  0x46   :  { %1547 = vmatprep.mubr.bf16.mxu0 %v7079_v35 }
  0x47   :  { %1518 = vmatpush1.bf16.msra.mxu0 %v5866_v12  ;;  %v5954_v12 = vld [vmem:[%s8879_s2 + $0x8] ss:$16 sps:$4 sm:$0xff]  }
  0x48   :  { %1559 = vmatpush1.bf16.msra.mxu1 %v5869_v13  ;;  %1519 = vmatprep.subr.bf16.mxu0 %v5874_v14  ;;  %v5961_v13 = vld [vmem:[%s8879_s2 + $0x1ec] ss:$16 sps:$4 sm:$0xff]  }
  0x49   :  { %1560 = vmatprep.subr.bf16.mxu1 %v5877_v15  ;;  %v5964_v14 = vld [vmem:[%s8879_s2 + $0x2ec] ss:$16 sps:$4 sm:$0xff]   ;;  %v7208_v15 = vcombine.low %v7072_v33, %v7072_v33  ;;  %v5986_v33 = vld [vmem:[%s8879_s2 + $0x268] ss:$16 sps:$4 sm:$0xff]  }
  0x4b   :  { %1520 = vmatpush1.bf16.msra.mxu0 %v5872_v17  ;;  %v5959_v17 = vld [vmem:[%s8879_s2 + $0x1e8] ss:$16 sps:$4 sm:$0xff]  }
  0x4c   :  { %1561 = vmatpush1.bf16.msra.mxu1 %v5875_v18  ;;  %1521 = vmatprep.subr.bf16.mxu0 %v5880_v19  ;;  %v5962_v18 = vld [vmem:[%s8879_s2 + $0x2e8] ss:$16 sps:$4 sm:$0xff]   ;;  %v5967_v19 = vld [vmem:[%s8879_s2 + $0x1cc] ss:$16 sps:$4 sm:$0xff]  }
  0x4d   :  { %1562 = vmatprep.subr.bf16.mxu1 %v5883_v20  ;;  %v5970_v20 = vld [vmem:[%s8879_s2 + $0x2cc] ss:$16 sps:$4 sm:$0xff]  }
  0x4f   :  { %1522 = vmatpush1.bf16.msra.mxu0 %v5878_v21  ;;  %v5965_v21 = vld [vmem:[%s8879_s2 + $0x1c8] ss:$16 sps:$4 sm:$0xff]  }
  0x50   :  { %1563 = vmatpush1.bf16.msra.mxu1 %v5881_v22  ;;  %1523 = vmatprep.subr.bf16.mxu0 %v5886_v23  ;;  %v5968_v22 = vld [vmem:[%s8879_s2 + $0x2c8] ss:$16 sps:$4 sm:$0xff]   ;;  %v5973_v23 = vld [vmem:[%s8879_s2 + $0x1ac] ss:$16 sps:$4 sm:$0xff]  }
  0x51   :  { %1564 = vmatprep.subr.bf16.mxu1 %v5889_v24  ;;  %v5976_v24 = vld [vmem:[%s8879_s2 + $0x2ac] ss:$16 sps:$4 sm:$0xff]  }
  0x53   :  { %1524 = vmatpush1.bf16.msra.mxu0 %v5884_v25  ;;  %v5971_v25 = vld [vmem:[%s8879_s2 + $0x1a8] ss:$16 sps:$4 sm:$0xff]  }
  0x54   :  { %1565 = vmatpush1.bf16.msra.mxu1 %v5887_v26  ;;  %1525 = vmatprep.subr.bf16.mxu0 %v5892_v27  ;;  %v5974_v26 = vld [vmem:[%s8879_s2 + $0x2a8] ss:$16 sps:$4 sm:$0xff]   ;;  %v5979_v27 = vld [vmem:[%s8879_s2 + $0x18c] ss:$16 sps:$4 sm:$0xff]  }
  0x55   :  { %1566 = vmatprep.subr.bf16.mxu1 %v5895_v28  ;;  %v5977_v28 = vld [vmem:[%s8879_s2 + $0x188] ss:$16 sps:$4 sm:$0xff]  }
  0x57   :  { %1526 = vmatpush1.bf16.msra.mxu0 %v5890_v29  ;;  %v5980_v29 = vld [vmem:[%s8879_s2 + $0x288] ss:$16 sps:$4 sm:$0xff]  }
  0x58   :  { %1567 = vmatpush1.bf16.msra.mxu1 %v5893_v30  ;;  %1527 = vmatprep.subr.bf16.mxu0 %v5898_v31  ;;  %v5985_v30 = vld [vmem:[%s8879_s2 + $0x16c] ss:$16 sps:$4 sm:$0xff]  }
  0x59   :  { %1568 = vmatprep.subr.bf16.mxu1 %v5901_v32  ;;  %v5988_v31 = vld [vmem:[%s8879_s2 + $0x26c] ss:$16 sps:$4 sm:$0xff]   ;;  %v5983_v32 = vld [vmem:[%s8879_s2 + $0x168] ss:$16 sps:$4 sm:$0xff]  }
  0x5b   :  { %1528 = vmatpush1.bf16.msra.mxu0 %v5896_v34  ;;  %v5991_v34 = vld [vmem:[%s8879_s2 + $0x14c] ss:$16 sps:$4 sm:$0xff]  }
  0x5c   :  { %1569 = vmatpush1.bf16.msra.mxu1 %v5899_v36  ;;  %1529 = vmatprep.subr.bf16.mxu0 %v5904_v37  ;;  %v5994_v36 = vld [vmem:[%s8879_s2 + $0x24c] ss:$16 sps:$4 sm:$0xff]   ;;  %v5989_v37 = vld [vmem:[%s8879_s2 + $0x148] ss:$16 sps:$4 sm:$0xff]  }
  0x5d   :  { %1570 = vmatprep.subr.bf16.mxu1 %v5907_v38  ;;  %v5992_v38 = vld [vmem:[%s8879_s2 + $0x248] ss:$16 sps:$4 sm:$0xff]  }
  0x5f   :  { %1530 = vmatpush1.bf16.msra.mxu0 %v5902_v39  ;;  %v5997_v39 = vld [vmem:[%s8879_s2 + $0x12c] ss:$16 sps:$4 sm:$0xff]  }
  0x60   :  { %1571 = vmatpush1.bf16.msra.mxu1 %v5905_v40  ;;  %1531 = vmatprep.subr.bf16.mxu0 %v5910_v41  ;;  %v6000_v40 = vld [vmem:[%s8879_s2 + $0x22c] ss:$16 sps:$4 sm:$0xff]   ;;  %v5995_v41 = vld [vmem:[%s8879_s2 + $0x128] ss:$16 sps:$4 sm:$0xff]  }
  0x61   :  { %1597 = vmatprep.subr.bf16.mxu1 %v5914_v42  ;;  %v5998_v42 = vld [vmem:[%s8879_s2 + $0x228] ss:$16 sps:$4 sm:$0xff]  }
  0x63   :  { %1589 = vmatmul.mubr.bf16.vlgmr.msra.gmra.mxu1 %v7109_v44  ;;  %1532 = vmatpush2.bf16.msra.mxu0 %v5908_v43  ;;  %v6003_v43 = vld [vmem:[%s8879_s2 + $0x10c] ss:$16 sps:$4 sm:$0xff]  }
  0x64   :  { %1598 = vmatpush1.bf16.msra.mxu1 %v5912_v45  ;;  %1533 = vmatprep.subr.bf16.mxu0 %v5917_v46  ;;  %v6006_v45 = vld [vmem:[%s8879_s2 + $0x20c] ss:$16 sps:$4 sm:$0xff]   ;;  %v6001_v46 = vld [vmem:[%s8879_s2 + $0x108] ss:$16 sps:$4 sm:$0xff]  }
  0x65   :  { %1599 = vmatprep.subr.bf16.mxu1 %v5920_v48  ;;  %1629 = vmatprep.mubr.bf16.mxu1 %v6921_v47  ;;  %v5932_v47 = vld [vmem:[%s8879_s2 + $0x8c] ss:$16 sps:$4 sm:$0xff]   ;;  %v6004_v48 = vld [vmem:[%s8879_s2 + $0x208] ss:$16 sps:$4 sm:$0xff]  }
  0x67   :  { %1534 = vmatpush2.bf16.msra.mxu0 %v5915_v49  ;;  %v6009_v49 = vld [vmem:[%s8879_s2 + $0x3ec] ss:$16 sps:$4 sm:$0xff]  }
  0x68   :  { %1600 = vmatpush1.bf16.msra.mxu1 %v5918_v50  ;;  %1535 = vmatprep.subr.bf16.mxu0 %v5923_v52  ;;  %v6012_v50 = vld [vmem:[%s8879_s2 + $0x4ec] ss:$16 sps:$4 sm:$0xff]   ;;  %v6007_v52 = vld [vmem:[%s8879_s2 + $0x3e8] ss:$16 sps:$4 sm:$0xff]  }
  0x69   :  { %1601 = vmatprep.subr.bf16.mxu1 %v5926_v53  ;;  %v6010_v53 = vld [vmem:[%s8879_s2 + $0x4e8] ss:$16 sps:$4 sm:$0xff]  }
  0x6b   :  { %1536 = vmatpush2.bf16.msra.mxu0 %v5921_v54  ;;  %v6015_v54 = vld [vmem:[%s8879_s2 + $0x3cc] ss:$16 sps:$4 sm:$0xff]  }
  0x6c   :  { %1602 = vmatpush1.bf16.msra.mxu1 %v5924_v55  ;;  %1537 = vmatprep.subr.bf16.mxu0 %v5929_v56  ;;  %v6018_v55 = vld [vmem:[%s8879_s2 + $0x4cc] ss:$16 sps:$4 sm:$0xff]   ;;  %v6013_v56 = vld [vmem:[%s8879_s2 + $0x3c8] ss:$16 sps:$4 sm:$0xff]  }
  0x6d   :  { %1603 = vmatprep.subr.bf16.mxu1 %v5932_v47  ;;  %v6016_v47 = vld [vmem:[%s8879_s2 + $0x4c8] ss:$16 sps:$4 sm:$0xff]  }
  0x6f   :  { %1538 = vmatpush2.bf16.msra.mxu0 %v5927_v57  ;;  %v6021_v57 = vld [vmem:[%s8879_s2 + $0x3ac] ss:$16 sps:$4 sm:$0xff]  }
  0x70   :  { %1604 = vmatpush1.bf16.msra.mxu1 %v5930_v58  ;;  %1539 = vmatprep.subr.bf16.mxu0 %v5935_v59  ;;  %v6024_v58 = vld [vmem:[%s8879_s2 + $0x4ac] ss:$16 sps:$4 sm:$0xff]   ;;  %v6019_v59 = vld [vmem:[%s8879_s2 + $0x3a8] ss:$16 sps:$4 sm:$0xff]  }
  0x71   :  { %1605 = vmatprep.subr.bf16.mxu1 %v5938_v60  ;;  %v6027_v60 = vld [vmem:[%s8879_s2 + $0x38c] ss:$16 sps:$4 sm:$0xff]  }
  0x73   :  { %1540 = vmatpush2.bf16.msra.mxu0 %v5933_v61  ;;  %v6030_v61 = vld [vmem:[%s8879_s2 + $0x48c] ss:$16 sps:$4 sm:$0xff]  }
  0x74   :  { %1606 = vmatpush1.bf16.msra.mxu1 %v5936_v62  ;;  %1541 = vmatprep.subr.bf16.mxu0 %v5941_v63  ;;  %v6028_v62 = vld [vmem:[%s8879_s2 + $0x488] ss:$16 sps:$4 sm:$0xff]   ;;  %v6033_v63 = vld [vmem:[%s8879_s2 + $0x36c] ss:$16 sps:$4 sm:$0xff]  }
  0x75   :  { %1607 = vmatprep.subr.bf16.mxu1 %v5944_v0  ;;  %v6036_v0 = vld [vmem:[%s8879_s2 + $0x46c] ss:$16 sps:$4 sm:$0xff]  }
  0x77   :  { %1542 = vmatpush2.bf16.msra.mxu0 %v5939_v1  ;;  %v6031_v1 = vld [vmem:[%s8879_s2 + $0x368] ss:$16 sps:$4 sm:$0xff]  }
  0x78   :  { %1608 = vmatpush1.bf16.msra.mxu1 %v5942_v2  ;;  %1543 = vmatprep.subr.bf16.mxu0 %v5947_v3  ;;  %v6034_v2 = vld [vmem:[%s8879_s2 + $0x468] ss:$16 sps:$4 sm:$0xff]   ;;  %v6039_v3 = vld [vmem:[%s8879_s2 + $0x34c] ss:$16 sps:$4 sm:$0xff]  }
  0x79   :  { %1609 = vmatprep.subr.bf16.mxu1 %v5950_v4  ;;  %v6042_v4 = vld [vmem:[%s8879_s2 + $0x44c] ss:$16 sps:$4 sm:$0xff]  }
  0x7b   :  { %1544 = vmatpush2.bf16.msra.mxu0 %v5945_v5  ;;  %v6037_v5 = vld [vmem:[%s8879_s2 + $0x348] ss:$16 sps:$4 sm:$0xff]  }
  0x7c   :  { %1610 = vmatpush1.bf16.msra.mxu1 %v5948_v8  ;;  %1545 = vmatprep.subr.bf16.mxu0 %v5953_v9  ;;  %v6040_v8 = vld [vmem:[%s8879_s2 + $0x448] ss:$16 sps:$4 sm:$0xff]   ;;  %v6045_v9 = vld [vmem:[%s8879_s2 + $0x32c] ss:$16 sps:$4 sm:$0xff]  }
  0x7d   :  { %1611 = vmatprep.subr.bf16.mxu1 %v5956_v10  ;;  %v6048_v10 = vld [vmem:[%s8879_s2 + $0x42c] ss:$16 sps:$4 sm:$0xff]  }
  0x7f   :  { %1546 = vmatpush2.bf16.msra.mxu0 %v5951_v11  ;;  %v6043_v11 = vld [vmem:[%s8879_s2 + $0x328] ss:$16 sps:$4 sm:$0xff]  }
  0x80   :  { %1612 = vmatpush1.bf16.msra.mxu1 %v5954_v12  ;;  %1638 = vmatprep.subr.bf16.mxu0 %v5964_v14  ;;  %v6046_v12 = vld [vmem:[%s8879_s2 + $0x428] ss:$16 sps:$4 sm:$0xff]   ;;  %v6054_v14 = vld [vmem:[%s8879_s2 + $0x40c] ss:$16 sps:$4 sm:$0xff]  }
  0x81   :  { %1613 = vmatprep.subr.bf16.mxu1 %v5961_v13  ;;  %v6051_v13 = vld [vmem:[%s8879_s2 + $0x30c] ss:$16 sps:$4 sm:$0xff]  }
  0x82   :  { %1548 = vmatmul.mubr.bf16.vlgmr.msra.gmra.mxu0 %v7208_v15 }
  0x83   :  { %1639 = vmatpush1.bf16.msra.mxu0 %v5962_v18  ;;  %1670 = vmatprep.mubr.bf16.mxu0 %v6932_v51  ;;  %v5982_v51 = vld [vmem:[%s8879_s2 + $0x28c] ss:$16 sps:$4 sm:$0xff]   ;;  %v6052_v18 = vld [vmem:[%s8879_s2 + $0x408] ss:$16 sps:$4 sm:$0xff]  }
  0x84   :  { %1614 = vmatpush2.bf16.msra.mxu1 %v5959_v17  ;;  %1640 = vmatprep.subr.bf16.mxu0 %v5970_v20  ;;  %v6049_v17 = vld [vmem:[%s8879_s2 + $0x308] ss:$16 sps:$4 sm:$0xff]   ;;  %v6060_v20 = vld [vmem:[%s8879_s2 + $0x6ec] ss:$16 sps:$4 sm:$0xff]  }
  0x85   :  { %1615 = vmatprep.subr.bf16.mxu1 %v5967_v19  ;;  %v6057_v19 = vld [vmem:[%s8879_s2 + $0x5ec] ss:$16 sps:$4 sm:$0xff]  }
  0x87   :  { %1641 = vmatpush1.bf16.msra.mxu0 %v5968_v22  ;;  %v6058_v22 = vld [vmem:[%s8879_s2 + $0x6e8] ss:$16 sps:$4 sm:$0xff]  }
  0x88   :  { %1616 = vmatpush2.bf16.msra.mxu1 %v5965_v21  ;;  %1642 = vmatprep.subr.bf16.mxu0 %v5976_v24  ;;  %v6055_v21 = vld [vmem:[%s8879_s2 + $0x5e8] ss:$16 sps:$4 sm:$0xff]   ;;  %v6066_v24 = vld [vmem:[%s8879_s2 + $0x6cc] ss:$16 sps:$4 sm:$0xff]  }
  0x89   :  { %1617 = vmatprep.subr.bf16.mxu1 %v5973_v23  ;;  %v6063_v23 = vld [vmem:[%s8879_s2 + $0x5cc] ss:$16 sps:$4 sm:$0xff]  }
  0x8b   :  { %1643 = vmatpush1.bf16.msra.mxu0 %v5974_v26  ;;  %v6064_v26 = vld [vmem:[%s8879_s2 + $0x6c8] ss:$16 sps:$4 sm:$0xff]  }
  0x8c   :  { %1618 = vmatpush2.bf16.msra.mxu1 %v5971_v25  ;;  %1644 = vmatprep.subr.bf16.mxu0 %v5982_v51  ;;  %v6061_v25 = vld [vmem:[%s8879_s2 + $0x5c8] ss:$16 sps:$4 sm:$0xff]   ;;  %v6072_v51 = vld [vmem:[%s8879_s2 + $0x6ac] ss:$16 sps:$4 sm:$0xff]  }
  0x8d   :  { %1619 = vmatprep.subr.bf16.mxu1 %v5979_v27  ;;  %v6069_v27 = vld [vmem:[%s8879_s2 + $0x5ac] ss:$16 sps:$4 sm:$0xff]  }
  0x8f   :  { %1645 = vmatpush1.bf16.msra.mxu0 %v5980_v29  ;;  %v6075_v29 = vld [vmem:[%s8879_s2 + $0x58c] ss:$16 sps:$4 sm:$0xff]  }
  0x90   :  { %1620 = vmatpush2.bf16.msra.mxu1 %v5977_v28  ;;  %1646 = vmatprep.subr.bf16.mxu0 %v5988_v31  ;;  %v6067_v28 = vld [vmem:[%s8879_s2 + $0x5a8] ss:$16 sps:$4 sm:$0xff]  }
  0x91   :  { %1621 = vmatprep.subr.bf16.mxu1 %v5985_v30  ;;  %v6078_v30 = vld [vmem:[%s8879_s2 + $0x68c] ss:$16 sps:$4 sm:$0xff]   ;;  %v6073_v31 = vld [vmem:[%s8879_s2 + $0x588] ss:$16 sps:$4 sm:$0xff]  }
  0x93   :  { %1647 = vmatpush1.bf16.msra.mxu0 %v5986_v33  ;;  %v6084_v33 = vld [vmem:[%s8879_s2 + $0x66c] ss:$16 sps:$4 sm:$0xff]  }
  0x94   :  { %1622 = vmatpush2.bf16.msra.mxu1 %v5983_v32  ;;  %1648 = vmatprep.subr.bf16.mxu0 %v5994_v36  ;;  %v6081_v32 = vld [vmem:[%s8879_s2 + $0x56c] ss:$16 sps:$4 sm:$0xff]   ;;  %v6082_v36 = vld [vmem:[%s8879_s2 + $0x668] ss:$16 sps:$4 sm:$0xff]  }
  0x95   :  { %1623 = vmatprep.subr.bf16.mxu1 %v5991_v34  ;;  %v6079_v34 = vld [vmem:[%s8879_s2 + $0x568] ss:$16 sps:$4 sm:$0xff]  }
  0x97   :  { %1649 = vmatpush1.bf16.msra.mxu0 %v5992_v38  ;;  %v6090_v38 = vld [vmem:[%s8879_s2 + $0x64c] ss:$16 sps:$4 sm:$0xff]  }
  0x98   :  { %1624 = vmatpush2.bf16.msra.mxu1 %v5989_v37  ;;  %1650 = vmatprep.subr.bf16.mxu0 %v6000_v40  ;;  %v6087_v37 = vld [vmem:[%s8879_s2 + $0x54c] ss:$16 sps:$4 sm:$0xff]   ;;  %v6088_v40 = vld [vmem:[%s8879_s2 + $0x648] ss:$16 sps:$4 sm:$0xff]  }
  0x99   :  { %1625 = vmatprep.subr.bf16.mxu1 %v5997_v39  ;;  %v6085_v39 = vld [vmem:[%s8879_s2 + $0x548] ss:$16 sps:$4 sm:$0xff]  }
  0x9b   :  { %1651 = vmatpush1.bf16.msra.mxu0 %v5998_v42  ;;  %v6096_v42 = vld [vmem:[%s8879_s2 + $0x62c] ss:$16 sps:$4 sm:$0xff]  }
  0x9c   :  { %1626 = vmatpush2.bf16.msra.mxu1 %v5995_v41  ;;  %1652 = vmatprep.subr.bf16.mxu0 %v6006_v45  ;;  %v6093_v41 = vld [vmem:[%s8879_s2 + $0x52c] ss:$16 sps:$4 sm:$0xff]   ;;  %v6094_v45 = vld [vmem:[%s8879_s2 + $0x628] ss:$16 sps:$4 sm:$0xff]  }
  0x9d   :  { %1627 = vmatprep.subr.bf16.mxu1 %v6003_v43  ;;  %v6091_v43 = vld [vmem:[%s8879_s2 + $0x528] ss:$16 sps:$4 sm:$0xff]  }
  0x9f   :  { %1653 = vmatpush1.bf16.msra.mxu0 %v6004_v48  ;;  %v6102_v48 = vld [vmem:[%s8879_s2 + $0x60c] ss:$16 sps:$4 sm:$0xff]  }
  0xa0   :  { %1628 = vmatpush2.bf16.msra.mxu1 %v6001_v46  ;;  %1654 = vmatprep.subr.bf16.mxu0 %v6009_v49  ;;  %v6099_v46 = vld [vmem:[%s8879_s2 + $0x50c] ss:$16 sps:$4 sm:$0xff]   ;;  %v6097_v49 = vld [vmem:[%s8879_s2 + $0x508] ss:$16 sps:$4 sm:$0xff]  }
  0xa1   :  { %1679 = vmatprep.subr.bf16.mxu1 %v6012_v50  ;;  %v6100_v50 = vld [vmem:[%s8879_s2 + $0x608] ss:$16 sps:$4 sm:$0xff]  }
  0xa3   :  { %1630 = vmatmul.mubr.bf16.vlgmr.msra.gmra.mxu1 %v6990_v6  ;;  %1655 = vmatpush2.bf16.msra.mxu0 %v6007_v52  ;;  %v6022_v6 = vld [vmem:[%s8879_s2 + $0x4a8] ss:$16 sps:$4 sm:$0xff]   ;;  %v6105_v52 = vld [vmem:[%s8881_s4 + $0xe4] ss:$16 sps:$4 sm:$0xff]  }
  0xa4   :  { %1680 = vmatpush1.bf16.msra.mxu1 %v6010_v53  ;;  %1656 = vmatprep.subr.bf16.mxu0 %v6015_v54  ;;  %v6103_v53 = vld [vmem:[%s8881_s4 + $0xe0] ss:$16 sps:$4 sm:$0xff]   ;;  %v6108_v54 = vld [vmem:[%s8881_s4 + $0xc4] ss:$16 sps:$4 sm:$0xff]  }
  0xa5   :  { %1681 = vmatprep.subr.bf16.mxu1 %v6018_v55  ;;  %1711 = vmatprep.mubr.bf16.mxu1 %v7079_v35  ;;  %v6025_v35 = vld [vmem:[%s8879_s2 + $0x388] ss:$16 sps:$4 sm:$0xff]   ;;  %v6106_v55 = vld [vmem:[%s8881_s4 + $0xc0] ss:$16 sps:$4 sm:$0xff]  }
  0xa7   :  { %1657 = vmatpush2.bf16.msra.mxu0 %v6013_v56  ;;  %v6111_v56 = vld [vmem:[%s8881_s4 + $0xa4] ss:$16 sps:$4 sm:$0xff]  }
  0xa8   :  { %1682 = vmatpush1.bf16.msra.mxu1 %v6016_v47  ;;  %1658 = vmatprep.subr.bf16.mxu0 %v6021_v57  ;;  %v6109_v47 = vld [vmem:[%s8881_s4 + $0xa0] ss:$16 sps:$4 sm:$0xff]  }
  0xa9   :  { %1683 = vmatprep.subr.bf16.mxu1 %v6024_v58  ;;  %v6175_v57 = vld [vmem:[%s8881_s4 + $0x2e0] ss:$16 sps:$4 sm:$0xff]   ;;  %v6177_v58 = vld [vmem:[%s8881_s4 + $0x2e4] ss:$16 sps:$4 sm:$0xff]  }
  0xab   :  { %1659 = vmatpush2.bf16.msra.mxu0 %v6019_v59  ;;  %v6117_v59 = vld [vmem:[%s8881_s4 + $0x64] ss:$16 sps:$4 sm:$0xff]  }
  0xac   :  { %1684 = vmatpush1.bf16.msra.mxu1 %v6022_v6  ;;  %1660 = vmatprep.subr.bf16.mxu0 %v6027_v60  ;;  %v6115_v6 = vld [vmem:[%s8881_s4 + $0x60] ss:$16 sps:$4 sm:$0xff]  }
  0xad   :  { %1685 = vmatprep.subr.bf16.mxu1 %v6030_v61  ;;  %v6181_v60 = vld [vmem:[%s8881_s4 + $0x2c0] ss:$16 sps:$4 sm:$0xff]   ;;  %v6183_v61 = vld [vmem:[%s8881_s4 + $0x2c4] ss:$16 sps:$4 sm:$0xff]  }
  0xaf   :  { %1661 = vmatpush2.bf16.msra.mxu0 %v6025_v35  ;;  %v6120_v35 = vld [vmem:[%s8881_s4 + $0x44] ss:$16 sps:$4 sm:$0xff]  }
  0xb0   :  { %1686 = vmatpush1.bf16.msra.mxu1 %v6028_v62  ;;  %1662 = vmatprep.subr.bf16.mxu0 %v6033_v63  ;;  %v6118_v62 = vld [vmem:[%s8881_s4 + $0x40] ss:$16 sps:$4 sm:$0xff]  }
  0xb1   :  { %1687 = vmatprep.subr.bf16.mxu1 %v6036_v0  ;;  %v6187_v63 = vld [vmem:[%s8881_s4 + $0x2a0] ss:$16 sps:$4 sm:$0xff]   ;;  %v6189_v0 = vld [vmem:[%s8881_s4 + $0x2a4] ss:$16 sps:$4 sm:$0xff]  }
  0xb3   :  { %1663 = vmatpush2.bf16.msra.mxu0 %v6031_v1  ;;  %v6123_v1 = vld [vmem:[%s8881_s4 + $0x24] ss:$16 sps:$4 sm:$0xff]  }
  0xb4   :  { %1688 = vmatpush1.bf16.msra.mxu1 %v6034_v2  ;;  %1664 = vmatprep.subr.bf16.mxu0 %v6039_v3  ;;  %v6121_v2 = vld [vmem:[%s8881_s4 + $0x20] ss:$16 sps:$4 sm:$0xff]  }
  0xb5   :  { %1689 = vmatprep.subr.bf16.mxu1 %v6042_v4  ;;  %v6193_v3 = vld [vmem:[%s8881_s4 + $0x280] ss:$16 sps:$4 sm:$0xff]   ;;  %v6195_v4 = vld [vmem:[%s8881_s4 + $0x284] ss:$16 sps:$4 sm:$0xff]  }
  0xb7   :  { %1665 = vmatpush2.bf16.msra.mxu0 %v6037_v5  ;;  %v6126_v5 = vld [vmem:[%s8881_s4 + $0x4] ss:$16 sps:$4 sm:$0xff]  }
  0xb8   :  { %1690 = vmatpush1.bf16.msra.mxu1 %v6040_v8  ;;  %1666 = vmatprep.subr.bf16.mxu0 %v6045_v9  ;;  %v6124_v8 = vld [vmem:[%s8881_s4] ss:$16 sps:$4 sm:$0xff]  }
  0xb9   :  { %1691 = vmatprep.subr.bf16.mxu1 %v6048_v10  ;;  %v6199_v9 = vld [vmem:[%s8881_s4 + $0x260] ss:$16 sps:$4 sm:$0xff]   ;;  %v6201_v10 = vld [vmem:[%s8881_s4 + $0x264] ss:$16 sps:$4 sm:$0xff]  }
  0xbb   :  { %1667 = vmatpush2.bf16.msra.mxu0 %v6043_v11  ;;  %v6129_v11 = vld [vmem:[%s8881_s4 + $0x1e4] ss:$16 sps:$4 sm:$0xff]  }
  0xbc   :  { %1692 = vmatpush1.bf16.msra.mxu1 %v6046_v12  ;;  %1668 = vmatprep.subr.bf16.mxu0 %v6051_v13  ;;  %v6127_v12 = vld [vmem:[%s8881_s4 + $0x1e0] ss:$16 sps:$4 sm:$0xff]  }
  0xbd   :  { %1693 = vmatprep.subr.bf16.mxu1 %v6054_v14  ;;  %v6205_v13 = vld [vmem:[%s8881_s4 + $0x240] ss:$16 sps:$4 sm:$0xff]   ;;  %v6207_v14 = vld [vmem:[%s8881_s4 + $0x244] ss:$16 sps:$4 sm:$0xff]  }
  0xbf   :  { %1669 = vmatpush2.bf16.msra.mxu0 %v6049_v17  ;;  %v6132_v17 = vld [vmem:[%s8881_s4 + $0x1c4] ss:$16 sps:$4 sm:$0xff]  }
  0xc0   :  { %1694 = vmatpush1.bf16.msra.mxu1 %v6052_v18  ;;  %1720 = vmatprep.subr.bf16.mxu0 %v6060_v20  ;;  %v6130_v20 = vld [vmem:[%s8881_s4 + $0x1c0] ss:$16 sps:$4 sm:$0xff]  }
  0xc1   :  { %1695 = vmatprep.subr.bf16.mxu1 %v6057_v19 }
  0xc2   :  { %1671 = vmatmul.mubr.bf16.vlgmr.msra.gmra.mxu0 %v6992_v7  ;;  %v6070_v7 = vld [vmem:[%s8879_s2 + $0x6a8] ss:$16 sps:$4 sm:$0xff]  }
  0xc3   :  { %1721 = vmatpush1.bf16.msra.mxu0 %v6058_v22  ;;  %1752 = vmatprep.mubr.bf16.mxu0 %v6719_v16  ;;  %v6076_v16 = vld [vmem:[%s8879_s2 + $0x688] ss:$16 sps:$4 sm:$0xff]  }
  0xc4   :  { %1696 = vmatpush2.bf16.msra.mxu1 %v6055_v21  ;;  %1722 = vmatprep.subr.bf16.mxu0 %v6066_v24  ;;  %v6213_v24 = vld [vmem:[%s8881_s4 + $0x224] ss:$16 sps:$4 sm:$0xff]  }
  0xc5   :  { %1697 = vmatprep.subr.bf16.mxu1 %v6063_v23  ;;  %v6135_v23 = vld [vmem:[%s8881_s4 + $0x1a4] ss:$16 sps:$4 sm:$0xff]  }
  0xc7   :  { %1723 = vmatpush1.bf16.msra.mxu0 %v6064_v26 }
  0xc8   :  { %1698 = vmatpush2.bf16.msra.mxu1 %v6061_v25  ;;  %1724 = vmatprep.subr.bf16.mxu0 %v6072_v51  ;;  %v6211_v25 = vld [vmem:[%s8881_s4 + $0x220] ss:$16 sps:$4 sm:$0xff]  }
  0xc9   :  { %1699 = vmatprep.subr.bf16.mxu1 %v6069_v27  ;;  %v6133_v51 = vld [vmem:[%s8881_s4 + $0x1a0] ss:$16 sps:$4 sm:$0xff]  }
  0xcb   :  { %1725 = vmatpush1.bf16.msra.mxu0 %v6070_v7 }
  0xcc   :  { %1700 = vmatpush2.bf16.msra.mxu1 %v6067_v28  ;;  %1726 = vmatprep.subr.bf16.mxu0 %v6078_v30  ;;  %v6217_v30 = vld [vmem:[%s8881_s4 + $0x200] ss:$16 sps:$4 sm:$0xff]  }
  0xcd   :  { %1701 = vmatprep.subr.bf16.mxu1 %v6075_v29  ;;  %v6138_v29 = vld [vmem:[%s8881_s4 + $0x184] ss:$16 sps:$4 sm:$0xff]  }
  0xcf   :  { %1727 = vmatpush1.bf16.msra.mxu0 %v6076_v16  ;;  %v6136_v16 = vld [vmem:[%s8881_s4 + $0x180] ss:$16 sps:$4 sm:$0xff]  }
  0xd0   :  { %1702 = vmatpush2.bf16.msra.mxu1 %v6073_v31  ;;  %1728 = vmatprep.subr.bf16.mxu0 %v6084_v33  ;;  %v6219_v31 = vld [vmem:[%s8881_s4 + $0x204] ss:$16 sps:$4 sm:$0xff]  }
  0xd1   :  { %1703 = vmatprep.subr.bf16.mxu1 %v6081_v32  ;;  %v6223_v32 = vld [vmem:[%s8881_s4 + $0x3e0] ss:$16 sps:$4 sm:$0xff]   ;;  %v6225_v33 = vld [vmem:[%s8881_s4 + $0x3e4] ss:$16 sps:$4 sm:$0xff]  }
  0xd3   :  { %1729 = vmatpush1.bf16.msra.mxu0 %v6082_v36  ;;  %v6228_v36 = vld [vmem:[%s8881_s4 + $0x3c4] ss:$16 sps:$4 sm:$0xff]  }
  0xd4   :  { %1704 = vmatpush2.bf16.msra.mxu1 %v6079_v34  ;;  %1730 = vmatprep.subr.bf16.mxu0 %v6090_v38  ;;  %v6141_v34 = vld [vmem:[%s8881_s4 + $0x164] ss:$16 sps:$4 sm:$0xff]   ;;  %v6226_v38 = vld [vmem:[%s8881_s4 + $0x3c0] ss:$16 sps:$4 sm:$0xff]  }
  0xd5   :  { %1705 = vmatprep.subr.bf16.mxu1 %v6087_v37  ;;  %v6139_v37 = vld [vmem:[%s8881_s4 + $0x160] ss:$16 sps:$4 sm:$0xff]  }
  0xd7   :  { %1731 = vmatpush1.bf16.msra.mxu0 %v6088_v40  ;;  %v6231_v40 = vld [vmem:[%s8881_s4 + $0x3a4] ss:$16 sps:$4 sm:$0xff]  }
  0xd8   :  { %1706 = vmatpush2.bf16.msra.mxu1 %v6085_v39  ;;  %1732 = vmatprep.subr.bf16.mxu0 %v6096_v42  ;;  %v6144_v39 = vld [vmem:[%s8881_s4 + $0x144] ss:$16 sps:$4 sm:$0xff]   ;;  %v6229_v42 = vld [vmem:[%s8881_s4 + $0x3a0] ss:$16 sps:$4 sm:$0xff]  }
  0xd9   :  { %1707 = vmatprep.subr.bf16.mxu1 %v6093_v41  ;;  %v6142_v41 = vld [vmem:[%s8881_s4 + $0x140] ss:$16 sps:$4 sm:$0xff]  }
  0xdb   :  { %1733 = vmatpush1.bf16.msra.mxu0 %v6094_v45  ;;  %v6234_v45 = vld [vmem:[%s8881_s4 + $0x384] ss:$16 sps:$4 sm:$0xff]  }
  0xdc   :  { %1708 = vmatpush2.bf16.msra.mxu1 %v6091_v43  ;;  %1734 = vmatprep.subr.bf16.mxu0 %v6102_v48  ;;  %v6147_v43 = vld [vmem:[%s8881_s4 + $0x124] ss:$16 sps:$4 sm:$0xff]   ;;  %v6232_v48 = vld [vmem:[%s8881_s4 + $0x380] ss:$16 sps:$4 sm:$0xff]  }
  0xdd   :  { %1709 = vmatprep.subr.bf16.mxu1 %v6099_v46  ;;  %v6145_v46 = vld [vmem:[%s8881_s4 + $0x120] ss:$16 sps:$4 sm:$0xff]  }
  0xdf   :  { %1735 = vmatpush1.bf16.msra.mxu0 %v6100_v50  ;;  %v6237_v50 = vld [vmem:[%s8881_s4 + $0x364] ss:$16 sps:$4 sm:$0xff]  }
  0xe0   :  { %1710 = vmatpush2.bf16.msra.mxu1 %v6097_v49  ;;  %2559 = vmatprep.subr.bf16.mxu0 %v6105_v52  ;;  %v6150_v49 = vld [vmem:[%s8881_s4 + $0x104] ss:$16 sps:$4 sm:$0xff]   ;;  %v6148_v52 = vld [vmem:[%s8881_s4 + $0x100] ss:$16 sps:$4 sm:$0xff]  }
  0xe1   :  { %2600 = vmatprep.subr.bf16.mxu1 %v6177_v58 }
  0xe2   :  { %1753 = vmatmul.mubr.bf16.vlgmr.msra.gmra.mxu0 %v7109_v44  ;;  %v6114_v44 = vld [vmem:[%s8881_s4 + $0x84] ss:$16 sps:$4 sm:$0xff]  }
  0xe3   :  { %1712 = vmatmul.mubr.bf16.vlgmr.msra.gmra.mxu1 %v7208_v15  ;;  %2560 = vmatpush1.bf16.msra.mxu0 %v6103_v53  ;;  %v6112_v15 = vld [vmem:[%s8881_s4 + $0x80] ss:$16 sps:$4 sm:$0xff]  }
  0xe4   :  { %2561 = vmatprep.subr.bf16.mxu0 %v6108_v54  ;;  %2601 = vmatpush1.bf16.msra.mxu1 %v6175_v57  ;;  %v6235_v53 = vld [vmem:[%s8881_s4 + $0x360] ss:$16 sps:$4 sm:$0xff]   ;;  %v6153_v54 = vld [vmem:[%s8881_s4 + $0xec] ss:$16 sps:$4 sm:$0xff]  }
  0xe5   :  { %2602 = vmatprep.subr.bf16.mxu1 %v6183_v61  ;;  %v6241_v57 = vld [vmem:[%s8881_s4 + $0x320] ss:$16 sps:$4 sm:$0xff]   ;;  %v6249_v61 = vld [vmem:[%s8881_s4 + $0x2ec] ss:$16 sps:$4 sm:$0xff]  }
  0xe7   :  { %2562 = vmatpush1.bf16.msra.mxu0 %v6106_v55  ;;  %v6240_v55 = vld [vmem:[%s8881_s4 + $0x344] ss:$16 sps:$4 sm:$0xff]  }
  0xe8   :  { %2563 = vmatprep.subr.bf16.mxu0 %v6111_v56  ;;  %2603 = vmatpush1.bf16.msra.mxu1 %v6181_v60  ;;  %v6238_v56 = vld [vmem:[%s8881_s4 + $0x340] ss:$16 sps:$4 sm:$0xff]  }
  0xe9   :  { %2604 = vmatprep.subr.bf16.mxu1 %v6189_v0  ;;  %v6244_v60 = vld [vmem:[%s8881_s4 + $0x300] ss:$16 sps:$4 sm:$0xff]  }
  0xea   :  { %v7714_v0 = vld [vmem:[%s8882_s3] sm:$0xf] }
  0xeb   :  { %2564 = vmatpush1.bf16.msra.mxu0 %v6109_v47 }
  0xec   :  { %2565 = vmatprep.subr.bf16.mxu0 %v6114_v44  ;;  %2605 = vmatpush1.bf16.msra.mxu1 %v6187_v63 }
  0xed   :  { %2606 = vmatprep.subr.bf16.mxu1 %v6195_v4 }
  0xef   :  { %2566 = vmatpush1.bf16.msra.mxu0 %v6112_v15  ;;  %v6243_v15 = vld [vmem:[%s8881_s4 + $0x324] ss:$16 sps:$4 sm:$0xff]  }
  0xf0   :  { %2567 = vmatprep.subr.bf16.mxu0 %v6117_v59  ;;  %2607 = vmatpush1.bf16.msra.mxu1 %v6193_v3 }
  0xf1   :  { %2608 = vmatprep.subr.bf16.mxu1 %v6201_v10 }
  0xf3   :  { %2568 = vmatpush1.bf16.msra.mxu0 %v6115_v6  ;;  %v6246_v6 = vld [vmem:[%s8881_s4 + $0x304] ss:$16 sps:$4 sm:$0xff]  }
  0xf4   :  { %2569 = vmatprep.subr.bf16.mxu0 %v6120_v35  ;;  %2609 = vmatpush1.bf16.msra.mxu1 %v6199_v9  ;;  %v268_v35 = vlaneseq }
  0xf5   :  { %2610 = vmatprep.subr.bf16.mxu1 %v6207_v14 }
  0xf7   :  { %2570 = vmatpush1.bf16.msra.mxu0 %v6118_v62  ;;  %v7706_v62 = vshrl.u32 %v268_v35, 7 }
  0xf8   :  { %2571 = vmatprep.subr.bf16.mxu0 %v6123_v1  ;;  %2611 = vmatpush1.bf16.msra.mxu1 %v6205_v13 }
  0xf9   :  { %2612 = vmatprep.subr.bf16.mxu1 %v6213_v24  ;;  %v7709_v63 = vsub.s32 0, %v7706_v62  ;;  %v7717_v1 = vsub.s32 1, %v7706_v62 }
  0xfb   :  { %2572 = vmatpush1.bf16.msra.mxu0 %v6121_v2  ;;  %v271_v2 = vrot.slane %v7714_v0, %v7709_v63  ;;  %v275_v3 = vrot.slane %v7714_v0, %v7717_v1 }
  0xfc   :  { %2573 = vmatprep.subr.bf16.mxu0 %v6126_v5  ;;  %2613 = vmatpush1.bf16.msra.mxu1 %v6211_v25 }
  0xfd   :  { %2614 = vmatprep.subr.bf16.mxu1 %v6219_v31  ;;  %v6168_v31 = vld [vmem:[%s8881_s4 + $0x4c] ss:$16 sps:$4 sm:$0xff]  }
  0xff   :  { %2574 = vmatpush1.bf16.msra.mxu0 %v6124_v8 }
 0x100   :  { %2575 = vmatprep.subr.bf16.mxu0 %v6129_v11  ;;  %2615 = vmatpush1.bf16.msra.mxu1 %v6217_v30  ;;  %v6163_v30 = vld [vmem:[%s8881_s4 + $0x68] ss:$16 sps:$4 sm:$0xff]  }
 0x101   :  { %2616 = vmatprep.subr.bf16.mxu1 %v6225_v33 }
 0x102   :  { %v7593_v18 = vpop.f32.mrf.mxu0 }
 0x103   :  { %v7595_v19 = vpop.f32.mrf.mxu1  ;;  %2576 = vmatpush2.bf16.msra.mxu0 %v6127_v12  ;;  %v1468_v4 = vadd.f32 %v7593_v18, %v271_v2  ;;  %v6151_v18 = vld [vmem:[%s8881_s4 + $0xe8] ss:$16 sps:$4 sm:$0xff]  }
 0x104   :  { %v7600_v21 = vpop.f32.mrf.mxu0  ;;  %2577 = vmatprep.subr.bf16.mxu0 %v6132_v17  ;;  %2617 = vmatpush2.bf16.msra.mxu1 %v6223_v32  ;;  %v6171_v32 = vld [vmem:[%s8881_s4 + $0x2c] ss:$16 sps:$4 sm:$0xff]  }
 0x105   :  { %v7602_v22 = vpop.f32.mrf.mxu1  ;;  %2618 = vmatprep.subr.bf16.mxu1 %v6228_v36  ;;  %v1470_v5 = vadd.f32 %v7600_v21, %v275_v3  ;;  %v1509_v8 = vadd.f32 %v7595_v19, %v1468_v4  ;;  %v6156_v19 = vld [vmem:[%s8881_s4 + $0xcc] ss:$16 sps:$4 sm:$0xff]  }
 0x106   :  { %v1471_v26 = vpop.f32.mrf.mxu0 }
 0x107   :  { %v1512_v27 = vpop.f32.mrf.mxu1  ;;  %2578 = vmatpush2.bf16.msra.mxu0 %v6130_v20  ;;  %v1511_v10 = vadd.f32 %v7602_v22, %v1470_v5  ;;  %v6154_v22 = vld [vmem:[%s8881_s4 + $0xc8] ss:$16 sps:$4 sm:$0xff]  }
 0x108   :  { %v1472_v28 = vpop.f32.mrf.mxu0  ;;  %2579 = vmatprep.subr.bf16.mxu0 %v6135_v23  ;;  %2619 = vmatpush2.bf16.msra.mxu1 %v6226_v38  ;;  %v6159_v27 = vld [vmem:[%s8881_s4 + $0xac] ss:$16 sps:$4 sm:$0xff]  }
 0x109   :  { %v1513_v7 = vpop.f32.mrf.mxu1  ;;  %2620 = vmatprep.subr.bf16.mxu1 %v6231_v40  ;;  %v6162_v28 = vld [vmem:[%s8881_s4 + $0x8c] ss:$16 sps:$4 sm:$0xff]  }
 0x10a   :  { %v6160_v7 = vld [vmem:[%s8881_s4 + $0x88] ss:$16 sps:$4 sm:$0xff]  }
 0x10b   :  { %2580 = vmatpush2.bf16.msra.mxu0 %v6133_v51  ;;  %v6157_v51 = vld [vmem:[%s8881_s4 + $0xa8] ss:$16 sps:$4 sm:$0xff]  }
 0x10c   :  { %2581 = vmatprep.subr.bf16.mxu0 %v6138_v29  ;;  %2621 = vmatpush2.bf16.msra.mxu1 %v6229_v42  ;;  %v6165_v29 = vld [vmem:[%s8881_s4 + $0x6c] ss:$16 sps:$4 sm:$0xff]   ;;  %v6178_v42 = vld [vmem:[%s8881_s4 + $0x1e8] ss:$16 sps:$4 sm:$0xff]  }
 0x10d   :  { %2622 = vmatprep.subr.bf16.mxu1 %v6234_v45  ;;  %v6184_v45 = vld [vmem:[%s8881_s4 + $0x1c8] ss:$16 sps:$4 sm:$0xff]  }
 0x10f   :  { %2582 = vmatpush2.bf16.msra.mxu0 %v6136_v16  ;;  %v6166_v16 = vld [vmem:[%s8881_s4 + $0x48] ss:$16 sps:$4 sm:$0xff]  }
 0x110   :  { %2583 = vmatprep.subr.bf16.mxu0 %v6141_v34  ;;  %2623 = vmatpush2.bf16.msra.mxu1 %v6232_v48  ;;  %v6169_v34 = vld [vmem:[%s8881_s4 + $0x28] ss:$16 sps:$4 sm:$0xff]  }
 0x111   :  { %2624 = vmatprep.subr.bf16.mxu1 %v6237_v50  ;;  %v6190_v48 = vld [vmem:[%s8881_s4 + $0x1a8] ss:$16 sps:$4 sm:$0xff]  }
 0x112   :  { %v6196_v50 = vld [vmem:[%s8881_s4 + $0x188] ss:$16 sps:$4 sm:$0xff]  }
 0x113   :  { %2584 = vmatpush2.bf16.msra.mxu0 %v6139_v37  ;;  %v6174_v37 = vld [vmem:[%s8881_s4 + $0xc] ss:$16 sps:$4 sm:$0xff]  }
 0x114   :  { %2585 = vmatprep.subr.bf16.mxu0 %v6144_v39  ;;  %2625 = vmatpush2.bf16.msra.mxu1 %v6235_v53  ;;  %v6172_v39 = vld [vmem:[%s8881_s4 + $0x8] ss:$16 sps:$4 sm:$0xff]  }
 0x115   :  { %2626 = vmatprep.subr.bf16.mxu1 %v6240_v55  ;;  %v6202_v53 = vld [vmem:[%s8881_s4 + $0x168] ss:$16 sps:$4 sm:$0xff]  }
 0x116   :  { %v6208_v55 = vld [vmem:[%s8881_s4 + $0x148] ss:$16 sps:$4 sm:$0xff]  }
 0x117   :  { %2586 = vmatpush2.bf16.msra.mxu0 %v6142_v41  ;;  %v6180_v41 = vld [vmem:[%s8881_s4 + $0x1ec] ss:$16 sps:$4 sm:$0xff]  }
 0x118   :  { %2587 = vmatprep.subr.bf16.mxu0 %v6147_v43  ;;  %2627 = vmatpush2.bf16.msra.mxu1 %v6238_v56  ;;  %v6186_v43 = vld [vmem:[%s8881_s4 + $0x1cc] ss:$16 sps:$4 sm:$0xff]  }
 0x119   :  { %2628 = vmatprep.subr.bf16.mxu1 %v6243_v15  ;;  %v6216_v56 = vld [vmem:[%s8881_s4 + $0x12c] ss:$16 sps:$4 sm:$0xff]  }
 0x11b   :  { %2588 = vmatpush2.bf16.msra.mxu0 %v6145_v46  ;;  %v6192_v46 = vld [vmem:[%s8881_s4 + $0x1ac] ss:$16 sps:$4 sm:$0xff]  }
 0x11c   :  { %2589 = vmatprep.subr.bf16.mxu0 %v6150_v49  ;;  %2629 = vmatpush2.bf16.msra.mxu1 %v6241_v57  ;;  %v6198_v49 = vld [vmem:[%s8881_s4 + $0x18c] ss:$16 sps:$4 sm:$0xff]  }
 0x11d   :  { %2630 = vmatprep.subr.bf16.mxu1 %v6246_v6  ;;  %v6222_v57 = vld [vmem:[%s8881_s4 + $0x10c] ss:$16 sps:$4 sm:$0xff]  }
 0x11f   :  { %2590 = vmatpush2.bf16.msra.mxu0 %v6148_v52  ;;  %v6204_v52 = vld [vmem:[%s8881_s4 + $0x16c] ss:$16 sps:$4 sm:$0xff]  }
 0x120   :  { %2641 = vmatprep.subr.bf16.mxu0 %v6153_v54  ;;  %2631 = vmatpush2.bf16.msra.mxu1 %v6244_v60  ;;  %v6210_v54 = vld [vmem:[%s8881_s4 + $0x14c] ss:$16 sps:$4 sm:$0xff]   ;;  %v7825_v60 = vsub.s32 2, %v7706_v62 }
 0x121   :  { %2682 = vmatprep.subr.bf16.mxu1 %v6249_v61  ;;  %v7828_v61 = vsub.s32 3, %v7706_v62 }
 0x122   :  { %v279_v35 = vrot.slane %v7714_v0, %v7825_v60 }
 0x123   :  { %v1590_v47 = vpop.f32.mrf.mxu1  ;;  %v283_v2 = vrot.slane %v7714_v0, %v7828_v61  ;;  %v6247_v0 = vld [vmem:[%s8881_s4 + $0x2e8] ss:$16 sps:$4 sm:$0xff]  }
 0x125   :  { %v1592_v44 = vpop.f32.mrf.mxu1 }
 0x127   :  { %v1594_v58 = vpop.f32.mrf.mxu1 }
 0x129   :  { %v1595_v59 = vpop.f32.mrf.mxu1 }
 0x12a   :  { %v6220_v59 = vld [vmem:[%s8881_s4 + $0x108] ss:$16 sps:$4 sm:$0xff]  }
 0x142   :  { %v1549_v9 = vpop.f32.mrf.mxu0 }
 0x143   :  { %v1550_v11 = vadd.f32 %v1549_v9, %v1509_v8 }
 0x144   :  { %v1551_v12 = vpop.f32.mrf.mxu0 }
 0x145   :  { %v1591_v13 = vadd.f32 %v1590_v47, %v1550_v11  ;;  %v1552_v14 = vadd.f32 %v1551_v12, %v1511_v10 }
 0x146   :  { %v1553_v17 = vpop.f32.mrf.mxu0 }
 0x147   :  { %v1593_v20 = vadd.f32 %v1592_v44, %v1552_v14  ;;  %v1761_v23 = vmax.f32 %v1591_v13, 0.0  ;;  %v6214_v44 = vld [vmem:[%s8881_s4 + $0x128] ss:$16 sps:$4 sm:$0xff]  }
 0x148   :  { %v1554_v24 = vpop.f32.mrf.mxu0 }
 0x149   :  { %v1762_v25 = vmax.f32 %v1593_v20, 0.0  ;;  %v7730_v21 = vpack.c.bf16 %v1761_v23, %v1761_v23 }
 0x14b   :  { %v1766_v26 = vpack.c.bf16 %v1762_v25, %v1762_v25 }
 0x14d   :  { %2591 = vmatprep.mubr.bf16.mxu0 %v1766_v26 }
 0x14e   :  { %2592 = vmatmul.mubr.bf16.vlgmr.msra.gmra.mxu0 %v7730_v21 }
 0x14f   :  { %2642 = vmatpush1.bf16.msra.mxu0 %v6151_v18  ;;  %2673 = vmatprep.mubr.bf16.mxu0 %v1766_v26 }
 0x150   :  { %2643 = vmatprep.subr.bf16.mxu0 %v6156_v19 }
 0x153   :  { %2644 = vmatpush1.bf16.msra.mxu0 %v6154_v22 }
 0x154   :  { %2645 = vmatprep.subr.bf16.mxu0 %v6159_v27  ;;  %v6252_v27 = vld [vmem:[%s8881_s4 + $0x2cc] ss:$16 sps:$4 sm:$0xff]  }
 0x157   :  { %2646 = vmatpush1.bf16.msra.mxu0 %v6157_v51  ;;  %v6250_v51 = vld [vmem:[%s8881_s4 + $0x2c8] ss:$16 sps:$4 sm:$0xff]  }
 0x158   :  { %2647 = vmatprep.subr.bf16.mxu0 %v6162_v28  ;;  %v6255_v28 = vld [vmem:[%s8881_s4 + $0x2ac] ss:$16 sps:$4 sm:$0xff]  }
 0x15b   :  { %2648 = vmatpush1.bf16.msra.mxu0 %v6160_v7  ;;  %v6253_v7 = vld [vmem:[%s8881_s4 + $0x2a8] ss:$16 sps:$4 sm:$0xff]  }
 0x15c   :  { %2649 = vmatprep.subr.bf16.mxu0 %v6165_v29  ;;  %v6258_v29 = vld [vmem:[%s8881_s4 + $0x28c] ss:$16 sps:$4 sm:$0xff]  }
 0x15f   :  { %2650 = vmatpush1.bf16.msra.mxu0 %v6163_v30  ;;  %v6256_v30 = vld [vmem:[%s8881_s4 + $0x288] ss:$16 sps:$4 sm:$0xff]  }
 0x160   :  { %2651 = vmatprep.subr.bf16.mxu0 %v6168_v31  ;;  %v6261_v31 = vld [vmem:[%s8881_s4 + $0x26c] ss:$16 sps:$4 sm:$0xff]  }
 0x163   :  { %v1631_v33 = vpop.f32.mrf.mxu1  ;;  %2652 = vmatpush1.bf16.msra.mxu0 %v6166_v16  ;;  %v6259_v16 = vld [vmem:[%s8881_s4 + $0x268] ss:$16 sps:$4 sm:$0xff]  }
 0x164   :  { %2653 = vmatprep.subr.bf16.mxu0 %v6171_v32  ;;  %v1632_v3 = vadd.f32 %v1631_v33, %v279_v35  ;;  %v6264_v32 = vld [vmem:[%s8881_s4 + $0x24c] ss:$16 sps:$4 sm:$0xff]   ;;  %v6262_v33 = vld [vmem:[%s8881_s4 + $0x248] ss:$16 sps:$4 sm:$0xff]  }
 0x165   :  { %v1633_v36 = vpop.f32.mrf.mxu1  ;;  %v6304_v35 = vld [vmem:[%s8883_s6 + $0xc8] ss:$16 sps:$4 sm:$0xff]  }
 0x166   :  { %v1634_v4 = vadd.f32 %v1633_v36, %v283_v2  ;;  %v6265_v36 = vld [vmem:[%s8881_s4 + $0x228] ss:$16 sps:$4 sm:$0xff]   ;;  %v6306_v2 = vld [vmem:[%s8883_s6 + $0xcc] ss:$16 sps:$4 sm:$0xff]  }
 0x167   :  { %v1635_v38 = vpop.f32.mrf.mxu1  ;;  %2654 = vmatpush1.bf16.msra.mxu0 %v6169_v34  ;;  %v6267_v34 = vld [vmem:[%s8881_s4 + $0x22c] ss:$16 sps:$4 sm:$0xff]  }
 0x168   :  { %2655 = vmatprep.subr.bf16.mxu0 %v6174_v37  ;;  %v6270_v37 = vld [vmem:[%s8881_s4 + $0x20c] ss:$16 sps:$4 sm:$0xff]   ;;  %v6268_v38 = vld [vmem:[%s8881_s4 + $0x208] ss:$16 sps:$4 sm:$0xff]  }
 0x169   :  { %v1636_v40 = vpop.f32.mrf.mxu1 }
 0x16a   :  { %v6271_v40 = vld [vmem:[%s8881_s4 + $0x3e8] ss:$16 sps:$4 sm:$0xff]  }
 0x16b   :  { %2656 = vmatpush1.bf16.msra.mxu0 %v6172_v39  ;;  %v6273_v39 = vld [vmem:[%s8881_s4 + $0x3ec] ss:$16 sps:$4 sm:$0xff]  }
 0x16c   :  { %2657 = vmatprep.subr.bf16.mxu0 %v6180_v41  ;;  %v6276_v41 = vld [vmem:[%s8881_s4 + $0x3cc] ss:$16 sps:$4 sm:$0xff]  }
 0x16f   :  { %2658 = vmatpush2.bf16.msra.mxu0 %v6178_v42  ;;  %v6274_v42 = vld [vmem:[%s8881_s4 + $0x3c8] ss:$16 sps:$4 sm:$0xff]  }
 0x170   :  { %2659 = vmatprep.subr.bf16.mxu0 %v6186_v43  ;;  %v6279_v43 = vld [vmem:[%s8881_s4 + $0x3ac] ss:$16 sps:$4 sm:$0xff]  }
 0x173   :  { %2660 = vmatpush2.bf16.msra.mxu0 %v6184_v45  ;;  %v6277_v45 = vld [vmem:[%s8881_s4 + $0x3a8] ss:$16 sps:$4 sm:$0xff]  }
 0x174   :  { %2661 = vmatprep.subr.bf16.mxu0 %v6192_v46  ;;  %v6282_v46 = vld [vmem:[%s8881_s4 + $0x38c] ss:$16 sps:$4 sm:$0xff]  }
 0x177   :  { %2662 = vmatpush2.bf16.msra.mxu0 %v6190_v48  ;;  %v6280_v48 = vld [vmem:[%s8881_s4 + $0x388] ss:$16 sps:$4 sm:$0xff]  }
 0x178   :  { %2663 = vmatprep.subr.bf16.mxu0 %v6198_v49  ;;  %v6285_v49 = vld [vmem:[%s8881_s4 + $0x36c] ss:$16 sps:$4 sm:$0xff]  }
 0x17b   :  { %2664 = vmatpush2.bf16.msra.mxu0 %v6196_v50  ;;  %v6283_v50 = vld [vmem:[%s8881_s4 + $0x368] ss:$16 sps:$4 sm:$0xff]  }
 0x17c   :  { %2665 = vmatprep.subr.bf16.mxu0 %v6204_v52  ;;  %v6288_v52 = vld [vmem:[%s8881_s4 + $0x34c] ss:$16 sps:$4 sm:$0xff]  }
 0x17f   :  { %2666 = vmatpush2.bf16.msra.mxu0 %v6202_v53  ;;  %v6286_v53 = vld [vmem:[%s8881_s4 + $0x348] ss:$16 sps:$4 sm:$0xff]  }
 0x180   :  { %2667 = vmatprep.subr.bf16.mxu0 %v6210_v54  ;;  %v6291_v54 = vld [vmem:[%s8881_s4 + $0x32c] ss:$16 sps:$4 sm:$0xff]  }
 0x182   :  { %v1672_v47 = vpop.f32.mrf.mxu0 }
 0x183   :  { %2668 = vmatpush2.bf16.msra.mxu0 %v6208_v55  ;;  %v1673_v5 = vadd.f32 %v1672_v47, %v1632_v3  ;;  %v6289_v55 = vld [vmem:[%s8881_s4 + $0x328] ss:$16 sps:$4 sm:$0xff]   ;;  %v6309_v3 = vld [vmem:[%s8883_s6 + $0xa4] ss:$16 sps:$4 sm:$0xff]  }
 0x184   :  { %v1674_v15 = vpop.f32.mrf.mxu0  ;;  %2669 = vmatprep.subr.bf16.mxu0 %v6216_v56  ;;  %v6294_v56 = vld [vmem:[%s8881_s4 + $0x30c] ss:$16 sps:$4 sm:$0xff]   ;;  %v6292_v47 = vld [vmem:[%s8881_s4 + $0x308] ss:$16 sps:$4 sm:$0xff]  }
 0x185   :  { %v1675_v10 = vadd.f32 %v1674_v15, %v1634_v4  ;;  %v6297_v15 = vld [vmem:[%s8883_s6 + $0xe4] ss:$16 sps:$4 sm:$0xff]   ;;  %v6307_v4 = vld [vmem:[%s8883_s6 + $0xa0] ss:$16 sps:$4 sm:$0xff]  }
 0x186   :  { %v1676_v58 = vpop.f32.mrf.mxu0 }
 0x187   :  { %2670 = vmatpush2.bf16.msra.mxu0 %v6214_v44  ;;  %v6295_v44 = vld [vmem:[%s8883_s6 + $0xe0] ss:$16 sps:$4 sm:$0xff]   ;;  %v6300_v58 = vld [vmem:[%s8883_s6 + $0xec] ss:$16 sps:$4 sm:$0xff]  }
 0x188   :  { %v1677_v6 = vpop.f32.mrf.mxu0  ;;  %2671 = vmatprep.subr.bf16.mxu0 %v6222_v57  ;;  %v6298_v57 = vld [vmem:[%s8883_s6 + $0xe8] ss:$16 sps:$4 sm:$0xff]  }
 0x189   :  { %v6303_v6 = vld [vmem:[%s8883_s6 + $0xc4] ss:$16 sps:$4 sm:$0xff]  }
 0x18b   :  { %2672 = vmatpush2.bf16.msra.mxu0 %v6220_v59  ;;  %v6301_v59 = vld [vmem:[%s8883_s6 + $0xc0] ss:$16 sps:$4 sm:$0xff]  }
 0x18c   :  { %3147 = vmatprep.subr.bf16.mxu0 %v6297_v15 }
 0x18e   :  { %2674 = vmatmul.mubr.bf16.vlgmr.msra.gmra.mxu0 %v7730_v21 }
 0x18f   :  { %3148 = vmatpush1.bf16.msra.mxu0 %v6295_v44  ;;  %v6376_v44 = vld [vmem:[%s8883_s6 + $0x148] ss:$16 sps:$4 sm:$0xff]  }
 0x190   :  { %3149 = vmatprep.subr.bf16.mxu0 %v6303_v6  ;;  %v6379_v6 = vld [vmem:[%s8883_s6 + $0x120] ss:$16 sps:$4 sm:$0xff]  }
 0x193   :  { %3150 = vmatpush1.bf16.msra.mxu0 %v6301_v59 }
 0x194   :  { %3151 = vmatprep.subr.bf16.mxu0 %v6309_v3  ;;  %v6387_v3 = vld [vmem:[%s8883_s6 + $0x104] ss:$16 sps:$4 sm:$0xff]  }
 0x197   :  { %3152 = vmatpush1.bf16.msra.mxu0 %v6307_v4  ;;  %v6390_v4 = vld [vmem:[%s8883_s6 + $0x10c] ss:$16 sps:$4 sm:$0xff]  }
 0x1a2   :  { %v1754_v9 = vpop.f32.mrf.mxu0 }
 0x1a3   :  { %v1713_v8 = vpop.f32.mrf.mxu1 }
 0x1a4   :  { %v1714_v11 = vadd.f32 %v1713_v8, %v1673_v5  ;;  %v1756_v13 = vpop.f32.mrf.mxu0  ;;  %v6312_v5 = vld [vmem:[%s8883_s6 + $0xac] ss:$16 sps:$4 sm:$0xff]   ;;  %v6310_v8 = vld [vmem:[%s8883_s6 + $0xa8] ss:$16 sps:$4 sm:$0xff]  }
 0x1a5   :  { %v1715_v12 = vpop.f32.mrf.mxu1 }
 0x1a6   :  { %v1755_v14 = vadd.f32 %v1754_v9, %v1714_v11  ;;  %v1716_v17 = vadd.f32 %v1715_v12, %v1675_v10  ;;  %v1758_v23 = vpop.f32.mrf.mxu0  ;;  %v6315_v9 = vld [vmem:[%s8883_s6 + $0x84] ss:$16 sps:$4 sm:$0xff]   ;;  %v6318_v10 = vld [vmem:[%s8883_s6 + $0x8c] ss:$16 sps:$4 sm:$0xff]   ;;  %v6313_v11 = vld [vmem:[%s8883_s6 + $0x80] ss:$16 sps:$4 sm:$0xff]  }
 0x1a7   :  { %v1717_v20 = vpop.f32.mrf.mxu1  ;;  %v6316_v12 = vld [vmem:[%s8883_s6 + $0x88] ss:$16 sps:$4 sm:$0xff]   ;;  %3153 = vmatprep.subr.bf16.mxu0 %v6315_v9 }
 0x1a8   :  { %v1757_v24 = vadd.f32 %v1756_v13, %v1716_v17  ;;  %v1763_v25 = vmax.f32 %v1755_v14, 0.0  ;;  %v1759_v18 = vpop.f32.mrf.mxu0  ;;  %v6321_v13 = vld [vmem:[%s8883_s6 + $0x64] ss:$16 sps:$4 sm:$0xff]   ;;  %v6324_v14 = vld [vmem:[%s8883_s6 + $0x6c] ss:$16 sps:$4 sm:$0xff]   ;;  %3154 = vmatpush1.bf16.msra.mxu0 %v6313_v11 }
 0x1a9   :  { %v1718_v26 = vpop.f32.mrf.mxu1  ;;  %v6319_v17 = vld [vmem:[%s8883_s6 + $0x60] ss:$16 sps:$4 sm:$0xff]   ;;  %v6322_v20 = vld [vmem:[%s8883_s6 + $0x68] ss:$16 sps:$4 sm:$0xff]   ;;  %3155 = vmatprep.subr.bf16.mxu0 %v6321_v13  ;;  %v6327_v18 = vld [vmem:[%s8883_s6 + $0x44] ss:$16 sps:$4 sm:$0xff]  }
 0x1aa   :  { %v1764_v21 = vmax.f32 %v1757_v24, 0.0  ;;  %v7837_v22 = vpack.c.bf16 %v1763_v25, %v1763_v25  ;;  %v6388_v9 = vld [vmem:[%s8883_s6 + $0x108] ss:$16 sps:$4 sm:$0xff]  }
 0x1ab   :  { %v6396_v11 = vld [vmem:[%s8884_s8 + $0x50c] ss:$28 sps:$4 sm:$0xff]  }
 0x1ac   :  { %v1768_v19 = vpack.c.bf16 %v1764_v21, %v1764_v21  ;;  %3156 = vmatpush1.bf16.msra.mxu0 %v6319_v17  ;;  %v6330_v21 = vld [vmem:[%s8883_s6 + $0x4c] ss:$16 sps:$4 sm:$0xff]  }
 0x1ad   :  { %3157 = vmatprep.subr.bf16.mxu0 %v6327_v18 }
 0x1ae   :  { %2632 = vmatprep.mubr.bf16.mxu1 %v1768_v19 }
 0x1af   :  { %2633 = vmatmul.mubr.bf16.vlgmr.msra.gmra.mxu1 %v7837_v22 }
 0x1b0   :  { %2683 = vmatpush1.bf16.msra.mxu1 %v6247_v0  ;;  %2714 = vmatprep.mubr.bf16.mxu1 %v1768_v19  ;;  %v6325_v19 = vld [vmem:[%s8883_s6 + $0x40] ss:$16 sps:$4 sm:$0xff]   ;;  %v6328_v0 = vld [vmem:[%s8883_s6 + $0x48] ss:$16 sps:$4 sm:$0xff]  }
 0x1b1   :  { %2684 = vmatprep.subr.bf16.mxu1 %v6252_v27  ;;  %3158 = vmatpush1.bf16.msra.mxu0 %v6325_v19  ;;  %v6336_v27 = vld [vmem:[%s8883_s6 + $0x2c] ss:$16 sps:$4 sm:$0xff]  }
 0x1b4   :  { %2685 = vmatpush1.bf16.msra.mxu1 %v6250_v51  ;;  %v6331_v51 = vld [vmem:[%s8883_s6 + $0x20] ss:$16 sps:$4 sm:$0xff]  }
 0x1b5   :  { %2686 = vmatprep.subr.bf16.mxu1 %v6255_v28  ;;  %v6334_v28 = vld [vmem:[%s8883_s6 + $0x28] ss:$16 sps:$4 sm:$0xff]  }
 0x1b8   :  { %2687 = vmatpush1.bf16.msra.mxu1 %v6253_v7  ;;  %v6339_v7 = vld [vmem:[%s8883_s6 + $0x4] ss:$16 sps:$4 sm:$0xff]  }
 0x1b9   :  { %2688 = vmatprep.subr.bf16.mxu1 %v6258_v29  ;;  %v6342_v29 = vld [vmem:[%s8883_s6 + $0xc] ss:$16 sps:$4 sm:$0xff]  }
 0x1bc   :  { %2689 = vmatpush1.bf16.msra.mxu1 %v6256_v30  ;;  %v6337_v30 = vld [vmem:[%s8883_s6] ss:$16 sps:$4 sm:$0xff]  }
 0x1bd   :  { %2690 = vmatprep.subr.bf16.mxu1 %v6261_v31  ;;  %v6340_v31 = vld [vmem:[%s8883_s6 + $0x8] ss:$16 sps:$4 sm:$0xff]  }
 0x1c0   :  { %2691 = vmatpush1.bf16.msra.mxu1 %v6259_v16  ;;  %v6345_v16 = vld [vmem:[%s8883_s6 + $0x1e4] ss:$16 sps:$4 sm:$0xff]  }
 0x1c1   :  { %2692 = vmatprep.subr.bf16.mxu1 %v6264_v32  ;;  %v6348_v32 = vld [vmem:[%s8883_s6 + $0x1ec] ss:$16 sps:$4 sm:$0xff]  }
 0x1c4   :  { %2693 = vmatpush1.bf16.msra.mxu1 %v6262_v33  ;;  %v6343_v33 = vld [vmem:[%s8883_s6 + $0x1e0] ss:$16 sps:$4 sm:$0xff]  }
 0x1c5   :  { %2694 = vmatprep.subr.bf16.mxu1 %v6267_v34  ;;  %v6346_v34 = vld [vmem:[%s8883_s6 + $0x1e8] ss:$16 sps:$4 sm:$0xff]  }
 0x1c8   :  { %2695 = vmatpush1.bf16.msra.mxu1 %v6265_v36  ;;  %v6351_v36 = vld [vmem:[%s8883_s6 + $0x1c4] ss:$16 sps:$4 sm:$0xff]  }
 0x1c9   :  { %2696 = vmatprep.subr.bf16.mxu1 %v6270_v37  ;;  %v6354_v37 = vld [vmem:[%s8883_s6 + $0x1cc] ss:$16 sps:$4 sm:$0xff]  }
 0x1cc   :  { %2697 = vmatpush1.bf16.msra.mxu1 %v6268_v38  ;;  %v6349_v38 = vld [vmem:[%s8883_s6 + $0x1c0] ss:$16 sps:$4 sm:$0xff]  }
 0x1cd   :  { %2698 = vmatprep.subr.bf16.mxu1 %v6273_v39  ;;  %v6352_v39 = vld [vmem:[%s8883_s6 + $0x1c8] ss:$16 sps:$4 sm:$0xff]  }
 0x1d0   :  { %2699 = vmatpush2.bf16.msra.mxu1 %v6271_v40  ;;  %v6357_v40 = vld [vmem:[%s8883_s6 + $0x1a4] ss:$16 sps:$4 sm:$0xff]  }
 0x1d1   :  { %2700 = vmatprep.subr.bf16.mxu1 %v6276_v41  ;;  %v6360_v41 = vld [vmem:[%s8883_s6 + $0x1ac] ss:$16 sps:$4 sm:$0xff]  }
 0x1d4   :  { %2701 = vmatpush2.bf16.msra.mxu1 %v6274_v42  ;;  %v6355_v42 = vld [vmem:[%s8883_s6 + $0x1a0] ss:$16 sps:$4 sm:$0xff]  }
 0x1d5   :  { %2702 = vmatprep.subr.bf16.mxu1 %v6279_v43  ;;  %v6358_v43 = vld [vmem:[%s8883_s6 + $0x1a8] ss:$16 sps:$4 sm:$0xff]  }
 0x1d8   :  { %2703 = vmatpush2.bf16.msra.mxu1 %v6277_v45  ;;  %v6363_v45 = vld [vmem:[%s8883_s6 + $0x184] ss:$16 sps:$4 sm:$0xff]  }
 0x1d9   :  { %2704 = vmatprep.subr.bf16.mxu1 %v6282_v46  ;;  %v6366_v46 = vld [vmem:[%s8883_s6 + $0x18c] ss:$16 sps:$4 sm:$0xff]  }
 0x1dc   :  { %2705 = vmatpush2.bf16.msra.mxu1 %v6280_v48  ;;  %v6361_v48 = vld [vmem:[%s8883_s6 + $0x180] ss:$16 sps:$4 sm:$0xff]  }
 0x1dd   :  { %2706 = vmatprep.subr.bf16.mxu1 %v6285_v49  ;;  %v6364_v49 = vld [vmem:[%s8883_s6 + $0x188] ss:$16 sps:$4 sm:$0xff]  }
 0x1e0   :  { %2707 = vmatpush2.bf16.msra.mxu1 %v6283_v50  ;;  %v6369_v50 = vld [vmem:[%s8883_s6 + $0x164] ss:$16 sps:$4 sm:$0xff]  }
 0x1e1   :  { %2708 = vmatprep.subr.bf16.mxu1 %v6288_v52  ;;  %v6372_v52 = vld [vmem:[%s8883_s6 + $0x16c] ss:$16 sps:$4 sm:$0xff]  }
 0x1e4   :  { %2709 = vmatpush2.bf16.msra.mxu1 %v6286_v53  ;;  %v6367_v53 = vld [vmem:[%s8883_s6 + $0x160] ss:$16 sps:$4 sm:$0xff]  }
 0x1e5   :  { %2710 = vmatprep.subr.bf16.mxu1 %v6291_v54  ;;  %v6370_v54 = vld [vmem:[%s8883_s6 + $0x168] ss:$16 sps:$4 sm:$0xff]  }
 0x1e8   :  { %2711 = vmatpush2.bf16.msra.mxu1 %v6289_v55  ;;  %v6375_v55 = vld [vmem:[%s8883_s6 + $0x144] ss:$16 sps:$4 sm:$0xff]  }
 0x1e9   :  { %2712 = vmatprep.subr.bf16.mxu1 %v6294_v56  ;;  %v6378_v56 = vld [vmem:[%s8883_s6 + $0x14c] ss:$16 sps:$4 sm:$0xff]  }
 0x1ec   :  { %2713 = vmatpush2.bf16.msra.mxu1 %v6292_v47  ;;  %v6373_v47 = vld [vmem:[%s8883_s6 + $0x140] ss:$16 sps:$4 sm:$0xff]  }
 0x1ed   :  { %3188 = vmatprep.subr.bf16.mxu1 %v6300_v58  ;;  %v6384_v58 = vld [vmem:[%s8883_s6 + $0x12c] ss:$16 sps:$4 sm:$0xff]  }
 0x1ef   :  { %2715 = vmatmul.mubr.bf16.vlgmr.msra.gmra.mxu1 %v7837_v22  ;;  %v6333_v22 = vld [vmem:[%s8883_s6 + $0x24] ss:$16 sps:$4 sm:$0xff]  }
 0x1f0   :  { %3189 = vmatpush1.bf16.msra.mxu1 %v6298_v57  ;;  %3159 = vmatprep.subr.bf16.mxu0 %v6333_v22  ;;  %v6381_v57 = vld [vmem:[%s8883_s6 + $0x124] ss:$16 sps:$4 sm:$0xff]  }
 0x1f1   :  { %3190 = vmatprep.subr.bf16.mxu1 %v6306_v2  ;;  %3160 = vmatpush1.bf16.msra.mxu0 %v6331_v51 }
 0x1f2   :  { %3161 = vmatprep.subr.bf16.mxu0 %v6339_v7 }
 0x1f4   :  { %3191 = vmatpush1.bf16.msra.mxu1 %v6304_v35  ;;  %v6382_v35 = vld [vmem:[%s8883_s6 + $0x128] ss:$16 sps:$4 sm:$0xff]  }
 0x1f5   :  { %3192 = vmatprep.subr.bf16.mxu1 %v6312_v5  ;;  %3162 = vmatpush1.bf16.msra.mxu0 %v6337_v30 }
 0x1f6   :  { %3163 = vmatprep.subr.bf16.mxu0 %v6345_v16 }
 0x1f8   :  { %3193 = vmatpush1.bf16.msra.mxu1 %v6310_v8  ;;  %v6385_v8 = vld [vmem:[%s8883_s6 + $0x100] ss:$16 sps:$4 sm:$0xff]  }
 0x1f9   :  { %3194 = vmatprep.subr.bf16.mxu1 %v6318_v10  ;;  %3164 = vmatpush2.bf16.msra.mxu0 %v6343_v33  ;;  %v6393_v10 = vld [vmem:[%s8884_s8 + $0x18c] ss:$28 sps:$4 sm:$0xff]  }
 0x1fa   :  { %3165 = vmatprep.subr.bf16.mxu0 %v6351_v36 }
 0x1fc   :  { %3195 = vmatpush1.bf16.msra.mxu1 %v6316_v12  ;;  %v1897_v12 = vld [vmem:[%s8885_s5] sm:$0xf] }
 0x1fd   :  { %3196 = vmatprep.subr.bf16.mxu1 %v6324_v14  ;;  %3166 = vmatpush2.bf16.msra.mxu0 %v6349_v38  ;;  %v1902_v13 = vrot.slane %v1897_v12, %v7709_v63  ;;  %v1906_v14 = vrot.slane %v1897_v12, %v7717_v1  ;;  %v1910_v22 = vrot.slane %v1897_v12, %v7825_v60 }
 0x1fe   :  { %3167 = vmatprep.subr.bf16.mxu0 %v6357_v40  ;;  %v2733_v40 = vld [vmem:[%s8887_s1] sm:$0xff] }
 0x200   :  { %3197 = vmatpush1.bf16.msra.mxu1 %v6322_v20 }
 0x201   :  { %3198 = vmatprep.subr.bf16.mxu1 %v6330_v21  ;;  %3168 = vmatpush2.bf16.msra.mxu0 %v6355_v42  ;;  %v2734_v42 = vld [vmem:[%s8887_s1 + $0x8] sm:$0xff] }
 0x202   :  { %3169 = vmatprep.subr.bf16.mxu0 %v6363_v45 }
 0x204   :  { %3199 = vmatpush1.bf16.msra.mxu1 %v6328_v0 }
 0x205   :  { %3200 = vmatprep.subr.bf16.mxu1 %v6336_v27  ;;  %3170 = vmatpush2.bf16.msra.mxu0 %v6361_v48 }
 0x206   :  { %3171 = vmatprep.subr.bf16.mxu0 %v6369_v50 }
 0x208   :  { %3201 = vmatpush1.bf16.msra.mxu1 %v6334_v28 }
 0x209   :  { %3202 = vmatprep.subr.bf16.mxu1 %v6342_v29  ;;  %3172 = vmatpush2.bf16.msra.mxu0 %v6367_v53  ;;  %v6394_v53 = vld [vmem:[%s8884_s8 + $0x508] ss:$28 sps:$4 sm:$0xff]  }
 0x20a   :  { %3173 = vmatprep.subr.bf16.mxu0 %v6375_v55  ;;  %v6399_v55 = vld [vmem:[%s8884_s8 + $0x154] ss:$28 sps:$4 sm:$0xff]  }
 0x20c   :  { %3203 = vmatpush1.bf16.msra.mxu1 %v6340_v31 }
 0x20d   :  { %3204 = vmatprep.subr.bf16.mxu1 %v6348_v32  ;;  %3174 = vmatpush2.bf16.msra.mxu0 %v6373_v47  ;;  %v6397_v47 = vld [vmem:[%s8884_s8 + $0x150] ss:$28 sps:$4 sm:$0xff]  }
 0x20e   :  { %v7991_v23 = vpop.f32.mrf.mxu0  ;;  %3175 = vmatprep.subr.bf16.mxu0 %v6381_v57  ;;  %v6408_v57 = vld [vmem:[%s8884_s8 + $0x49c] ss:$28 sps:$4 sm:$0xff]  }
 0x20f   :  { %v2594_v17 = vadd.f32 %v7991_v23, %v1902_v13  ;;  %v1914_v23 = vrot.slane %v1897_v12, %v7828_v61  ;;  %v6421_v12 = vld [vmem:[%s8884_s8 + $0x70] ss:$28 sps:$4 sm:$0xff]  }
 0x210   :  { %v7993_v24 = vpop.f32.mrf.mxu0  ;;  %3205 = vmatpush2.bf16.msra.mxu1 %v6346_v34  ;;  %v6424_v13 = vld [vmem:[%s8884_s8 + $0x3f0] ss:$28 sps:$4 sm:$0xff]  }
 0x211   :  { %3206 = vmatprep.subr.bf16.mxu1 %v6354_v37  ;;  %3176 = vmatpush2.bf16.msra.mxu0 %v6379_v6  ;;  %v6411_v6 = vld [vmem:[%s8884_s8 + $0xe4] ss:$28 sps:$4 sm:$0xff]  }
 0x212   :  { %v2597_v25 = vpop.f32.mrf.mxu0  ;;  %3177 = vmatprep.subr.bf16.mxu0 %v6387_v3  ;;  %v6412_v3 = vld [vmem:[%s8884_s8 + $0x460] ss:$28 sps:$4 sm:$0xff]  }
 0x213   :  { %v2596_v25 = vadd.f32 %v7993_v24, %v1906_v14  ;;  %v6429_v14 = vld [vmem:[%s8884_s8 + $0x3c] ss:$28 sps:$4 sm:$0xff]  }
 0x214   :  { %v2598_v26 = vpop.f32.mrf.mxu0  ;;  %3207 = vmatpush2.bf16.msra.mxu1 %v6352_v39 }
 0x215   :  { %3208 = vmatprep.subr.bf16.mxu1 %v6360_v41  ;;  %3178 = vmatpush2.bf16.msra.mxu0 %v6385_v8  ;;  %v6415_v8 = vld [vmem:[%s8884_s8 + $0xa8] ss:$28 sps:$4 sm:$0xff]  }
 0x216   :  { %4682 = vmatprep.subr.bf16.mxu0 %v6393_v10  ;;  %v6423_v10 = vld [vmem:[%s8884_s8 + $0x74] ss:$28 sps:$4 sm:$0xff]  }
 0x218   :  { %3209 = vmatpush2.bf16.msra.mxu1 %v6358_v43 }
 0x219   :  { %3210 = vmatprep.subr.bf16.mxu1 %v6366_v46 }
 0x21c   :  { %3211 = vmatpush2.bf16.msra.mxu1 %v6364_v49 }
 0x21d   :  { %3212 = vmatprep.subr.bf16.mxu1 %v6372_v52  ;;  %v6391_v52 = vld [vmem:[%s8884_s8 + $0x188] ss:$28 sps:$4 sm:$0xff]  }
 0x220   :  { %3213 = vmatpush2.bf16.msra.mxu1 %v6370_v54 }
 0x221   :  { %3214 = vmatprep.subr.bf16.mxu1 %v6378_v56  ;;  %v6402_v56 = vld [vmem:[%s8884_s8 + $0x4d4] ss:$28 sps:$4 sm:$0xff]  }
 0x224   :  { %3215 = vmatpush2.bf16.msra.mxu1 %v6376_v44  ;;  %v6400_v44 = vld [vmem:[%s8884_s8 + $0x4d0] ss:$28 sps:$4 sm:$0xff]  }
 0x225   :  { %3216 = vmatprep.subr.bf16.mxu1 %v6384_v58  ;;  %v6403_v58 = vld [vmem:[%s8884_s8 + $0x118] ss:$28 sps:$4 sm:$0xff]  }
 0x228   :  { %3217 = vmatpush2.bf16.msra.mxu1 %v6382_v35  ;;  %v6414_v35 = vld [vmem:[%s8884_s8 + $0x464] ss:$28 sps:$4 sm:$0xff]  }
 0x229   :  { %3218 = vmatprep.subr.bf16.mxu1 %v6390_v4  ;;  %v6417_v4 = vld [vmem:[%s8884_s8 + $0xac] ss:$28 sps:$4 sm:$0xff]  }
 0x22c   :  { %3219 = vmatpush2.bf16.msra.mxu1 %v6388_v9  ;;  %v6418_v9 = vld [vmem:[%s8884_s8 + $0x428] ss:$28 sps:$4 sm:$0xff]  }
 0x22d   :  { %4723 = vmatprep.subr.bf16.mxu1 %v6396_v11  ;;  %v6426_v11 = vld [vmem:[%s8884_s8 + $0x3f4] ss:$28 sps:$4 sm:$0xff]  }
 0x24e   :  { %v2675_v15 = vpop.f32.mrf.mxu0 }
 0x24f   :  { %v2676_v27 = vadd.f32 %v2675_v15, %v1910_v22  ;;  %v6405_v15 = vld [vmem:[%s8884_s8 + $0x11c] ss:$28 sps:$4 sm:$0xff]   ;;  %v6444_v22 = vld [vmem:[%s8884_s8 + $0x6cc] ss:$28 sps:$4 sm:$0xff]  }
 0x250   :  { %v2677_v59 = vpop.f32.mrf.mxu0 }
 0x251   :  { %v2678_v24 = vadd.f32 %v2677_v59, %v1914_v23  ;;  %v6406_v59 = vld [vmem:[%s8884_s8 + $0x498] ss:$28 sps:$4 sm:$0xff]   ;;  %v6439_v23 = vld [vmem:[%s8884_s8 + $0x348] ss:$28 sps:$4 sm:$0xff]  }
 0x252   :  { %v2679_v2 = vpop.f32.mrf.mxu0 }
 0x253   :  { %v6409_v2 = vld [vmem:[%s8884_s8 + $0xe0] ss:$28 sps:$4 sm:$0xff]  }
 0x254   :  { %v2680_v5 = vpop.f32.mrf.mxu0 }
 0x255   :  { %v6420_v5 = vld [vmem:[%s8884_s8 + $0x42c] ss:$28 sps:$4 sm:$0xff]  }
 0x26f   :  { %v2634_v20 = vpop.f32.mrf.mxu1 }
 0x270   :  { %v2635_v26 = vadd.f32 %v2634_v20, %v2594_v17  ;;  %v6432_v17 = vld [vmem:[%s8884_s8 + $0x3bc] ss:$28 sps:$4 sm:$0xff]  }
 0x271   :  { %v2636_v18 = vpop.f32.mrf.mxu1  ;;  %v6427_v20 = vld [vmem:[%s8884_s8 + $0x38] ss:$28 sps:$4 sm:$0xff]  }
 0x272   :  { %5048 = vst [vmem:[%s8886_s11] sm:$0xff] %v2635_v26  ;;  %v2637_v21 = vadd.f32 %v2636_v18, %v2596_v25  ;;  %v6430_v25 = vld [vmem:[%s8884_s8 + $0x3b8] ss:$28 sps:$4 sm:$0xff]   ;;  %v6438_v18 = vld [vmem:[%s8884_s8 + $0x384] ss:$28 sps:$4 sm:$0xff]  }
 0x273   :  { %v2638_v19 = vpop.f32.mrf.mxu1 }
 0x274   :  { %5049 = vst [vmem:[%s8886_s11 + $0x8] sm:$0xff] %v2637_v21  ;;  %v6436_v19 = vld [vmem:[%s8884_s8 + $0x380] ss:$28 sps:$4 sm:$0xff]  }
 0x275   :  { %v2639_v0 = vpop.f32.mrf.mxu1 }
 0x276   :  { %v6441_v0 = vld [vmem:[%s8884_s8 + $0x34c] ss:$28 sps:$4 sm:$0xff]  }
 0x2af   :  { %v2716_v51 = vpop.f32.mrf.mxu1 }
 0x2b0   :  { %v2717_v28 = vadd.f32 %v2716_v51, %v2676_v27  ;;  %v6442_v27 = vld [vmem:[%s8884_s8 + $0x6c8] ss:$28 sps:$4 sm:$0xff]   ;;  %v6447_v51 = vld [vmem:[%s8884_s8 + $0x314] ss:$28 sps:$4 sm:$0xff]  }
 0x2b1   :  { %v2718_v7 = vpop.f32.mrf.mxu1 }
 0x2b2   :  { %v2723_v29 = vmul.f32 -0.6931472, %v2717_v28  ;;  %5050 = vst [vmem:[%s8886_s11 + $0x10] sm:$0xff] %v2717_v28  ;;  %v2719_v30 = vadd.f32 %v2718_v7, %v2678_v24  ;;  %v6450_v24 = vld [vmem:[%s8884_s8 + $0x694] ss:$28 sps:$4 sm:$0xff]  }
 0x2b3   :  { %v2720_v31 = vpop.f32.mrf.mxu1  ;;  %v6445_v28 = vld [vmem:[%s8884_s8 + $0x310] ss:$28 sps:$4 sm:$0xff]  }
 0x2b4   :  { %v2725_v16 = vmul.f32 1.442695, %v2723_v29  ;;  %v2724_v32 = vmul.f32 -0.6931472, %v2719_v30  ;;  %5051 = vst [vmem:[%s8886_s11 + $0x18] sm:$0xff] %v2719_v30 }
 0x2b5   :  { %v2721_v33 = vpop.f32.mrf.mxu1  ;;  %v6448_v7 = vld [vmem:[%s8884_s8 + $0x690] ss:$28 sps:$4 sm:$0xff]   ;;  %v6453_v29 = vld [vmem:[%s8884_s8 + $0x2dc] ss:$28 sps:$4 sm:$0xff]  }
 0x2b6   :  { %6711 = vpow2.f32 %v2725_v16  ;;  %v2727_v34 = vmul.f32 1.442695, %v2724_v32  ;;  %v6456_v30 = vld [vmem:[%s8884_s8 + $0x65c] ss:$28 sps:$4 sm:$0xff]   ;;  %v6459_v32 = vld [vmem:[%s8884_s8 + $0x2a4] ss:$28 sps:$4 sm:$0xff]  }
 0x2b7   :  { %v6451_v31 = vld [vmem:[%s8884_s8 + $0x2d8] ss:$28 sps:$4 sm:$0xff]   ;;  %v6462_v33 = vld [vmem:[%s8884_s8 + $0x624] ss:$28 sps:$4 sm:$0xff]  }
 0x2b8   :  { %6713 = vpow2.f32 %v2727_v34  ;;  %v6454_v16 = vld [vmem:[%s8884_s8 + $0x658] ss:$28 sps:$4 sm:$0xff]   ;;  %v6457_v34 = vld [vmem:[%s8884_s8 + $0x2a0] ss:$28 sps:$4 sm:$0xff]  }
 0x2c3   :  { %v6712_v36 = vpop.eup %6711 }
 0x2c4   :  { %v2729_v37 = vmul.f32 1.442695, %v6712_v36  ;;  %v6460_v36 = vld [vmem:[%s8884_s8 + $0x620] ss:$28 sps:$4 sm:$0xff]  }
 0x2c5   :  { %v6714_v38 = vpop.eup %6713 }
 0x2c6   :  { %6715 = vpow2.f32 %v2729_v37  ;;  %v2731_v39 = vmul.f32 1.442695, %v6714_v38  ;;  %v6465_v37 = vld [vmem:[%s8884_s8 + $0x26c] ss:$28 sps:$4 sm:$0xff]  }
 0x2c7   :  { %v6468_v38 = vld [vmem:[%s8884_s8 + $0x5ec] ss:$28 sps:$4 sm:$0xff]  }
 0x2c8   :  { %6717 = vpow2.f32 %v2731_v39  ;;  %v6463_v39 = vld [vmem:[%s8884_s8 + $0x268] ss:$28 sps:$4 sm:$0xff]  }
 0x2d3   :  { %v6716_v41 = vpop.eup %6715 }
 0x2d4   :  { %v2735_v43 = vmul.f32 %v6716_v41, %v2733_v40  ;;  %v6466_v40 = vld [vmem:[%s8884_s8 + $0x5e8] ss:$28 sps:$4 sm:$0xff]   ;;  %v6471_v41 = vld [vmem:[%s8884_s8 + $0x234] ss:$28 sps:$4 sm:$0xff]  }
 0x2d5   :  { %v6718_v45 = vpop.eup %6717 }
 0x2d6   :  { %v2736_v46 = vmul.f32 %v6718_v45, %v2734_v42  ;;  %v2737_v48 = vadd.f32 %v2735_v43, %v2635_v26  ;;  %v6435_v26 = vld [vmem:[%s8884_s8 + $0x4] ss:$28 sps:$4 sm:$0xff]   ;;  %v6474_v42 = vld [vmem:[%s8884_s8 + $0x5b4] ss:$28 sps:$4 sm:$0xff]  }
 0x2d7   :  { %v6469_v43 = vld [vmem:[%s8884_s8 + $0x230] ss:$28 sps:$4 sm:$0xff]  }
 0x2d8   :  { %v2738_v49 = vadd.f32 %v2736_v46, %v2637_v21  ;;  %v2739_v54 = vpack.c.bf16 %v2737_v48, %v2737_v48  ;;  %v6433_v21 = vld [vmem:[%s8884_s8] ss:$28 sps:$4 sm:$0xff]   ;;  %v6472_v45 = vld [vmem:[%s8884_s8 + $0x5b0] ss:$28 sps:$4 sm:$0xff]  }
 0x2d9   :  { %v6477_v46 = vld [vmem:[%s8884_s8 + $0x1fc] ss:$28 sps:$4 sm:$0xff]  }
 0x2da   :  { %v2740_v50 = vpack.c.bf16 %v2738_v49, %v2738_v49  ;;  %v6480_v48 = vld [vmem:[%s8884_s8 + $0x57c] ss:$28 sps:$4 sm:$0xff]  }
 0x2db   :  { %v6475_v49 = vld [vmem:[%s8884_s8 + $0x1f8] ss:$28 sps:$4 sm:$0xff]  }
 0x2dc   :  { %3179 = vmatprep.mubr.bf16.mxu0 %v2740_v50  ;;  %3220 = vmatprep.mubr.bf16.mxu1 %v2740_v50  ;;  %v6478_v50 = vld [vmem:[%s8884_s8 + $0x578] ss:$28 sps:$4 sm:$0xff]  }
 0x2dd   :  { %3180 = vmatmul.mubr.bf16.vlgmr.msra.gmra.mxu0 %v2739_v54  ;;  %3221 = vmatmul.mubr.bf16.vlgmr.msra.gmra.mxu1 %v2739_v54  ;;  %v6481_v54 = vld [vmem:[%s8884_s8 + $0x1c0] ss:$28 sps:$4 sm:$0xff]  }
 0x2de   :  { %4683 = vmatpush1.bf16.msra.mxu0 %v6391_v52  ;;  %4724 = vmatpush1.bf16.msra.mxu1 %v6394_v53  ;;  %v6483_v52 = vld [vmem:[%s8884_s8 + $0x1c4] ss:$28 sps:$4 sm:$0xff]  }
 0x2df   :  { %4684 = vmatprep.subr.bf16.mxu0 %v6399_v55  ;;  %4725 = vmatprep.subr.bf16.mxu1 %v6402_v56  ;;  %v6486_v53 = vld [vmem:[%s8884_s8 + $0x544] ss:$28 sps:$4 sm:$0xff]   ;;  %v6489_v56 = vld [vmem:[%s8884_s8 + $0x194] ss:$28 sps:$4 sm:$0xff]  }
 0x2e0   :  { %v6484_v55 = vld [vmem:[%s8884_s8 + $0x540] ss:$28 sps:$4 sm:$0xff]  }
 0x2e2   :  { %4685 = vmatpush1.bf16.msra.mxu0 %v6397_v47  ;;  %4726 = vmatpush1.bf16.msra.mxu1 %v6400_v44  ;;  %v6492_v47 = vld [vmem:[%s8884_s8 + $0x514] ss:$28 sps:$4 sm:$0xff]   ;;  %v2805_v44 = vld [vmem:[%s8888_s7] sm:$0xf] }
 0x2e3   :  { %4686 = vmatprep.subr.bf16.mxu0 %v6405_v15  ;;  %4727 = vmatprep.subr.bf16.mxu1 %v6408_v57  ;;  %v2810_v15 = vrot.slane %v2805_v44, %v7709_v63  ;;  %v2818_v57 = vrot.slane %v2805_v44, %v7825_v60 }
 0x2e6   :  { %4687 = vmatpush1.bf16.msra.mxu0 %v6403_v58  ;;  %4728 = vmatpush1.bf16.msra.mxu1 %v6406_v59  ;;  %v2814_v58 = vrot.slane %v2805_v44, %v7717_v1  ;;  %v2822_v59 = vrot.slane %v2805_v44, %v7828_v61  ;;  %v6543_v44 = vld [vmem:[%s8884_s8 + $0x31c] ss:$28 sps:$4 sm:$0xff]  }
 0x2e7   :  { %4688 = vmatprep.subr.bf16.mxu0 %v6411_v6  ;;  %4729 = vmatprep.subr.bf16.mxu1 %v6414_v35 }
 0x2ea   :  { %4689 = vmatpush1.bf16.msra.mxu0 %v6409_v2  ;;  %4730 = vmatpush1.bf16.msra.mxu1 %v6412_v3 }
 0x2eb   :  { %4690 = vmatprep.subr.bf16.mxu0 %v6417_v4  ;;  %4731 = vmatprep.subr.bf16.mxu1 %v6420_v5 }
 0x2ee   :  { %4691 = vmatpush1.bf16.msra.mxu0 %v6415_v8  ;;  %4732 = vmatpush1.bf16.msra.mxu1 %v6418_v9 }
 0x2ef   :  { %4692 = vmatprep.subr.bf16.mxu0 %v6423_v10  ;;  %4733 = vmatprep.subr.bf16.mxu1 %v6426_v11 }
 0x2f2   :  { %4693 = vmatpush1.bf16.msra.mxu0 %v6421_v12  ;;  %4734 = vmatpush1.bf16.msra.mxu1 %v6424_v13 }
 0x2f3   :  { %4694 = vmatprep.subr.bf16.mxu0 %v6429_v14  ;;  %4735 = vmatprep.subr.bf16.mxu1 %v6432_v17 }
 0x2f6   :  { %4695 = vmatpush1.bf16.msra.mxu0 %v6427_v20  ;;  %4736 = vmatpush1.bf16.msra.mxu1 %v6430_v25 }
 0x2f7   :  { %4696 = vmatprep.subr.bf16.mxu0 %v6435_v26  ;;  %4737 = vmatprep.subr.bf16.mxu1 %v6438_v18 }
 0x2fa   :  { %4697 = vmatpush1.bf16.msra.mxu0 %v6433_v21  ;;  %4738 = vmatpush1.bf16.msra.mxu1 %v6436_v19  ;;  %v6487_v21 = vld [vmem:[%s8884_s8 + $0x190] ss:$28 sps:$4 sm:$0xff]  }
 0x2fb   :  { %4698 = vmatprep.subr.bf16.mxu0 %v6441_v0  ;;  %4739 = vmatprep.subr.bf16.mxu1 %v6444_v22  ;;  %v6490_v19 = vld [vmem:[%s8884_s8 + $0x510] ss:$28 sps:$4 sm:$0xff]  }
 0x2fe   :  { %4699 = vmatpush2.bf16.msra.mxu0 %v6439_v23  ;;  %4740 = vmatpush2.bf16.msra.mxu1 %v6442_v27  ;;  %v6495_v23 = vld [vmem:[%s8884_s8 + $0x15c] ss:$28 sps:$4 sm:$0xff]  }
 0x2ff   :  { %4700 = vmatprep.subr.bf16.mxu0 %v6447_v51  ;;  %4741 = vmatprep.subr.bf16.mxu1 %v6450_v24  ;;  %v6498_v27 = vld [vmem:[%s8884_s8 + $0x4dc] ss:$28 sps:$4 sm:$0xff]  }
 0x300   :  { %v6493_v51 = vld [vmem:[%s8884_s8 + $0x158] ss:$28 sps:$4 sm:$0xff]  }
 0x301   :  { %v6496_v24 = vld [vmem:[%s8884_s8 + $0x4d8] ss:$28 sps:$4 sm:$0xff]  }
 0x302   :  { %4701 = vmatpush2.bf16.msra.mxu0 %v6445_v28  ;;  %4742 = vmatpush2.bf16.msra.mxu1 %v6448_v7  ;;  %v6501_v28 = vld [vmem:[%s8884_s8 + $0x124] ss:$28 sps:$4 sm:$0xff]  }
 0x303   :  { %4702 = vmatprep.subr.bf16.mxu0 %v6453_v29  ;;  %4743 = vmatprep.subr.bf16.mxu1 %v6456_v30  ;;  %v6504_v7 = vld [vmem:[%s8884_s8 + $0x4a4] ss:$28 sps:$4 sm:$0xff]  }
 0x304   :  { %v6499_v29 = vld [vmem:[%s8884_s8 + $0x120] ss:$28 sps:$4 sm:$0xff]  }
 0x305   :  { %v6502_v30 = vld [vmem:[%s8884_s8 + $0x4a0] ss:$28 sps:$4 sm:$0xff]  }
 0x306   :  { %4703 = vmatpush2.bf16.msra.mxu0 %v6451_v31  ;;  %4744 = vmatpush2.bf16.msra.mxu1 %v6454_v16  ;;  %v6507_v31 = vld [vmem:[%s8884_s8 + $0xec] ss:$28 sps:$4 sm:$0xff]  }
 0x307   :  { %4704 = vmatprep.subr.bf16.mxu0 %v6459_v32  ;;  %4745 = vmatprep.subr.bf16.mxu1 %v6462_v33  ;;  %v6510_v16 = vld [vmem:[%s8884_s8 + $0x46c] ss:$28 sps:$4 sm:$0xff]  }
 0x308   :  { %v6505_v32 = vld [vmem:[%s8884_s8 + $0xe8] ss:$28 sps:$4 sm:$0xff]  }
 0x309   :  { %v6508_v33 = vld [vmem:[%s8884_s8 + $0x468] ss:$28 sps:$4 sm:$0xff]  }
 0x30a   :  { %4705 = vmatpush2.bf16.msra.mxu0 %v6457_v34  ;;  %4746 = vmatpush2.bf16.msra.mxu1 %v6460_v36  ;;  %v6513_v34 = vld [vmem:[%s8884_s8 + $0xb4] ss:$28 sps:$4 sm:$0xff]  }
 0x30b   :  { %4706 = vmatprep.subr.bf16.mxu0 %v6465_v37  ;;  %4747 = vmatprep.subr.bf16.mxu1 %v6468_v38  ;;  %v6516_v36 = vld [vmem:[%s8884_s8 + $0x434] ss:$28 sps:$4 sm:$0xff]  }
 0x30c   :  { %v6511_v37 = vld [vmem:[%s8884_s8 + $0xb0] ss:$28 sps:$4 sm:$0xff]  }
 0x30d   :  { %v6514_v38 = vld [vmem:[%s8884_s8 + $0x430] ss:$28 sps:$4 sm:$0xff]  }
 0x30e   :  { %4707 = vmatpush2.bf16.msra.mxu0 %v6463_v39  ;;  %4748 = vmatpush2.bf16.msra.mxu1 %v6466_v40  ;;  %v6519_v39 = vld [vmem:[%s8884_s8 + $0x7c] ss:$28 sps:$4 sm:$0xff]  }
 0x30f   :  { %4708 = vmatprep.subr.bf16.mxu0 %v6471_v41  ;;  %4749 = vmatprep.subr.bf16.mxu1 %v6474_v42  ;;  %v6522_v40 = vld [vmem:[%s8884_s8 + $0x3fc] ss:$28 sps:$4 sm:$0xff]  }
 0x310   :  { %v6517_v41 = vld [vmem:[%s8884_s8 + $0x78] ss:$28 sps:$4 sm:$0xff]  }
 0x311   :  { %v6520_v42 = vld [vmem:[%s8884_s8 + $0x3f8] ss:$28 sps:$4 sm:$0xff]  }
 0x312   :  { %4709 = vmatpush2.bf16.msra.mxu0 %v6469_v43  ;;  %4750 = vmatpush2.bf16.msra.mxu1 %v6472_v45  ;;  %v6525_v43 = vld [vmem:[%s8884_s8 + $0x44] ss:$28 sps:$4 sm:$0xff]  }
 0x313   :  { %4710 = vmatprep.subr.bf16.mxu0 %v6477_v46  ;;  %4751 = vmatprep.subr.bf16.mxu1 %v6480_v48  ;;  %v6528_v45 = vld [vmem:[%s8884_s8 + $0x3c4] ss:$28 sps:$4 sm:$0xff]  }
 0x314   :  { %v6523_v46 = vld [vmem:[%s8884_s8 + $0x40] ss:$28 sps:$4 sm:$0xff]  }
 0x315   :  { %v6526_v48 = vld [vmem:[%s8884_s8 + $0x3c0] ss:$28 sps:$4 sm:$0xff]  }
 0x316   :  { %4711 = vmatpush2.bf16.msra.mxu0 %v6475_v49  ;;  %4752 = vmatpush2.bf16.msra.mxu1 %v6478_v50  ;;  %v6531_v49 = vld [vmem:[%s8884_s8 + $0xc] ss:$28 sps:$4 sm:$0xff]  }
 0x317   :  { %4712 = vmatprep.subr.bf16.mxu0 %v6483_v52  ;;  %4753 = vmatprep.subr.bf16.mxu1 %v6486_v53  ;;  %v6534_v50 = vld [vmem:[%s8884_s8 + $0x38c] ss:$28 sps:$4 sm:$0xff]  }
 0x318   :  { %v6529_v52 = vld [vmem:[%s8884_s8 + $0x8] ss:$28 sps:$4 sm:$0xff]  }
 0x319   :  { %v6532_v53 = vld [vmem:[%s8884_s8 + $0x388] ss:$28 sps:$4 sm:$0xff]  }
 0x31a   :  { %4713 = vmatpush2.bf16.msra.mxu0 %v6481_v54  ;;  %4754 = vmatpush2.bf16.msra.mxu1 %v6484_v55  ;;  %v6537_v54 = vld [vmem:[%s8884_s8 + $0x354] ss:$28 sps:$4 sm:$0xff]  }
 0x31b   :  { %4764 = vmatprep.subr.bf16.mxu0 %v6489_v56  ;;  %4805 = vmatprep.subr.bf16.mxu1 %v6492_v47  ;;  %v6540_v55 = vld [vmem:[%s8884_s8 + $0x6d4] ss:$28 sps:$4 sm:$0xff]  }
 0x31c   :  { %v6535_v56 = vld [vmem:[%s8884_s8 + $0x350] ss:$28 sps:$4 sm:$0xff]  }
 0x31d   :  { %v6538_v47 = vld [vmem:[%s8884_s8 + $0x6d0] ss:$28 sps:$4 sm:$0xff]  }
 0x39d   :  { %v3181_v6 = vpop.f32.mrf.mxu0  ;;  %v3222_v35 = vpop.f32.mrf.mxu1 }
 0x39e   :  { %v3182_v2 = vadd.f32 %v3181_v6, %v2810_v15  ;;  %v3223_v3 = vadd.f32 %v3222_v35, %v2818_v57  ;;  %v6546_v15 = vld [vmem:[%s8884_s8 + $0x69c] ss:$28 sps:$4 sm:$0xff]   ;;  %v6552_v6 = vld [vmem:[%s8884_s8 + $0x664] ss:$28 sps:$4 sm:$0xff]  }
 0x39f   :  { %v3183_v4 = vpop.f32.mrf.mxu0  ;;  %v3224_v5 = vpop.f32.mrf.mxu1  ;;  %v6541_v57 = vld [vmem:[%s8884_s8 + $0x318] ss:$28 sps:$4 sm:$0xff]   ;;  %v6547_v35 = vld [vmem:[%s8884_s8 + $0x2e0] ss:$28 sps:$4 sm:$0xff]  }
 0x3a0   :  { %v3184_v8 = vadd.f32 %v3183_v4, %v2814_v58  ;;  %v3225_v9 = vadd.f32 %v3224_v5, %v2822_v59  ;;  %v3229_v10 = vmax.f32 %v3182_v2, 0.0  ;;  %v3231_v11 = vmax.f32 %v3223_v3, 0.0  ;;  %v6544_v58 = vld [vmem:[%s8884_s8 + $0x698] ss:$28 sps:$4 sm:$0xff]   ;;  %v6549_v59 = vld [vmem:[%s8884_s8 + $0x2e4] ss:$28 sps:$4 sm:$0xff]  }
 0x3a1   :  { %v3185_v12 = vpop.f32.mrf.mxu0  ;;  %v3226_v13 = vpop.f32.mrf.mxu1  ;;  %v6550_v2 = vld [vmem:[%s8884_s8 + $0x660] ss:$28 sps:$4 sm:$0xff]   ;;  %v6555_v3 = vld [vmem:[%s8884_s8 + $0x2ac] ss:$28 sps:$4 sm:$0xff]  }
 0x3a2   :  { %v3230_v14 = vmax.f32 %v3184_v8, 0.0  ;;  %v3232_v17 = vmax.f32 %v3225_v9, 0.0  ;;  %v8369_v0 = vpack.c.bf16 %v3229_v10, %v3229_v10  ;;  %v8371_v22 = vpack.c.bf16 %v3231_v11, %v3231_v11  ;;  %v6558_v4 = vld [vmem:[%s8884_s8 + $0x62c] ss:$28 sps:$4 sm:$0xff]   ;;  %v6561_v9 = vld [vmem:[%s8884_s8 + $0x274] ss:$28 sps:$4 sm:$0xff]  }
 0x3a3   :  { %v3186_v20 = vpop.f32.mrf.mxu0  ;;  %v3227_v25 = vpop.f32.mrf.mxu1  ;;  %v6553_v5 = vld [vmem:[%s8884_s8 + $0x2a8] ss:$28 sps:$4 sm:$0xff]   ;;  %v6564_v10 = vld [vmem:[%s8884_s8 + $0x5f4] ss:$28 sps:$4 sm:$0xff]   ;;  %v6567_v13 = vld [vmem:[%s8884_s8 + $0x23c] ss:$28 sps:$4 sm:$0xff]  }
 0x3a4   :  { %v8359_v26 = vpack.c.bf16 %v3230_v14, %v3230_v14  ;;  %v8361_v18 = vpack.c.bf16 %v3232_v17, %v3232_v17  ;;  %v6556_v8 = vld [vmem:[%s8884_s8 + $0x628] ss:$28 sps:$4 sm:$0xff]   ;;  %v6559_v11 = vld [vmem:[%s8884_s8 + $0x270] ss:$28 sps:$4 sm:$0xff]   ;;  %v6570_v14 = vld [vmem:[%s8884_s8 + $0x5bc] ss:$28 sps:$4 sm:$0xff]  }
 0x3a5   :  { %v6562_v12 = vld [vmem:[%s8884_s8 + $0x5f0] ss:$28 sps:$4 sm:$0xff]   ;;  %v6565_v17 = vld [vmem:[%s8884_s8 + $0x238] ss:$28 sps:$4 sm:$0xff]   ;;  %v6573_v25 = vld [vmem:[%s8884_s8 + $0x204] ss:$28 sps:$4 sm:$0xff]  }
 0x3a6   :  { %4714 = vmatprep.mubr.bf16.mxu0 %v8359_v26  ;;  %4755 = vmatprep.mubr.bf16.mxu1 %v8361_v18  ;;  %v6568_v20 = vld [vmem:[%s8884_s8 + $0x5b8] ss:$28 sps:$4 sm:$0xff]  }
 0x3a7   :  { %4715 = vmatmul.mubr.bf16.vlgmr.msra.gmra.mxu0 %v8369_v0  ;;  %4756 = vmatmul.mubr.bf16.vlgmr.msra.gmra.mxu1 %v8371_v22 }
 0x3a8   :  { %4765 = vmatpush1.bf16.msra.mxu0 %v6487_v21  ;;  %4806 = vmatpush1.bf16.msra.mxu1 %v6490_v19  ;;  %v6576_v21 = vld [vmem:[%s8884_s8 + $0x584] ss:$28 sps:$4 sm:$0xff]  }
 0x3a9   :  { %4796 = vmatprep.mubr.bf16.mxu0 %v8359_v26  ;;  %4837 = vmatprep.mubr.bf16.mxu1 %v8361_v18  ;;  %v6571_v19 = vld [vmem:[%s8884_s8 + $0x200] ss:$28 sps:$4 sm:$0xff]  }
 0x3aa   :  { %4766 = vmatprep.subr.bf16.mxu0 %v6495_v23  ;;  %4807 = vmatprep.subr.bf16.mxu1 %v6498_v27  ;;  %v6574_v23 = vld [vmem:[%s8884_s8 + $0x580] ss:$28 sps:$4 sm:$0xff]   ;;  %v6579_v27 = vld [vmem:[%s8884_s8 + $0x1cc] ss:$28 sps:$4 sm:$0xff]  }
 0x3ac   :  { %4767 = vmatpush1.bf16.msra.mxu0 %v6493_v51  ;;  %4808 = vmatpush1.bf16.msra.mxu1 %v6496_v24  ;;  %v6582_v51 = vld [vmem:[%s8884_s8 + $0x54c] ss:$28 sps:$4 sm:$0xff]  }
 0x3ad   :  { %4768 = vmatprep.subr.bf16.mxu0 %v6501_v28  ;;  %4809 = vmatprep.subr.bf16.mxu1 %v6504_v7  ;;  %v6577_v24 = vld [vmem:[%s8884_s8 + $0x1c8] ss:$28 sps:$4 sm:$0xff]   ;;  %v6585_v7 = vld [vmem:[%s8884_s8 + $0x19c] ss:$28 sps:$4 sm:$0xff]  }
 0x3ae   :  { %v6580_v28 = vld [vmem:[%s8884_s8 + $0x548] ss:$28 sps:$4 sm:$0xff]  }
 0x3b0   :  { %4769 = vmatpush1.bf16.msra.mxu0 %v6499_v29  ;;  %4810 = vmatpush1.bf16.msra.mxu1 %v6502_v30  ;;  %v6588_v29 = vld [vmem:[%s8884_s8 + $0x51c] ss:$28 sps:$4 sm:$0xff]  }
 0x3b1   :  { %4770 = vmatprep.subr.bf16.mxu0 %v6507_v31  ;;  %4811 = vmatprep.subr.bf16.mxu1 %v6510_v16  ;;  %v6583_v30 = vld [vmem:[%s8884_s8 + $0x198] ss:$28 sps:$4 sm:$0xff]   ;;  %v6591_v16 = vld [vmem:[%s8884_s8 + $0x164] ss:$28 sps:$4 sm:$0xff]  }
 0x3b2   :  { %v6586_v31 = vld [vmem:[%s8884_s8 + $0x518] ss:$28 sps:$4 sm:$0xff]  }
 0x3b4   :  { %4771 = vmatpush1.bf16.msra.mxu0 %v6505_v32  ;;  %4812 = vmatpush1.bf16.msra.mxu1 %v6508_v33  ;;  %v6594_v32 = vld [vmem:[%s8884_s8 + $0x4e4] ss:$28 sps:$4 sm:$0xff]  }
 0x3b5   :  { %4772 = vmatprep.subr.bf16.mxu0 %v6513_v34  ;;  %4813 = vmatprep.subr.bf16.mxu1 %v6516_v36  ;;  %v6589_v33 = vld [vmem:[%s8884_s8 + $0x160] ss:$28 sps:$4 sm:$0xff]   ;;  %v6597_v36 = vld [vmem:[%s8884_s8 + $0x12c] ss:$28 sps:$4 sm:$0xff]  }
 0x3b6   :  { %v6592_v34 = vld [vmem:[%s8884_s8 + $0x4e0] ss:$28 sps:$4 sm:$0xff]  }
 0x3b8   :  { %4773 = vmatpush1.bf16.msra.mxu0 %v6511_v37  ;;  %4814 = vmatpush1.bf16.msra.mxu1 %v6514_v38  ;;  %v6600_v37 = vld [vmem:[%s8884_s8 + $0x4ac] ss:$28 sps:$4 sm:$0xff]  }
 0x3b9   :  { %4774 = vmatprep.subr.bf16.mxu0 %v6519_v39  ;;  %4815 = vmatprep.subr.bf16.mxu1 %v6522_v40  ;;  %v6595_v38 = vld [vmem:[%s8884_s8 + $0x128] ss:$28 sps:$4 sm:$0xff]   ;;  %v6603_v40 = vld [vmem:[%s8884_s8 + $0xf4] ss:$28 sps:$4 sm:$0xff]  }
 0x3ba   :  { %v6598_v39 = vld [vmem:[%s8884_s8 + $0x4a8] ss:$28 sps:$4 sm:$0xff]  }
 0x3bc   :  { %4775 = vmatpush1.bf16.msra.mxu0 %v6517_v41  ;;  %4816 = vmatpush1.bf16.msra.mxu1 %v6520_v42  ;;  %v6606_v41 = vld [vmem:[%s8884_s8 + $0x474] ss:$28 sps:$4 sm:$0xff]  }
 0x3bd   :  { %4776 = vmatprep.subr.bf16.mxu0 %v6525_v43  ;;  %4817 = vmatprep.subr.bf16.mxu1 %v6528_v45  ;;  %v6601_v42 = vld [vmem:[%s8884_s8 + $0xf0] ss:$28 sps:$4 sm:$0xff]   ;;  %v6609_v45 = vld [vmem:[%s8884_s8 + $0xbc] ss:$28 sps:$4 sm:$0xff]  }
 0x3be   :  { %v6604_v43 = vld [vmem:[%s8884_s8 + $0x470] ss:$28 sps:$4 sm:$0xff]  }
 0x3c0   :  { %4777 = vmatpush1.bf16.msra.mxu0 %v6523_v46  ;;  %4818 = vmatpush1.bf16.msra.mxu1 %v6526_v48  ;;  %v6612_v46 = vld [vmem:[%s8884_s8 + $0x43c] ss:$28 sps:$4 sm:$0xff]  }
 0x3c1   :  { %4778 = vmatprep.subr.bf16.mxu0 %v6531_v49  ;;  %4819 = vmatprep.subr.bf16.mxu1 %v6534_v50  ;;  %v6607_v48 = vld [vmem:[%s8884_s8 + $0xb8] ss:$28 sps:$4 sm:$0xff]   ;;  %v6615_v50 = vld [vmem:[%s8884_s8 + $0x84] ss:$28 sps:$4 sm:$0xff]  }
 0x3c2   :  { %v6610_v49 = vld [vmem:[%s8884_s8 + $0x438] ss:$28 sps:$4 sm:$0xff]  }
 0x3c4   :  { %4779 = vmatpush1.bf16.msra.mxu0 %v6529_v52  ;;  %4820 = vmatpush1.bf16.msra.mxu1 %v6532_v53  ;;  %v6618_v52 = vld [vmem:[%s8884_s8 + $0x404] ss:$28 sps:$4 sm:$0xff]  }
 0x3c5   :  { %4780 = vmatprep.subr.bf16.mxu0 %v6537_v54  ;;  %4821 = vmatprep.subr.bf16.mxu1 %v6540_v55  ;;  %v6613_v53 = vld [vmem:[%s8884_s8 + $0x80] ss:$28 sps:$4 sm:$0xff]   ;;  %v6621_v55 = vld [vmem:[%s8884_s8 + $0x4c] ss:$28 sps:$4 sm:$0xff]  }
 0x3c6   :  { %v6616_v54 = vld [vmem:[%s8884_s8 + $0x400] ss:$28 sps:$4 sm:$0xff]  }
 0x3c8   :  { %4781 = vmatpush2.bf16.msra.mxu0 %v6535_v56  ;;  %4822 = vmatpush2.bf16.msra.mxu1 %v6538_v47  ;;  %v6624_v56 = vld [vmem:[%s8884_s8 + $0x3cc] ss:$28 sps:$4 sm:$0xff]  }
 0x3c9   :  { %4782 = vmatprep.subr.bf16.mxu0 %v6543_v44  ;;  %4823 = vmatprep.subr.bf16.mxu1 %v6546_v15  ;;  %v6619_v47 = vld [vmem:[%s8884_s8 + $0x48] ss:$28 sps:$4 sm:$0xff]   ;;  %v6627_v15 = vld [vmem:[%s8884_s8 + $0x14] ss:$28 sps:$4 sm:$0xff]  }
 0x3ca   :  { %v6622_v44 = vld [vmem:[%s8884_s8 + $0x3c8] ss:$28 sps:$4 sm:$0xff]  }
 0x3cc   :  { %4783 = vmatpush2.bf16.msra.mxu0 %v6541_v57  ;;  %4824 = vmatpush2.bf16.msra.mxu1 %v6544_v58  ;;  %v6630_v57 = vld [vmem:[%s8884_s8 + $0x394] ss:$28 sps:$4 sm:$0xff]  }
 0x3cd   :  { %4784 = vmatprep.subr.bf16.mxu0 %v6549_v59  ;;  %4825 = vmatprep.subr.bf16.mxu1 %v6552_v6  ;;  %v6625_v58 = vld [vmem:[%s8884_s8 + $0x10] ss:$28 sps:$4 sm:$0xff]   ;;  %v6633_v6 = vld [vmem:[%s8884_s8 + $0x35c] ss:$28 sps:$4 sm:$0xff]  }
 0x3ce   :  { %v6628_v59 = vld [vmem:[%s8884_s8 + $0x390] ss:$28 sps:$4 sm:$0xff]  }
 0x3d0   :  { %4785 = vmatpush2.bf16.msra.mxu0 %v6547_v35  ;;  %4826 = vmatpush2.bf16.msra.mxu1 %v6550_v2  ;;  %v6636_v35 = vld [vmem:[%s8884_s8 + $0x6dc] ss:$28 sps:$4 sm:$0xff]  }
 0x3d1   :  { %4786 = vmatprep.subr.bf16.mxu0 %v6555_v3  ;;  %4827 = vmatprep.subr.bf16.mxu1 %v6558_v4  ;;  %v6631_v2 = vld [vmem:[%s8884_s8 + $0x358] ss:$28 sps:$4 sm:$0xff]   ;;  %v6639_v4 = vld [vmem:[%s8884_s8 + $0x324] ss:$28 sps:$4 sm:$0xff]  }
 0x3d2   :  { %v6634_v3 = vld [vmem:[%s8884_s8 + $0x6d8] ss:$28 sps:$4 sm:$0xff]  }
 0x3d4   :  { %4787 = vmatpush2.bf16.msra.mxu0 %v6553_v5  ;;  %4828 = vmatpush2.bf16.msra.mxu1 %v6556_v8  ;;  %v6642_v5 = vld [vmem:[%s8884_s8 + $0x6a4] ss:$28 sps:$4 sm:$0xff]  }
 0x3d5   :  { %4788 = vmatprep.subr.bf16.mxu0 %v6561_v9  ;;  %4829 = vmatprep.subr.bf16.mxu1 %v6564_v10  ;;  %v6637_v8 = vld [vmem:[%s8884_s8 + $0x320] ss:$28 sps:$4 sm:$0xff]   ;;  %v6645_v10 = vld [vmem:[%s8884_s8 + $0x2ec] ss:$28 sps:$4 sm:$0xff]  }
 0x3d6   :  { %v6640_v9 = vld [vmem:[%s8884_s8 + $0x6a0] ss:$28 sps:$4 sm:$0xff]  }
 0x3d8   :  { %4789 = vmatpush2.bf16.msra.mxu0 %v6559_v11  ;;  %4830 = vmatpush2.bf16.msra.mxu1 %v6562_v12  ;;  %v6648_v11 = vld [vmem:[%s8884_s8 + $0x66c] ss:$28 sps:$4 sm:$0xff]  }
 0x3d9   :  { %4790 = vmatprep.subr.bf16.mxu0 %v6567_v13  ;;  %4831 = vmatprep.subr.bf16.mxu1 %v6570_v14  ;;  %v6643_v12 = vld [vmem:[%s8884_s8 + $0x2e8] ss:$28 sps:$4 sm:$0xff]   ;;  %v6651_v14 = vld [vmem:[%s8884_s8 + $0x2b4] ss:$28 sps:$4 sm:$0xff]  }
 0x3da   :  { %v6646_v13 = vld [vmem:[%s8884_s8 + $0x668] ss:$28 sps:$4 sm:$0xff]  }
 0x3dc   :  { %4791 = vmatpush2.bf16.msra.mxu0 %v6565_v17  ;;  %4832 = vmatpush2.bf16.msra.mxu1 %v6568_v20  ;;  %v6654_v17 = vld [vmem:[%s8884_s8 + $0x634] ss:$28 sps:$4 sm:$0xff]  }
 0x3dd   :  { %4792 = vmatprep.subr.bf16.mxu0 %v6573_v25  ;;  %4833 = vmatprep.subr.bf16.mxu1 %v6576_v21  ;;  %v6649_v20 = vld [vmem:[%s8884_s8 + $0x2b0] ss:$28 sps:$4 sm:$0xff]   ;;  %v6657_v21 = vld [vmem:[%s8884_s8 + $0x27c] ss:$28 sps:$4 sm:$0xff]  }
 0x3de   :  { %v6652_v25 = vld [vmem:[%s8884_s8 + $0x630] ss:$28 sps:$4 sm:$0xff]  }
 0x3e0   :  { %4793 = vmatpush2.bf16.msra.mxu0 %v6571_v19  ;;  %4834 = vmatpush2.bf16.msra.mxu1 %v6574_v23  ;;  %v6660_v19 = vld [vmem:[%s8884_s8 + $0x5fc] ss:$28 sps:$4 sm:$0xff]  }
 0x3e1   :  { %4794 = vmatprep.subr.bf16.mxu0 %v6579_v27  ;;  %4835 = vmatprep.subr.bf16.mxu1 %v6582_v51  ;;  %v6655_v23 = vld [vmem:[%s8884_s8 + $0x278] ss:$28 sps:$4 sm:$0xff]   ;;  %v6663_v51 = vld [vmem:[%s8884_s8 + $0x244] ss:$28 sps:$4 sm:$0xff]  }
 0x3e2   :  { %v6658_v27 = vld [vmem:[%s8884_s8 + $0x5f8] ss:$28 sps:$4 sm:$0xff]  }
 0x3e4   :  { %4795 = vmatpush2.bf16.msra.mxu0 %v6577_v24  ;;  %4836 = vmatpush2.bf16.msra.mxu1 %v6580_v28  ;;  %v6666_v24 = vld [vmem:[%s8884_s8 + $0x5c4] ss:$28 sps:$4 sm:$0xff]  }
 0x3e5   :  { %4846 = vmatprep.subr.bf16.mxu0 %v6585_v7  ;;  %4887 = vmatprep.subr.bf16.mxu1 %v6588_v29  ;;  %v6661_v28 = vld [vmem:[%s8884_s8 + $0x240] ss:$28 sps:$4 sm:$0xff]   ;;  %v6669_v29 = vld [vmem:[%s8884_s8 + $0x20c] ss:$28 sps:$4 sm:$0xff]  }
 0x3e6   :  { %v6664_v7 = vld [vmem:[%s8884_s8 + $0x5c0] ss:$28 sps:$4 sm:$0xff]  }
 0x3e7   :  { %4797 = vmatmul.mubr.bf16.vlgmr.msra.gmra.mxu0 %v8369_v0  ;;  %4838 = vmatmul.mubr.bf16.vlgmr.msra.gmra.mxu1 %v8371_v22 }
 0x3e8   :  { %4847 = vmatpush1.bf16.msra.mxu0 %v6583_v30  ;;  %4878 = vmatprep.mubr.bf16.mxu0 %v8359_v26  ;;  %v6672_v30 = vld [vmem:[%s8884_s8 + $0x58c] ss:$28 sps:$4 sm:$0xff]  }
 0x3e9   :  { %4888 = vmatpush1.bf16.msra.mxu1 %v6586_v31  ;;  %4919 = vmatprep.mubr.bf16.mxu1 %v8361_v18  ;;  %v6667_v31 = vld [vmem:[%s8884_s8 + $0x208] ss:$28 sps:$4 sm:$0xff]  }
 0x3ea   :  { %4848 = vmatprep.subr.bf16.mxu0 %v6591_v16  ;;  %4889 = vmatprep.subr.bf16.mxu1 %v6594_v32  ;;  %v6670_v16 = vld [vmem:[%s8884_s8 + $0x588] ss:$28 sps:$4 sm:$0xff]   ;;  %v6675_v32 = vld [vmem:[%s8884_s8 + $0x1d4] ss:$28 sps:$4 sm:$0xff]  }
 0x3ec   :  { %4849 = vmatpush1.bf16.msra.mxu0 %v6589_v33  ;;  %v6678_v33 = vld [vmem:[%s8884_s8 + $0x554] ss:$28 sps:$4 sm:$0xff]  }
 0x3ed   :  { %4890 = vmatpush1.bf16.msra.mxu1 %v6592_v34  ;;  %4850 = vmatprep.subr.bf16.mxu0 %v6597_v36  ;;  %v6673_v34 = vld [vmem:[%s8884_s8 + $0x1d0] ss:$28 sps:$4 sm:$0xff]  }
 0x3ee   :  { %4891 = vmatprep.subr.bf16.mxu1 %v6600_v37  ;;  %v6676_v36 = vld [vmem:[%s8884_s8 + $0x550] ss:$28 sps:$4 sm:$0xff]   ;;  %v6679_v37 = vld [vmem:[%s8884_s8 + $0x360] ss:$28 sps:$4 sm:$0xff]  }
 0x3f0   :  { %4851 = vmatpush1.bf16.msra.mxu0 %v6595_v38  ;;  %v6680_v38 = vld [vmem:[%s8884_s8 + $0x6e0] ss:$28 sps:$4 sm:$0xff]  }
 0x3f1   :  { %4892 = vmatpush1.bf16.msra.mxu1 %v6598_v39  ;;  %4852 = vmatprep.subr.bf16.mxu0 %v6603_v40  ;;  %v6681_v39 = vld [vmem:[%s8884_s8 + $0x1a0] ss:$28 sps:$4 sm:$0xff]  }
 0x3f2   :  { %4893 = vmatprep.subr.bf16.mxu1 %v6606_v41  ;;  %v6682_v40 = vld [vmem:[%s8884_s8 + $0x520] ss:$28 sps:$4 sm:$0xff]   ;;  %v6683_v41 = vld [vmem:[%s8884_s8 + $0x328] ss:$28 sps:$4 sm:$0xff]  }
 0x3f4   :  { %4853 = vmatpush1.bf16.msra.mxu0 %v6601_v42  ;;  %v6684_v42 = vld [vmem:[%s8884_s8 + $0x6a8] ss:$28 sps:$4 sm:$0xff]  }
 0x3f5   :  { %4894 = vmatpush1.bf16.msra.mxu1 %v6604_v43  ;;  %4854 = vmatprep.subr.bf16.mxu0 %v6609_v45  ;;  %v6685_v43 = vld [vmem:[%s8884_s8 + $0x168] ss:$28 sps:$4 sm:$0xff]  }
 0x3f6   :  { %4895 = vmatprep.subr.bf16.mxu1 %v6612_v46  ;;  %v6686_v45 = vld [vmem:[%s8884_s8 + $0x4e8] ss:$28 sps:$4 sm:$0xff]   ;;  %v6687_v46 = vld [vmem:[%s8884_s8 + $0x2f0] ss:$28 sps:$4 sm:$0xff]  }
 0x3f8   :  { %4855 = vmatpush1.bf16.msra.mxu0 %v6607_v48  ;;  %v6688_v48 = vld [vmem:[%s8884_s8 + $0x670] ss:$28 sps:$4 sm:$0xff]  }
 0x3f9   :  { %4896 = vmatpush1.bf16.msra.mxu1 %v6610_v49  ;;  %4856 = vmatprep.subr.bf16.mxu0 %v6615_v50  ;;  %v6690_v49 = vld [vmem:[%s8884_s8 + $0x4b0] ss:$28 sps:$4 sm:$0xff]   ;;  %v6692_v50 = vld [vmem:[%s8884_s8 + $0x638] ss:$28 sps:$4 sm:$0xff]  }
 0x3fa   :  { %4897 = vmatprep.subr.bf16.mxu1 %v6618_v52  ;;  %v6693_v52 = vld [vmem:[%s8884_s8 + $0xf8] ss:$28 sps:$4 sm:$0xff]  }
 0x3fc   :  { %4857 = vmatpush1.bf16.msra.mxu0 %v6613_v53  ;;  %v6694_v53 = vld [vmem:[%s8884_s8 + $0x478] ss:$28 sps:$4 sm:$0xff]  }
 0x3fd   :  { %4898 = vmatpush1.bf16.msra.mxu1 %v6616_v54  ;;  %4858 = vmatprep.subr.bf16.mxu0 %v6621_v55  ;;  %v6695_v54 = vld [vmem:[%s8884_s8 + $0x280] ss:$28 sps:$4 sm:$0xff]  }
 0x3fe   :  { %4899 = vmatprep.subr.bf16.mxu1 %v6624_v56  ;;  %v6696_v55 = vld [vmem:[%s8884_s8 + $0x600] ss:$28 sps:$4 sm:$0xff]  }
 0x3ff   :  { %v6697_v56 = vld [vmem:[%s8884_s8 + $0xc0] ss:$28 sps:$4 sm:$0xff]  }
 0x400   :  { %4859 = vmatpush1.bf16.msra.mxu0 %v6619_v47  ;;  %v6698_v47 = vld [vmem:[%s8884_s8 + $0x440] ss:$28 sps:$4 sm:$0xff]  }
 0x401   :  { %4900 = vmatpush1.bf16.msra.mxu1 %v6622_v44  ;;  %4860 = vmatprep.subr.bf16.mxu0 %v6627_v15  ;;  %v6699_v44 = vld [vmem:[%s8884_s8 + $0x248] ss:$28 sps:$4 sm:$0xff]  }
 0x402   :  { %4901 = vmatprep.subr.bf16.mxu1 %v6630_v57  ;;  %v6700_v15 = vld [vmem:[%s8884_s8 + $0x5c8] ss:$28 sps:$4 sm:$0xff]  }
 0x403   :  { %v6701_v57 = vld [vmem:[%s8884_s8 + $0x88] ss:$28 sps:$4 sm:$0xff]  }
 0x404   :  { %4861 = vmatpush1.bf16.msra.mxu0 %v6625_v58  ;;  %v6702_v58 = vld [vmem:[%s8884_s8 + $0x408] ss:$28 sps:$4 sm:$0xff]  }
 0x405   :  { %4902 = vmatpush1.bf16.msra.mxu1 %v6628_v59  ;;  %4862 = vmatprep.subr.bf16.mxu0 %v6633_v6  ;;  %v6703_v59 = vld [vmem:[%s8884_s8 + $0x210] ss:$28 sps:$4 sm:$0xff]  }
 0x406   :  { %4903 = vmatprep.subr.bf16.mxu1 %v6636_v35  ;;  %v6704_v6 = vld [vmem:[%s8884_s8 + $0x590] ss:$28 sps:$4 sm:$0xff]  }
 0x407   :  { %v6705_v35 = vld [vmem:[%s8884_s8 + $0x50] ss:$28 sps:$4 sm:$0xff]  }
 0x408   :  { %4863 = vmatpush2.bf16.msra.mxu0 %v6631_v2  ;;  %v6706_v2 = vld [vmem:[%s8884_s8 + $0x3d0] ss:$28 sps:$4 sm:$0xff]  }
 0x409   :  { %4904 = vmatpush2.bf16.msra.mxu1 %v6634_v3  ;;  %4864 = vmatprep.subr.bf16.mxu0 %v6639_v4  ;;  %v6707_v3 = vld [vmem:[%s8884_s8 + $0x1d8] ss:$28 sps:$4 sm:$0xff]  }
 0x40a   :  { %4905 = vmatprep.subr.bf16.mxu1 %v6642_v5  ;;  %v6708_v4 = vld [vmem:[%s8884_s8 + $0x558] ss:$28 sps:$4 sm:$0xff]  }
 0x40b   :  { %v6709_v5 = vld [vmem:[%s8884_s8 + $0x18] ss:$28 sps:$4 sm:$0xff]  }
 0x40c   :  { %4865 = vmatpush2.bf16.msra.mxu0 %v6637_v8  ;;  %v6710_v8 = vld [vmem:[%s8884_s8 + $0x398] ss:$28 sps:$4 sm:$0xff]  }
 0x40d   :  { %4906 = vmatpush2.bf16.msra.mxu1 %v6640_v9  ;;  %4866 = vmatprep.subr.bf16.mxu0 %v6645_v10  ;;  %v3493_v9 = vld [vmem:[%s8889_s9] sm:$0xff] }
 0x40e   :  { %4907 = vmatprep.subr.bf16.mxu1 %v6648_v11  ;;  %v3498_v10 = vrot.slane %v3493_v9, %v7709_v63  ;;  %v3502_v11 = vrot.slane %v3493_v9, %v7717_v1  ;;  %v3506_v63 = vrot.slane %v3493_v9, %v7825_v60  ;;  %v3510_v1 = vrot.slane %v3493_v9, %v7828_v61 }
 0x40f   :  { %v3513_v60 = vsub.s32 4, %v7706_v62  ;;  %v3517_v61 = vsub.s32 5, %v7706_v62 }
 0x410   :  { %4867 = vmatpush2.bf16.msra.mxu0 %v6643_v12 }
 0x411   :  { %4908 = vmatpush2.bf16.msra.mxu1 %v6646_v13  ;;  %4868 = vmatprep.subr.bf16.mxu0 %v6651_v14 }
 0x412   :  { %4909 = vmatprep.subr.bf16.mxu1 %v6654_v17 }
 0x414   :  { %4869 = vmatpush2.bf16.msra.mxu0 %v6649_v20 }
 0x415   :  { %4910 = vmatpush2.bf16.msra.mxu1 %v6652_v25  ;;  %4870 = vmatprep.subr.bf16.mxu0 %v6657_v21 }
 0x416   :  { %4911 = vmatprep.subr.bf16.mxu1 %v6660_v19 }
 0x418   :  { %4871 = vmatpush2.bf16.msra.mxu0 %v6655_v23 }
 0x419   :  { %4912 = vmatpush2.bf16.msra.mxu1 %v6658_v27  ;;  %4872 = vmatprep.subr.bf16.mxu0 %v6663_v51 }
 0x41a   :  { %4913 = vmatprep.subr.bf16.mxu1 %v6666_v24 }
 0x41c   :  { %4873 = vmatpush2.bf16.msra.mxu0 %v6661_v28 }
 0x41d   :  { %4914 = vmatpush2.bf16.msra.mxu1 %v6664_v7  ;;  %4874 = vmatprep.subr.bf16.mxu0 %v6669_v29 }
 0x41e   :  { %4915 = vmatprep.subr.bf16.mxu1 %v6672_v30 }
 0x420   :  { %4875 = vmatpush2.bf16.msra.mxu0 %v6667_v31 }
 0x421   :  { %4916 = vmatpush2.bf16.msra.mxu1 %v6670_v16  ;;  %4876 = vmatprep.subr.bf16.mxu0 %v6675_v32 }
 0x422   :  { %4917 = vmatprep.subr.bf16.mxu1 %v6678_v33 }
 0x424   :  { %4877 = vmatpush2.bf16.msra.mxu0 %v6673_v34 }
 0x425   :  { %4918 = vmatpush2.bf16.msra.mxu1 %v6676_v36  ;;  %5715 = vmatprep.subr.bf16.mxu0 %v6679_v37 }
 0x426   :  { %5737 = vmatprep.subr.bf16.mxu1 %v6680_v38 }
 0x427   :  { %4879 = vmatmul.mubr.bf16.vlgmr.msra.gmra.mxu0 %v8369_v0 }
 0x428   :  { %4920 = vmatmul.mubr.bf16.vlgmr.msra.gmra.mxu1 %v8371_v22  ;;  %5716 = vmatpush3.bf16.msra.mxu0 %v6681_v39 }
 0x429   :  { %4960 = vmatprep.mubr.bf16.mxu0 %v8359_v26  ;;  %5738 = vmatpush3.bf16.msra.mxu1 %v6682_v40  ;;  %v6689_v26 = vld [vmem:[%s8884_s8 + $0x130] ss:$28 sps:$4 sm:$0xff]  }
 0x42a   :  { %5000 = vmatprep.mubr.bf16.mxu1 %v8361_v18  ;;  %5717 = vmatprep.subr.bf16.mxu0 %v6683_v41  ;;  %v6691_v18 = vld [vmem:[%s8884_s8 + $0x2b8] ss:$28 sps:$4 sm:$0xff]  }
 0x42b   :  { %5739 = vmatprep.subr.bf16.mxu1 %v6684_v42 }
 0x42c   :  { %5718 = vmatpush3.bf16.msra.mxu0 %v6685_v43  ;;  %v3514_v43 = vrot.slane %v3493_v9, %v3513_v60 }
 0x42d   :  { %5740 = vmatpush3.bf16.msra.mxu1 %v6686_v45  ;;  %5719 = vmatprep.subr.bf16.mxu0 %v6687_v46  ;;  %v3518_v45 = vrot.slane %v3493_v9, %v3517_v61 }
 0x42e   :  { %5741 = vmatprep.subr.bf16.mxu1 %v6688_v48 }
 0x430   :  { %5720 = vmatpush3.bf16.msra.mxu0 %v6689_v26 }
 0x431   :  { %5742 = vmatpush3.bf16.msra.mxu1 %v6690_v49  ;;  %5721 = vmatprep.subr.bf16.mxu0 %v6691_v18 }
 0x432   :  { %5743 = vmatprep.subr.bf16.mxu1 %v6692_v50 }
 0x434   :  { %5722 = vmatpush3.bf16.msra.mxu0 %v6693_v52 }
 0x435   :  { %5744 = vmatpush3.bf16.msra.mxu1 %v6694_v53  ;;  %5723 = vmatprep.subr.bf16.mxu0 %v6695_v54 }
 0x436   :  { %5745 = vmatprep.subr.bf16.mxu1 %v6696_v55 }
 0x438   :  { %5724 = vmatpush3.bf16.msra.mxu0 %v6697_v56 }
 0x439   :  { %5746 = vmatpush3.bf16.msra.mxu1 %v6698_v47  ;;  %5725 = vmatprep.subr.bf16.mxu0 %v6699_v44 }
 0x43a   :  { %5747 = vmatprep.subr.bf16.mxu1 %v6700_v15 }
 0x43c   :  { %5726 = vmatpush3.bf16.msra.mxu0 %v6701_v57 }
 0x43d   :  { %5748 = vmatpush3.bf16.msra.mxu1 %v6702_v58  ;;  %5727 = vmatprep.subr.bf16.mxu0 %v6703_v59  ;;  %v3521_v58 = vsub.s32 6, %v7706_v62 }
 0x43e   :  { %5749 = vmatprep.subr.bf16.mxu1 %v6704_v6 }
 0x440   :  { %5728 = vmatpush3.bf16.msra.mxu0 %v6705_v35  ;;  %v3522_v35 = vrot.slane %v3493_v9, %v3521_v58 }
 0x441   :  { %5750 = vmatpush3.bf16.msra.mxu1 %v6706_v2  ;;  %5729 = vmatprep.subr.bf16.mxu0 %v6707_v3 }
 0x442   :  { %5751 = vmatprep.subr.bf16.mxu1 %v6708_v4 }
 0x444   :  { %5730 = vmatpush3.bf16.msra.mxu0 %v6709_v5 }
 0x445   :  { %5752 = vmatpush3.bf16.msra.mxu1 %v6710_v8 }
 0x447   :  { %4961 = vmatmul.mubr.bf16.vlgmr.msra.gmra.mxu0 %v8369_v0 }
 0x448   :  { %5001 = vmatmul.mubr.bf16.vlgmr.msra.gmra.mxu1 %v8371_v22 }
 0x467   :  { %v4716_v12 = vpop.f32.mrf.mxu0  ;;  %v4757_v13 = vpop.f32.mrf.mxu1 }
 0x468   :  { %v4717_v14 = vadd.f32 %v4716_v12, %v3498_v10 }
 0x469   :  { %v4718_v17 = vpop.f32.mrf.mxu0  ;;  %v4759_v20 = vpop.f32.mrf.mxu1 }
 0x46a   :  { %v4758_v25 = vadd.f32 %v4757_v13, %v4717_v14  ;;  %v4719_v21 = vadd.f32 %v4718_v17, %v3502_v11 }
 0x46b   :  { %v4720_v19 = vpop.f32.mrf.mxu0  ;;  %v4761_v23 = vpop.f32.mrf.mxu1 }
 0x46c   :  { %v4760_v0 = vadd.f32 %v4759_v20, %v4719_v21  ;;  %v5008_v51 = vmax.f32 %v4758_v25, 0.0 }
 0x46d   :  { %v4721_v27 = vpop.f32.mrf.mxu0  ;;  %v4762_v22 = vpop.f32.mrf.mxu1 }
 0x46e   :  { %v5009_v24 = vmax.f32 %v4760_v0, 0.0 }
 0x470   :  { %v5711_v28 = vpack.c.bf16 %v5009_v24, %v5008_v51 }
 0x472   :  { %5044 = vst [vmem:[%s8890_s10] sm:$0xff] %v5711_v28 }
 0x4a7   :  { %v4798_v7 = vpop.f32.mrf.mxu0  ;;  %v4839_v29 = vpop.f32.mrf.mxu1 }
 0x4a8   :  { %v4799_v30 = vadd.f32 %v4798_v7, %v3506_v63 }
 0x4a9   :  { %v4800_v31 = vpop.f32.mrf.mxu0  ;;  %v4841_v16 = vpop.f32.mrf.mxu1 }
 0x4aa   :  { %v4840_v32 = vadd.f32 %v4839_v29, %v4799_v30  ;;  %v4801_v33 = vadd.f32 %v4800_v31, %v3510_v1 }
 0x4ab   :  { %v4802_v34 = vpop.f32.mrf.mxu0  ;;  %v4843_v36 = vpop.f32.mrf.mxu1 }
 0x4ac   :  { %v4842_v37 = vadd.f32 %v4841_v16, %v4801_v33  ;;  %v5010_v40 = vmax.f32 %v4840_v32, 0.0 }
 0x4ad   :  { %v4803_v38 = vpop.f32.mrf.mxu0  ;;  %v4844_v39 = vpop.f32.mrf.mxu1 }
 0x4ae   :  { %v5011_v41 = vmax.f32 %v4842_v37, 0.0 }
 0x4b0   :  { %v5712_v42 = vpack.c.bf16 %v5011_v41, %v5010_v40 }
 0x4b2   :  { %5045 = vst [vmem:[%s8890_s10 + $0x8] sm:$0xff] %v5712_v42 }
 0x4e7   :  { %v4880_v46 = vpop.f32.mrf.mxu0 }
 0x4e8   :  { %v4881_v48 = vadd.f32 %v4880_v46, %v3514_v43  ;;  %v4921_v26 = vpop.f32.mrf.mxu1 }
 0x4e9   :  { %v4882_v49 = vpop.f32.mrf.mxu0 }
 0x4ea   :  { %v4922_v18 = vadd.f32 %v4921_v26, %v4881_v48  ;;  %v4883_v50 = vadd.f32 %v4882_v49, %v3518_v45  ;;  %v4923_v52 = vpop.f32.mrf.mxu1 }
 0x4eb   :  { %v4884_v53 = vpop.f32.mrf.mxu0 }
 0x4ec   :  { %v4924_v54 = vadd.f32 %v4923_v52, %v4883_v50  ;;  %v4925_v55 = vpop.f32.mrf.mxu1  ;;  %v5012_v47 = vmax.f32 %v4922_v18, 0.0 }
 0x4ed   :  { %v4885_v56 = vpop.f32.mrf.mxu0 }
 0x4ee   :  { %v5013_v44 = vmax.f32 %v4924_v54, 0.0  ;;  %v4926_v15 = vpop.f32.mrf.mxu1 }
 0x4f0   :  { %v5713_v57 = vpack.c.bf16 %v5013_v44, %v5012_v47 }
 0x4f2   :  { %5046 = vst [vmem:[%s8890_s10 + $0x10] sm:$0xff] %v5713_v57 }
 0x507   :  { %v5731_v59 = vpop.f32.mrf.mxu0 }
 0x508   :  { %v5753_v6 = vpop.f32.mrf.mxu1 }
 0x509   :  { %v5732_v2 = vpop.f32.mrf.mxu0 }
 0x50a   :  { %v5733_v3 = vadd.f32 %v5732_v2, %v5731_v59  ;;  %v5754_v4 = vpop.f32.mrf.mxu1 }
 0x50b   :  { %v5734_v5 = vpop.f32.mrf.mxu0  ;;  %v5755_v10 = vadd.f32 %v5754_v4, %v5753_v6 }
 0x50c   :  { %v4963_v8 = vadd.f32 %v5733_v3, %v3522_v35  ;;  %v5756_v11 = vpop.f32.mrf.mxu1 }
 0x50d   :  { %v5735_v12 = vpop.f32.mrf.mxu0 }
 0x50e   :  { %v5003_v13 = vadd.f32 %v5755_v10, %v4963_v8  ;;  %v5757_v14 = vpop.f32.mrf.mxu1 }
 0x510   :  { %v5014_v17 = vmax.f32 %v5003_v13, 0.0 }
 0x512   :  { %v5714_v20 = vpack.c.bf16 %v5014_v17, %v5014_v17 }
 0x514   :  { %5047 = vst [vmem:[%s8890_s10 + $0x18] sm:$0xf] %v5714_v20 }

// kernel: vae_forward.1
= control target key start
LH: loop header
LB: loop body
LE: loop exit
PB: predicated region body
PF: predicated region fallthrough
CT: control target
= control target key end

     0   :  { %s8879_s2 = inlined_call_operand.vmem [shape: bf16[896,512], index: 2, kind: input, shape index: {}]   ;;  %s8880_s0 = inlined_call_operand.vmem [shape: bf16[8,896], index: 0, kind: input, shape index: {}]   ;;  %s8881_s4 = inlined_call_operand.vmem [shape: bf16[512,512], index: 4, kind: input, shape index: {}]   ;;  %s8882_s3 = inlined_call_operand.vmem [shape: f32[1,512], index: 3, kind: input, shape index: {}]   ;;  %s8883_s6 = inlined_call_operand.vmem [shape: bf16[256,512], index: 6, kind: input, shape index: {}]   ;;  %s8884_s8 = inlined_call_operand.vmem [shape: bf16[512,896], index: 8, kind: input, shape index: {}]   ;;  %s8885_s5 = inlined_call_operand.vmem [shape: f32[1,512], index: 5, kind: input, shape index: {}]   ;;  %s8886_s11 = inlined_call_operand.vmem [shape: f32[8,512], index: 11, kind: output, shape index: {1}]   ;;  %s8887_s1 = inlined_call_operand.vmem [shape: f32[8,256], index: 1, kind: input, shape index: {}]   ;;  %s8888_s7 = inlined_call_operand.vmem [shape: f32[1,512], index: 7, kind: input, shape index: {}]   ;;  %s8889_s9 = inlined_call_operand.vmem [shape: f32[1,896], index: 9, kind: input, shape index: {}]   ;;  %s8890_s10 = inlined_call_operand.vmem [shape: bf16[8,896], index: 10, kind: output, shape index: {0}]  }
   0x1   :  { %v5760_v0 = vld [vmem:[%s8879_s2 + $0xe4] ss:$16 sps:$4 sm:$0xff]   ;;  %v5764_v2 = vld [vmem:[%s8879_s2 + $0xe0] ss:$16 sps:$4 sm:$0xff]   ;;  %v39_v48 = vld [vmem:[%s8880_s0 + $0x8] sm:$0xff] }
   0x2   :  { %v5762_v1 = vld [vmem:[%s8879_s2 + $0x2e4] ss:$16 sps:$4 sm:$0xff]   ;;  %1433 = vmatprep.subr.bf16.mxu0 %v5760_v0  ;;  %v5765_v3 = vld [vmem:[%s8879_s2 + $0x2e0] ss:$16 sps:$4 sm:$0xff]   ;;  %v6932_v51 = vcombine.high %v39_v48, %v39_v48 }
   0x3   :  { %1474 = vmatprep.subr.bf16.mxu1 %v5762_v1  ;;  %v5766_v4 = vld [vmem:[%s8879_s2 + $0xc4] ss:$16 sps:$4 sm:$0xff]   ;;  %1434 = vmatpush1.bf16.msra.mxu0 %v5764_v2  ;;  %v5770_v6 = vld [vmem:[%s8879_s2 + $0xc0] ss:$16 sps:$4 sm:$0xff]  }
   0x4   :  { %1475 = vmatpush1.bf16.msra.mxu1 %v5765_v3  ;;  %v5768_v5 = vld [vmem:[%s8879_s2 + $0x2c4] ss:$16 sps:$4 sm:$0xff]   ;;  %1435 = vmatprep.subr.bf16.mxu0 %v5766_v4  ;;  %v5771_v7 = vld [vmem:[%s8879_s2 + $0x2c0] ss:$16 sps:$4 sm:$0xff]  }
   0x5   :  { %1476 = vmatprep.subr.bf16.mxu1 %v5768_v5  ;;  %v5772_v8 = vld [vmem:[%s8879_s2 + $0xa4] ss:$16 sps:$4 sm:$0xff]   ;;  %v5776_v10 = vld [vmem:[%s8879_s2 + $0xa0] ss:$16 sps:$4 sm:$0xff]   ;;  %1506 = vmatprep.mubr.bf16.mxu1 %v6932_v51 }
   0x6   :  { %v5774_v9 = vld [vmem:[%s8879_s2 + $0x2a4] ss:$16 sps:$4 sm:$0xff]   ;;  %v5777_v11 = vld [vmem:[%s8879_s2 + $0x2a0] ss:$16 sps:$4 sm:$0xff]  }
   0x7   :  { %1436 = vmatpush1.bf16.msra.mxu0 %v5770_v6  ;;  %v5778_v12 = vld [vmem:[%s8879_s2 + $0x84] ss:$16 sps:$4 sm:$0xff]   ;;  %v5782_v14 = vld [vmem:[%s8879_s2 + $0x80] ss:$16 sps:$4 sm:$0xff]  }
   0x8   :  { %1477 = vmatpush1.bf16.msra.mxu1 %v5771_v7  ;;  %1437 = vmatprep.subr.bf16.mxu0 %v5772_v8  ;;  %v5780_v13 = vld [vmem:[%s8879_s2 + $0x284] ss:$16 sps:$4 sm:$0xff]   ;;  %v5783_v15 = vld [vmem:[%s8879_s2 + $0x280] ss:$16 sps:$4 sm:$0xff]   ;;  %v6992_v7 = vcombine.low %v39_v48, %v39_v48  ;;  %v5920_v48 = vld [vmem:[%s8879_s2 + $0xcc] ss:$16 sps:$4 sm:$0xff]  }
   0x9   :  { %1478 = vmatprep.subr.bf16.mxu1 %v5774_v9  ;;  %v5784_v16 = vld [vmem:[%s8879_s2 + $0x64] ss:$16 sps:$4 sm:$0xff]   ;;  %v5788_v18 = vld [vmem:[%s8879_s2 + $0x60] ss:$16 sps:$4 sm:$0xff]  }
   0xa   :  { %v5786_v17 = vld [vmem:[%s8879_s2 + $0x264] ss:$16 sps:$4 sm:$0xff]   ;;  %v5789_v19 = vld [vmem:[%s8879_s2 + $0x260] ss:$16 sps:$4 sm:$0xff]  }
   0xb   :  { %1438 = vmatpush1.bf16.msra.mxu0 %v5776_v10  ;;  %v5790_v20 = vld [vmem:[%s8879_s2 + $0x44] ss:$16 sps:$4 sm:$0xff]   ;;  %v5794_v22 = vld [vmem:[%s8879_s2 + $0x40] ss:$16 sps:$4 sm:$0xff]  }
   0xc   :  { %1479 = vmatpush1.bf16.msra.mxu1 %v5777_v11  ;;  %1439 = vmatprep.subr.bf16.mxu0 %v5778_v12  ;;  %v5792_v21 = vld [vmem:[%s8879_s2 + $0x244] ss:$16 sps:$4 sm:$0xff]   ;;  %v5795_v23 = vld [vmem:[%s8879_s2 + $0x240] ss:$16 sps:$4 sm:$0xff]  }
   0xd   :  { %1480 = vmatprep.subr.bf16.mxu1 %v5780_v13  ;;  %v5796_v24 = vld [vmem:[%s8879_s2 + $0x24] ss:$16 sps:$4 sm:$0xff]   ;;  %v5800_v26 = vld [vmem:[%s8879_s2 + $0x20] ss:$16 sps:$4 sm:$0xff]  }
   0xe   :  { %v5798_v25 = vld [vmem:[%s8879_s2 + $0x224] ss:$16 sps:$4 sm:$0xff]   ;;  %v5801_v27 = vld [vmem:[%s8879_s2 + $0x220] ss:$16 sps:$4 sm:$0xff]  }
   0xf   :  { %1440 = vmatpush1.bf16.msra.mxu0 %v5782_v14  ;;  %v5802_v28 = vld [vmem:[%s8879_s2 + $0x4] ss:$16 sps:$4 sm:$0xff]   ;;  %v5806_v30 = vld [vmem:[%s8879_s2] ss:$16 sps:$4 sm:$0xff]  }
  0x10   :  { %1481 = vmatpush1.bf16.msra.mxu1 %v5783_v15  ;;  %1441 = vmatprep.subr.bf16.mxu0 %v5784_v16  ;;  %v5804_v29 = vld [vmem:[%s8879_s2 + $0x204] ss:$16 sps:$4 sm:$0xff]   ;;  %v5807_v31 = vld [vmem:[%s8879_s2 + $0x200] ss:$16 sps:$4 sm:$0xff]   ;;  %v6719_v16 = vmov 0  }
  0x11   :  { %1482 = vmatprep.subr.bf16.mxu1 %v5786_v17  ;;  %v5808_v32 = vld [vmem:[%s8879_s2 + $0x1e4] ss:$16 sps:$4 sm:$0xff]   ;;  %v5812_v34 = vld [vmem:[%s8879_s2 + $0x1e0] ss:$16 sps:$4 sm:$0xff]  }
  0x12   :  { %v5810_v33 = vld [vmem:[%s8879_s2 + $0x3e4] ss:$16 sps:$4 sm:$0xff]   ;;  %v5813_v35 = vld [vmem:[%s8879_s2 + $0x3e0] ss:$16 sps:$4 sm:$0xff]  }
  0x13   :  { %1442 = vmatpush1.bf16.msra.mxu0 %v5788_v18  ;;  %v5814_v36 = vld [vmem:[%s8879_s2 + $0x1c4] ss:$16 sps:$4 sm:$0xff]   ;;  %v5818_v38 = vld [vmem:[%s8879_s2 + $0x1c0] ss:$16 sps:$4 sm:$0xff]  }
  0x14   :  { %1483 = vmatpush1.bf16.msra.mxu1 %v5789_v19  ;;  %1443 = vmatprep.subr.bf16.mxu0 %v5790_v20  ;;  %v5816_v37 = vld [vmem:[%s8879_s2 + $0x3c4] ss:$16 sps:$4 sm:$0xff]   ;;  %v5819_v39 = vld [vmem:[%s8879_s2 + $0x3c0] ss:$16 sps:$4 sm:$0xff]  }
  0x15   :  { %1484 = vmatprep.subr.bf16.mxu1 %v5792_v21  ;;  %v5820_v40 = vld [vmem:[%s8879_s2 + $0x1a4] ss:$16 sps:$4 sm:$0xff]   ;;  %v5824_v42 = vld [vmem:[%s8879_s2 + $0x1a0] ss:$16 sps:$4 sm:$0xff]  }
  0x16   :  { %v5822_v41 = vld [vmem:[%s8879_s2 + $0x3a4] ss:$16 sps:$4 sm:$0xff]   ;;  %v5825_v43 = vld [vmem:[%s8879_s2 + $0x3a0] ss:$16 sps:$4 sm:$0xff]  }
  0x17   :  { %1444 = vmatpush1.bf16.msra.mxu0 %v5794_v22  ;;  %v5826_v44 = vld [vmem:[%s8879_s2 + $0x184] ss:$16 sps:$4 sm:$0xff]   ;;  %v5830_v49 = vld [vmem:[%s8879_s2 + $0x180] ss:$16 sps:$4 sm:$0xff]  }
  0x18   :  { %1485 = vmatpush1.bf16.msra.mxu1 %v5795_v23  ;;  %1445 = vmatprep.subr.bf16.mxu0 %v5796_v24  ;;  %v5828_v45 = vld [vmem:[%s8879_s2 + $0x384] ss:$16 sps:$4 sm:$0xff]   ;;  %v5831_v50 = vld [vmem:[%s8879_s2 + $0x380] ss:$16 sps:$4 sm:$0xff]  }
  0x19   :  { %1486 = vmatprep.subr.bf16.mxu1 %v5798_v25  ;;  %v38_v46 = vld [vmem:[%s8880_s0] sm:$0xff] }
  0x1a   :  { %v6921_v47 = vcombine.high %v38_v46, %v38_v46  ;;  %v5832_v52 = vld [vmem:[%s8879_s2 + $0x164] ss:$16 sps:$4 sm:$0xff]   ;;  %v5836_v54 = vld [vmem:[%s8879_s2 + $0x160] ss:$16 sps:$4 sm:$0xff]   ;;  %v6990_v6 = vcombine.low %v38_v46, %v38_v46 }
  0x1b   :  { %1446 = vmatpush1.bf16.msra.mxu0 %v5800_v26  ;;  %v5834_v53 = vld [vmem:[%s8879_s2 + $0x364] ss:$16 sps:$4 sm:$0xff]   ;;  %v5837_v55 = vld [vmem:[%s8879_s2 + $0x360] ss:$16 sps:$4 sm:$0xff]  }
  0x1c   :  { %1487 = vmatpush1.bf16.msra.mxu1 %v5801_v27  ;;  %1447 = vmatprep.subr.bf16.mxu0 %v5802_v28  ;;  %v5838_v56 = vld [vmem:[%s8879_s2 + $0x144] ss:$16 sps:$4 sm:$0xff]   ;;  %v5842_v58 = vld [vmem:[%s8879_s2 + $0x140] ss:$16 sps:$4 sm:$0xff]  }
  0x1d   :  { %1488 = vmatprep.subr.bf16.mxu1 %v5804_v29  ;;  %1465 = vmatprep.mubr.bf16.mxu0 %v6921_v47  ;;  %v5840_v57 = vld [vmem:[%s8879_s2 + $0x344] ss:$16 sps:$4 sm:$0xff]   ;;  %v5843_v59 = vld [vmem:[%s8879_s2 + $0x340] ss:$16 sps:$4 sm:$0xff]  }
  0x1e   :  { %v5844_v60 = vld [vmem:[%s8879_s2 + $0x124] ss:$16 sps:$4 sm:$0xff]   ;;  %v5848_v62 = vld [vmem:[%s8879_s2 + $0x120] ss:$16 sps:$4 sm:$0xff]  }
  0x1f   :  { %1448 = vmatpush1.bf16.msra.mxu0 %v5806_v30  ;;  %v5846_v61 = vld [vmem:[%s8879_s2 + $0x324] ss:$16 sps:$4 sm:$0xff]   ;;  %v5849_v63 = vld [vmem:[%s8879_s2 + $0x320] ss:$16 sps:$4 sm:$0xff]  }
  0x20   :  { %1489 = vmatpush1.bf16.msra.mxu1 %v5807_v31  ;;  %1449 = vmatprep.subr.bf16.mxu0 %v5808_v32  ;;  %v5850_v0 = vld [vmem:[%s8879_s2 + $0x104] ss:$16 sps:$4 sm:$0xff]   ;;  %v5854_v2 = vld [vmem:[%s8879_s2 + $0x100] ss:$16 sps:$4 sm:$0xff]  }
  0x21   :  { %1490 = vmatprep.subr.bf16.mxu1 %v5810_v33  ;;  %v5852_v1 = vld [vmem:[%s8879_s2 + $0x304] ss:$16 sps:$4 sm:$0xff]   ;;  %v5855_v3 = vld [vmem:[%s8879_s2 + $0x300] ss:$16 sps:$4 sm:$0xff]  }
  0x22   :  { %v5862_v4 = vld [vmem:[%s8879_s2 + $0x4e4] ss:$16 sps:$4 sm:$0xff]   ;;  %v5860_v8 = vld [vmem:[%s8879_s2 + $0x4e0] ss:$16 sps:$4 sm:$0xff]  }
  0x23   :  { %1450 = vmatpush2.bf16.msra.mxu0 %v5812_v34  ;;  %v5865_v5 = vld [vmem:[%s8879_s2 + $0x6e4] ss:$16 sps:$4 sm:$0xff]   ;;  %v5863_v9 = vld [vmem:[%s8879_s2 + $0x6e0] ss:$16 sps:$4 sm:$0xff]  }
  0x24   :  { %1491 = vmatpush2.bf16.msra.mxu1 %v5813_v35  ;;  %1451 = vmatprep.subr.bf16.mxu0 %v5814_v36  ;;  %v5868_v10 = vld [vmem:[%s8879_s2 + $0x4c4] ss:$16 sps:$4 sm:$0xff]   ;;  %v5866_v12 = vld [vmem:[%s8879_s2 + $0x4c0] ss:$16 sps:$4 sm:$0xff]  }
  0x25   :  { %1492 = vmatprep.subr.bf16.mxu1 %v5816_v37  ;;  %v5871_v11 = vld [vmem:[%s8879_s2 + $0x6c4] ss:$16 sps:$4 sm:$0xff]   ;;  %v5869_v13 = vld [vmem:[%s8879_s2 + $0x6c0] ss:$16 sps:$4 sm:$0xff]  }
  0x26   :  { %v5874_v14 = vld [vmem:[%s8879_s2 + $0x4a4] ss:$16 sps:$4 sm:$0xff]   ;;  %v5872_v17 = vld [vmem:[%s8879_s2 + $0x4a0] ss:$16 sps:$4 sm:$0xff]  }
  0x27   :  { %1452 = vmatpush2.bf16.msra.mxu0 %v5818_v38  ;;  %v5877_v15 = vld [vmem:[%s8879_s2 + $0x6a4] ss:$16 sps:$4 sm:$0xff]   ;;  %v5875_v18 = vld [vmem:[%s8879_s2 + $0x6a0] ss:$16 sps:$4 sm:$0xff]  }
  0x28   :  { %1493 = vmatpush2.bf16.msra.mxu1 %v5819_v39  ;;  %1453 = vmatprep.subr.bf16.mxu0 %v5820_v40  ;;  %v5880_v19 = vld [vmem:[%s8879_s2 + $0x484] ss:$16 sps:$4 sm:$0xff]   ;;  %v5878_v21 = vld [vmem:[%s8879_s2 + $0x480] ss:$16 sps:$4 sm:$0xff]  }
  0x29   :  { %1494 = vmatprep.subr.bf16.mxu1 %v5822_v41  ;;  %v5883_v20 = vld [vmem:[%s8879_s2 + $0x684] ss:$16 sps:$4 sm:$0xff]   ;;  %v5881_v22 = vld [vmem:[%s8879_s2 + $0x680] ss:$16 sps:$4 sm:$0xff]  }
  0x2a   :  { %v5886_v23 = vld [vmem:[%s8879_s2 + $0x464] ss:$16 sps:$4 sm:$0xff]   ;;  %v5884_v25 = vld [vmem:[%s8879_s2 + $0x460] ss:$16 sps:$4 sm:$0xff]  }
  0x2b   :  { %1454 = vmatpush2.bf16.msra.mxu0 %v5824_v42  ;;  %v5889_v24 = vld [vmem:[%s8879_s2 + $0x664] ss:$16 sps:$4 sm:$0xff]   ;;  %v5887_v26 = vld [vmem:[%s8879_s2 + $0x660] ss:$16 sps:$4 sm:$0xff]   ;;  %v5914_v42 = vld [vmem:[%s8879_s2 + $0xec] ss:$16 sps:$4 sm:$0xff]  }
  0x2c   :  { %1495 = vmatpush2.bf16.msra.mxu1 %v5825_v43  ;;  %1455 = vmatprep.subr.bf16.mxu0 %v5826_v44  ;;  %v5892_v27 = vld [vmem:[%s8879_s2 + $0x444] ss:$16 sps:$4 sm:$0xff]   ;;  %v5890_v29 = vld [vmem:[%s8879_s2 + $0x440] ss:$16 sps:$4 sm:$0xff]   ;;  %v7109_v44 = vld [vmem:[%s8880_s0 + $0x18] ss:$0 sps:$4 sm:$0xff]  }
  0x2d   :  { %1496 = vmatprep.subr.bf16.mxu1 %v5828_v45  ;;  %v5895_v28 = vld [vmem:[%s8879_s2 + $0x644] ss:$16 sps:$4 sm:$0xff]   ;;  %v5893_v30 = vld [vmem:[%s8879_s2 + $0x640] ss:$16 sps:$4 sm:$0xff]   ;;  %v5912_v45 = vld [vmem:[%s8879_s2 + $0xe8] ss:$16 sps:$4 sm:$0xff]  }
  0x2e   :  { %v5898_v31 = vld [vmem:[%s8879_s2 + $0x424] ss:$16 sps:$4 sm:$0xff]   ;;  %v5896_v34 = vld [vmem:[%s8879_s2 + $0x420] ss:$16 sps:$4 sm:$0xff]  }
  0x2f   :  { %1456 = vmatpush2.bf16.msra.mxu0 %v5830_v49  ;;  %v5901_v32 = vld [vmem:[%s8879_s2 + $0x624] ss:$16 sps:$4 sm:$0xff]   ;;  %v5899_v36 = vld [vmem:[%s8879_s2 + $0x620] ss:$16 sps:$4 sm:$0xff]  }
  0x30   :  { %1497 = vmatpush2.bf16.msra.mxu1 %v5831_v50  ;;  %1457 = vmatprep.subr.bf16.mxu0 %v5832_v52  ;;  %v7072_v33 = vld [vmem:[%s8880_s0 + $0x10] sm:$0xff]  ;;  %v5918_v50 = vld [vmem:[%s8879_s2 + $0xc8] ss:$16 sps:$4 sm:$0xff]  }
  0x31   :  { %1498 = vmatprep.subr.bf16.mxu1 %v5834_v53  ;;  %v7079_v35 = vcombine.high %v7072_v33, %v7072_v33  ;;  %v5904_v37 = vld [vmem:[%s8879_s2 + $0x404] ss:$16 sps:$4 sm:$0xff]   ;;  %v5902_v39 = vld [vmem:[%s8879_s2 + $0x400] ss:$16 sps:$4 sm:$0xff]   ;;  %v5926_v53 = vld [vmem:[%s8879_s2 + $0xac] ss:$16 sps:$4 sm:$0xff]  }
  0x32   :  { %v5907_v38 = vld [vmem:[%s8879_s2 + $0x604] ss:$16 sps:$4 sm:$0xff]   ;;  %v5905_v40 = vld [vmem:[%s8879_s2 + $0x600] ss:$16 sps:$4 sm:$0xff]  }
  0x33   :  { %1458 = vmatpush2.bf16.msra.mxu0 %v5836_v54  ;;  %v5910_v41 = vld [vmem:[%s8879_s2 + $0x5e4] ss:$16 sps:$4 sm:$0xff]   ;;  %v5908_v43 = vld [vmem:[%s8879_s2 + $0x5e0] ss:$16 sps:$4 sm:$0xff]  }
  0x34   :  { %1499 = vmatpush2.bf16.msra.mxu1 %v5837_v55  ;;  %1459 = vmatprep.subr.bf16.mxu0 %v5838_v56  ;;  %v5917_v46 = vld [vmem:[%s8879_s2 + $0x5c4] ss:$16 sps:$4 sm:$0xff]   ;;  %v5915_v49 = vld [vmem:[%s8879_s2 + $0x5c0] ss:$16 sps:$4 sm:$0xff]   ;;  %v5924_v55 = vld [vmem:[%s8879_s2 + $0xa8] ss:$16 sps:$4 sm:$0xff]  }
  0x35   :  { %1500 = vmatprep.subr.bf16.mxu1 %v5840_v57  ;;  %v5923_v52 = vld [vmem:[%s8879_s2 + $0x5a4] ss:$16 sps:$4 sm:$0xff]   ;;  %v5921_v54 = vld [vmem:[%s8879_s2 + $0x5a0] ss:$16 sps:$4 sm:$0xff]  }
  0x36   :  { %v5929_v56 = vld [vmem:[%s8879_s2 + $0x584] ss:$16 sps:$4 sm:$0xff]   ;;  %v5927_v57 = vld [vmem:[%s8879_s2 + $0x580] ss:$16 sps:$4 sm:$0xff]  }
  0x37   :  { %1460 = vmatpush2.bf16.msra.mxu0 %v5842_v58  ;;  %v5930_v58 = vld [vmem:[%s8879_s2 + $0x88] ss:$16 sps:$4 sm:$0xff]  }
  0x38   :  { %1501 = vmatpush2.bf16.msra.mxu1 %v5843_v59  ;;  %1461 = vmatprep.subr.bf16.mxu0 %v5844_v60  ;;  %v5935_v59 = vld [vmem:[%s8879_s2 + $0x564] ss:$16 sps:$4 sm:$0xff]   ;;  %v5938_v60 = vld [vmem:[%s8879_s2 + $0x6c] ss:$16 sps:$4 sm:$0xff]  }
  0x39   :  { %1502 = vmatprep.subr.bf16.mxu1 %v5846_v61  ;;  %v5933_v61 = vld [vmem:[%s8879_s2 + $0x560] ss:$16 sps:$4 sm:$0xff]  }
  0x3b   :  { %1462 = vmatpush2.bf16.msra.mxu0 %v5848_v62  ;;  %v5936_v62 = vld [vmem:[%s8879_s2 + $0x68] ss:$16 sps:$4 sm:$0xff]  }
  0x3c   :  { %1503 = vmatpush2.bf16.msra.mxu1 %v5849_v63  ;;  %1463 = vmatprep.subr.bf16.mxu0 %v5850_v0  ;;  %v5941_v63 = vld [vmem:[%s8879_s2 + $0x544] ss:$16 sps:$4 sm:$0xff]   ;;  %v5944_v0 = vld [vmem:[%s8879_s2 + $0x4c] ss:$16 sps:$4 sm:$0xff]  }
  0x3d   :  { %1504 = vmatprep.subr.bf16.mxu1 %v5852_v1  ;;  %v5939_v1 = vld [vmem:[%s8879_s2 + $0x540] ss:$16 sps:$4 sm:$0xff]  }
  0x3f   :  { %1464 = vmatpush2.bf16.msra.mxu0 %v5854_v2  ;;  %v5942_v2 = vld [vmem:[%s8879_s2 + $0x48] ss:$16 sps:$4 sm:$0xff]  }
  0x40   :  { %1505 = vmatpush2.bf16.msra.mxu1 %v5855_v3  ;;  %1515 = vmatprep.subr.bf16.mxu0 %v5862_v4  ;;  %v5947_v3 = vld [vmem:[%s8879_s2 + $0x524] ss:$16 sps:$4 sm:$0xff]   ;;  %v5950_v4 = vld [vmem:[%s8879_s2 + $0x2c] ss:$16 sps:$4 sm:$0xff]  }
  0x41   :  { %1556 = vmatprep.subr.bf16.mxu1 %v5865_v5  ;;  %v5945_v5 = vld [vmem:[%s8879_s2 + $0x520] ss:$16 sps:$4 sm:$0xff]  }
  0x42   :  { %1466 = vmatmul.mubr.bf16.vlgmr.msra.gmra.mxu0 %v6990_v6 }
  0x43   :  { %1507 = vmatmul.mubr.bf16.vlgmr.msra.gmra.mxu1 %v6992_v7  ;;  %1516 = vmatpush1.bf16.msra.mxu0 %v5860_v8  ;;  %v5948_v8 = vld [vmem:[%s8879_s2 + $0x28] ss:$16 sps:$4 sm:$0xff]  }
  0x44   :  { %1557 = vmatpush1.bf16.msra.mxu1 %v5863_v9  ;;  %1517 = vmatprep.subr.bf16.mxu0 %v5868_v10  ;;  %v5953_v9 = vld [vmem:[%s8879_s2 + $0x504] ss:$16 sps:$4 sm:$0xff]   ;;  %v5956_v10 = vld [vmem:[%s8879_s2 + $0xc] ss:$16 sps:$4 sm:$0xff]  }
  0x45   :  { %1558 = vmatprep.subr.bf16.mxu1 %v5871_v11  ;;  %1588 = vmatprep.mubr.bf16.mxu1 %v6719_v16  ;;  %v5951_v11 = vld [vmem:[%s8879_s2 + $0x500] ss:$16 sps:$4 sm:$0xff]  }
  0x46   :  { %1547 = vmatprep.mubr.bf16.mxu0 %v7079_v35 }
  0x47   :  { %1518 = vmatpush1.bf16.msra.mxu0 %v5866_v12  ;;  %v5954_v12 = vld [vmem:[%s8879_s2 + $0x8] ss:$16 sps:$4 sm:$0xff]  }
  0x48   :  { %1559 = vmatpush1.bf16.msra.mxu1 %v5869_v13  ;;  %1519 = vmatprep.subr.bf16.mxu0 %v5874_v14  ;;  %v5961_v13 = vld [vmem:[%s8879_s2 + $0x1ec] ss:$16 sps:$4 sm:$0xff]  }
  0x49   :  { %1560 = vmatprep.subr.bf16.mxu1 %v5877_v15  ;;  %v5964_v14 = vld [vmem:[%s8879_s2 + $0x2ec] ss:$16 sps:$4 sm:$0xff]   ;;  %v7208_v15 = vcombine.low %v7072_v33, %v7072_v33  ;;  %v5986_v33 = vld [vmem:[%s8879_s2 + $0x268] ss:$16 sps:$4 sm:$0xff]  }
  0x4b   :  { %1520 = vmatpush1.bf16.msra.mxu0 %v5872_v17  ;;  %v5959_v17 = vld [vmem:[%s8879_s2 + $0x1e8] ss:$16 sps:$4 sm:$0xff]  }
  0x4c   :  { %1561 = vmatpush1.bf16.msra.mxu1 %v5875_v18  ;;  %1521 = vmatprep.subr.bf16.mxu0 %v5880_v19  ;;  %v5962_v18 = vld [vmem:[%s8879_s2 + $0x2e8] ss:$16 sps:$4 sm:$0xff]   ;;  %v5967_v19 = vld [vmem:[%s8879_s2 + $0x1cc] ss:$16 sps:$4 sm:$0xff]  }
  0x4d   :  { %1562 = vmatprep.subr.bf16.mxu1 %v5883_v20  ;;  %v5970_v20 = vld [vmem:[%s8879_s2 + $0x2cc] ss:$16 sps:$4 sm:$0xff]  }
  0x4f   :  { %1522 = vmatpush1.bf16.msra.mxu0 %v5878_v21  ;;  %v5965_v21 = vld [vmem:[%s8879_s2 + $0x1c8] ss:$16 sps:$4 sm:$0xff]  }
  0x50   :  { %1563 = vmatpush1.bf16.msra.mxu1 %v5881_v22  ;;  %1523 = vmatprep.subr.bf16.mxu0 %v5886_v23  ;;  %v5968_v22 = vld [vmem:[%s8879_s2 + $0x2c8] ss:$16 sps:$4 sm:$0xff]   ;;  %v5973_v23 = vld [vmem:[%s8879_s2 + $0x1ac] ss:$16 sps:$4 sm:$0xff]  }
  0x51   :  { %1564 = vmatprep.subr.bf16.mxu1 %v5889_v24  ;;  %v5976_v24 = vld [vmem:[%s8879_s2 + $0x2ac] ss:$16 sps:$4 sm:$0xff]  }
  0x53   :  { %1524 = vmatpush1.bf16.msra.mxu0 %v5884_v25  ;;  %v5971_v25 = vld [vmem:[%s8879_s2 + $0x1a8] ss:$16 sps:$4 sm:$0xff]  }
  0x54   :  { %1565 = vmatpush1.bf16.msra.mxu1 %v5887_v26  ;;  %1525 = vmatprep.subr.bf16.mxu0 %v5892_v27  ;;  %v5974_v26 = vld [vmem:[%s8879_s2 + $0x2a8] ss:$16 sps:$4 sm:$0xff]   ;;  %v5979_v27 = vld [vmem:[%s8879_s2 + $0x18c] ss:$16 sps:$4 sm:$0xff]  }
  0x55   :  { %1566 = vmatprep.subr.bf16.mxu1 %v5895_v28  ;;  %v5977_v28 = vld [vmem:[%s8879_s2 + $0x188] ss:$16 sps:$4 sm:$0xff]  }
  0x57   :  { %1526 = vmatpush1.bf16.msra.mxu0 %v5890_v29  ;;  %v5980_v29 = vld [vmem:[%s8879_s2 + $0x288] ss:$16 sps:$4 sm:$0xff]  }
  0x58   :  { %1567 = vmatpush1.bf16.msra.mxu1 %v5893_v30  ;;  %1527 = vmatprep.subr.bf16.mxu0 %v5898_v31  ;;  %v5985_v30 = vld [vmem:[%s8879_s2 + $0x16c] ss:$16 sps:$4 sm:$0xff]  }
  0x59   :  { %1568 = vmatprep.subr.bf16.mxu1 %v5901_v32  ;;  %v5988_v31 = vld [vmem:[%s8879_s2 + $0x26c] ss:$16 sps:$4 sm:$0xff]   ;;  %v5983_v32 = vld [vmem:[%s8879_s2 + $0x168] ss:$16 sps:$4 sm:$0xff]  }
  0x5b   :  { %1528 = vmatpush1.bf16.msra.mxu0 %v5896_v34  ;;  %v5991_v34 = vld [vmem:[%s8879_s2 + $0x14c] ss:$16 sps:$4 sm:$0xff]  }
  0x5c   :  { %1569 = vmatpush1.bf16.msra.mxu1 %v5899_v36  ;;  %1529 = vmatprep.subr.bf16.mxu0 %v5904_v37  ;;  %v5994_v36 = vld [vmem:[%s8879_s2 + $0x24c] ss:$16 sps:$4 sm:$0xff]   ;;  %v5989_v37 = vld [vmem:[%s8879_s2 + $0x148] ss:$16 sps:$4 sm:$0xff]  }
  0x5d   :  { %1570 = vmatprep.subr.bf16.mxu1 %v5907_v38  ;;  %v5992_v38 = vld [vmem:[%s8879_s2 + $0x248] ss:$16 sps:$4 sm:$0xff]  }
  0x5f   :  { %1530 = vmatpush1.bf16.msra.mxu0 %v5902_v39  ;;  %v5997_v39 = vld [vmem:[%s8879_s2 + $0x12c] ss:$16 sps:$4 sm:$0xff]  }
  0x60   :  { %1571 = vmatpush1.bf16.msra.mxu1 %v5905_v40  ;;  %1531 = vmatprep.subr.bf16.mxu0 %v5910_v41  ;;  %v6000_v40 = vld [vmem:[%s8879_s2 + $0x22c] ss:$16 sps:$4 sm:$0xff]   ;;  %v5995_v41 = vld [vmem:[%s8879_s2 + $0x128] ss:$16 sps:$4 sm:$0xff]  }
  0x61   :  { %1597 = vmatprep.subr.bf16.mxu1 %v5914_v42  ;;  %v5998_v42 = vld [vmem:[%s8879_s2 + $0x228] ss:$16 sps:$4 sm:$0xff]  }
  0x63   :  { %1589 = vmatmul.mubr.bf16.vlgmr.msra.gmra.mxu1 %v7109_v44  ;;  %1532 = vmatpush2.bf16.msra.mxu0 %v5908_v43  ;;  %v6003_v43 = vld [vmem:[%s8879_s2 + $0x10c] ss:$16 sps:$4 sm:$0xff]  }
  0x64   :  { %1598 = vmatpush1.bf16.msra.mxu1 %v5912_v45  ;;  %1533 = vmatprep.subr.bf16.mxu0 %v5917_v46  ;;  %v6006_v45 = vld [vmem:[%s8879_s2 + $0x20c] ss:$16 sps:$4 sm:$0xff]   ;;  %v6001_v46 = vld [vmem:[%s8879_s2 + $0x108] ss:$16 sps:$4 sm:$0xff]  }
  0x65   :  { %1599 = vmatprep.subr.bf16.mxu1 %v5920_v48  ;;  %1629 = vmatprep.mubr.bf16.mxu1 %v6921_v47  ;;  %v5932_v47 = vld [vmem:[%s8879_s2 + $0x8c] ss:$16 sps:$4 sm:$0xff]   ;;  %v6004_v48 = vld [vmem:[%s8879_s2 + $0x208] ss:$16 sps:$4 sm:$0xff]  }
  0x67   :  { %1534 = vmatpush2.bf16.msra.mxu0 %v5915_v49  ;;  %v6009_v49 = vld [vmem:[%s8879_s2 + $0x3ec] ss:$16 sps:$4 sm:$0xff]  }
  0x68   :  { %1600 = vmatpush1.bf16.msra.mxu1 %v5918_v50  ;;  %1535 = vmatprep.subr.bf16.mxu0 %v5923_v52  ;;  %v6012_v50 = vld [vmem:[%s8879_s2 + $0x4ec] ss:$16 sps:$4 sm:$0xff]   ;;  %v6007_v52 = vld [vmem:[%s8879_s2 + $0x3e8] ss:$16 sps:$4 sm:$0xff]  }
  0x69   :  { %1601 = vmatprep.subr.bf16.mxu1 %v5926_v53  ;;  %v6010_v53 = vld [vmem:[%s8879_s2 + $0x4e8] ss:$16 sps:$4 sm:$0xff]  }
  0x6b   :  { %1536 = vmatpush2.bf16.msra.mxu0 %v5921_v54  ;;  %v6015_v54 = vld [vmem:[%s8879_s2 + $0x3cc] ss:$16 sps:$4 sm:$0xff]  }
  0x6c   :  { %1602 = vmatpush1.bf16.msra.mxu1 %v5924_v55  ;;  %1537 = vmatprep.subr.bf16.mxu0 %v5929_v56  ;;  %v6018_v55 = vld [vmem:[%s8879_s2 + $0x4cc] ss:$16 sps:$4 sm:$0xff]   ;;  %v6013_v56 = vld [vmem:[%s8879_s2 + $0x3c8] ss:$16 sps:$4 sm:$0xff]  }
  0x6d   :  { %1603 = vmatprep.subr.bf16.mxu1 %v5932_v47  ;;  %v6016_v47 = vld [vmem:[%s8879_s2 + $0x4c8] ss:$16 sps:$4 sm:$0xff]  }
  0x6f   :  { %1538 = vmatpush2.bf16.msra.mxu0 %v5927_v57  ;;  %v6021_v57 = vld [vmem:[%s8879_s2 + $0x3ac] ss:$16 sps:$4 sm:$0xff]  }
  0x70   :  { %1604 = vmatpush1.bf16.msra.mxu1 %v5930_v58  ;;  %1539 = vmatprep.subr.bf16.mxu0 %v5935_v59  ;;  %v6024_v58 = vld [vmem:[%s8879_s2 + $0x4ac] ss:$16 sps:$4 sm:$0xff]   ;;  %v6019_v59 = vld [vmem:[%s8879_s2 + $0x3a8] ss:$16 sps:$4 sm:$0xff]  }
  0x71   :  { %1605 = vmatprep.subr.bf16.mxu1 %v5938_v60  ;;  %v6027_v60 = vld [vmem:[%s8879_s2 + $0x38c] ss:$16 sps:$4 sm:$0xff]  }
  0x73   :  { %1540 = vmatpush2.bf16.msra.mxu0 %v5933_v61  ;;  %v6030_v61 = vld [vmem:[%s8879_s2 + $0x48c] ss:$16 sps:$4 sm:$0xff]  }
  0x74   :  { %1606 = vmatpush1.bf16.msra.mxu1 %v5936_v62  ;;  %1541 = vmatprep.subr.bf16.mxu0 %v5941_v63  ;;  %v6028_v62 = vld [vmem:[%s8879_s2 + $0x488] ss:$16 sps:$4 sm:$0xff]   ;;  %v6033_v63 = vld [vmem:[%s8879_s2 + $0x36c] ss:$16 sps:$4 sm:$0xff]  }
  0x75   :  { %1607 = vmatprep.subr.bf16.mxu1 %v5944_v0  ;;  %v6036_v0 = vld [vmem:[%s8879_s2 + $0x46c] ss:$16 sps:$4 sm:$0xff]  }
  0x77   :  { %1542 = vmatpush2.bf16.msra.mxu0 %v5939_v1  ;;  %v6031_v1 = vld [vmem:[%s8879_s2 + $0x368] ss:$16 sps:$4 sm:$0xff]  }
  0x78   :  { %1608 = vmatpush1.bf16.msra.mxu1 %v5942_v2  ;;  %1543 = vmatprep.subr.bf16.mxu0 %v5947_v3  ;;  %v6034_v2 = vld [vmem:[%s8879_s2 + $0x468] ss:$16 sps:$4 sm:$0xff]   ;;  %v6039_v3 = vld [vmem:[%s8879_s2 + $0x34c] ss:$16 sps:$4 sm:$0xff]  }
  0x79   :  { %1609 = vmatprep.subr.bf16.mxu1 %v5950_v4  ;;  %v6042_v4 = vld [vmem:[%s8879_s2 + $0x44c] ss:$16 sps:$4 sm:$0xff]  }
  0x7b   :  { %1544 = vmatpush2.bf16.msra.mxu0 %v5945_v5  ;;  %v6037_v5 = vld [vmem:[%s8879_s2 + $0x348] ss:$16 sps:$4 sm:$0xff]  }
  0x7c   :  { %1610 = vmatpush1.bf16.msra.mxu1 %v5948_v8  ;;  %1545 = vmatprep.subr.bf16.mxu0 %v5953_v9  ;;  %v6040_v8 = vld [vmem:[%s8879_s2 + $0x448] ss:$16 sps:$4 sm:$0xff]   ;;  %v6045_v9 = vld [vmem:[%s8879_s2 + $0x32c] ss:$16 sps:$4 sm:$0xff]  }
  0x7d   :  { %1611 = vmatprep.subr.bf16.mxu1 %v5956_v10  ;;  %v6048_v10 = vld [vmem:[%s8879_s2 + $0x42c] ss:$16 sps:$4 sm:$0xff]  }
  0x7f   :  { %1546 = vmatpush2.bf16.msra.mxu0 %v5951_v11  ;;  %v6043_v11 = vld [vmem:[%s8879_s2 + $0x328] ss:$16 sps:$4 sm:$0xff]  }
  0x80   :  { %1612 = vmatpush1.bf16.msra.mxu1 %v5954_v12  ;;  %1638 = vmatprep.subr.bf16.mxu0 %v5964_v14  ;;  %v6046_v12 = vld [vmem:[%s8879_s2 + $0x428] ss:$16 sps:$4 sm:$0xff]   ;;  %v6054_v14 = vld [vmem:[%s8879_s2 + $0x40c] ss:$16 sps:$4 sm:$0xff]  }
  0x81   :  { %1613 = vmatprep.subr.bf16.mxu1 %v5961_v13  ;;  %v6051_v13 = vld [vmem:[%s8879_s2 + $0x30c] ss:$16 sps:$4 sm:$0xff]  }
  0x82   :  { %1548 = vmatmul.mubr.bf16.vlgmr.msra.gmra.mxu0 %v7208_v15 }
  0x83   :  { %1639 = vmatpush1.bf16.msra.mxu0 %v5962_v18  ;;  %1670 = vmatprep.mubr.bf16.mxu0 %v6932_v51  ;;  %v5982_v51 = vld [vmem:[%s8879_s2 + $0x28c] ss:$16 sps:$4 sm:$0xff]   ;;  %v6052_v18 = vld [vmem:[%s8879_s2 + $0x408] ss:$16 sps:$4 sm:$0xff]  }
  0x84   :  { %1614 = vmatpush2.bf16.msra.mxu1 %v5959_v17  ;;  %1640 = vmatprep.subr.bf16.mxu0 %v5970_v20  ;;  %v6049_v17 = vld [vmem:[%s8879_s2 + $0x308] ss:$16 sps:$4 sm:$0xff]   ;;  %v6060_v20 = vld [vmem:[%s8879_s2 + $0x6ec] ss:$16 sps:$4 sm:$0xff]  }
  0x85   :  { %1615 = vmatprep.subr.bf16.mxu1 %v5967_v19  ;;  %v6057_v19 = vld [vmem:[%s8879_s2 + $0x5ec] ss:$16 sps:$4 sm:$0xff]  }
  0x87   :  { %1641 = vmatpush1.bf16.msra.mxu0 %v5968_v22  ;;  %v6058_v22 = vld [vmem:[%s8879_s2 + $0x6e8] ss:$16 sps:$4 sm:$0xff]  }
  0x88   :  { %1616 = vmatpush2.bf16.msra.mxu1 %v5965_v21  ;;  %1642 = vmatprep.subr.bf16.mxu0 %v5976_v24  ;;  %v6055_v21 = vld [vmem:[%s8879_s2 + $0x5e8] ss:$16 sps:$4 sm:$0xff]   ;;  %v6066_v24 = vld [vmem:[%s8879_s2 + $0x6cc] ss:$16 sps:$4 sm:$0xff]  }
  0x89   :  { %1617 = vmatprep.subr.bf16.mxu1 %v5973_v23  ;;  %v6063_v23 = vld [vmem:[%s8879_s2 + $0x5cc] ss:$16 sps:$4 sm:$0xff]  }
  0x8b   :  { %1643 = vmatpush1.bf16.msra.mxu0 %v5974_v26  ;;  %v6064_v26 = vld [vmem:[%s8879_s2 + $0x6c8] ss:$16 sps:$4 sm:$0xff]  }
  0x8c   :  { %1618 = vmatpush2.bf16.msra.mxu1 %v5971_v25  ;;  %1644 = vmatprep.subr.bf16.mxu0 %v5982_v51  ;;  %v6061_v25 = vld [vmem:[%s8879_s2 + $0x5c8] ss:$16 sps:$4 sm:$0xff]   ;;  %v6072_v51 = vld [vmem:[%s8879_s2 + $0x6ac] ss:$16 sps:$4 sm:$0xff]  }
  0x8d   :  { %1619 = vmatprep.subr.bf16.mxu1 %v5979_v27  ;;  %v6069_v27 = vld [vmem:[%s8879_s2 + $0x5ac] ss:$16 sps:$4 sm:$0xff]  }
  0x8f   :  { %1645 = vmatpush1.bf16.msra.mxu0 %v5980_v29  ;;  %v6075_v29 = vld [vmem:[%s8879_s2 + $0x58c] ss:$16 sps:$4 sm:$0xff]  }
  0x90   :  { %1620 = vmatpush2.bf16.msra.mxu1 %v5977_v28  ;;  %1646 = vmatprep.subr.bf16.mxu0 %v5988_v31  ;;  %v6067_v28 = vld [vmem:[%s8879_s2 + $0x5a8] ss:$16 sps:$4 sm:$0xff]  }
  0x91   :  { %1621 = vmatprep.subr.bf16.mxu1 %v5985_v30  ;;  %v6078_v30 = vld [vmem:[%s8879_s2 + $0x68c] ss:$16 sps:$4 sm:$0xff]   ;;  %v6073_v31 = vld [vmem:[%s8879_s2 + $0x588] ss:$16 sps:$4 sm:$0xff]  }
  0x93   :  { %1647 = vmatpush1.bf16.msra.mxu0 %v5986_v33  ;;  %v6084_v33 = vld [vmem:[%s8879_s2 + $0x66c] ss:$16 sps:$4 sm:$0xff]  }
  0x94   :  { %1622 = vmatpush2.bf16.msra.mxu1 %v5983_v32  ;;  %1648 = vmatprep.subr.bf16.mxu0 %v5994_v36  ;;  %v6081_v32 = vld [vmem:[%s8879_s2 + $0x56c] ss:$16 sps:$4 sm:$0xff]   ;;  %v6082_v36 = vld [vmem:[%s8879_s2 + $0x668] ss:$16 sps:$4 sm:$0xff]  }
  0x95   :  { %1623 = vmatprep.subr.bf16.mxu1 %v5991_v34  ;;  %v6079_v34 = vld [vmem:[%s8879_s2 + $0x568] ss:$16 sps:$4 sm:$0xff]  }
  0x97   :  { %1649 = vmatpush1.bf16.msra.mxu0 %v5992_v38  ;;  %v6090_v38 = vld [vmem:[%s8879_s2 + $0x64c] ss:$16 sps:$4 sm:$0xff]  }
  0x98   :  { %1624 = vmatpush2.bf16.msra.mxu1 %v5989_v37  ;;  %1650 = vmatprep.subr.bf16.mxu0 %v6000_v40  ;;  %v6087_v37 = vld [vmem:[%s8879_s2 + $0x54c] ss:$16 sps:$4 sm:$0xff]   ;;  %v6088_v40 = vld [vmem:[%s8879_s2 + $0x648] ss:$16 sps:$4 sm:$0xff]  }
  0x99   :  { %1625 = vmatprep.subr.bf16.mxu1 %v5997_v39  ;;  %v6085_v39 = vld [vmem:[%s8879_s2 + $0x548] ss:$16 sps:$4 sm:$0xff]  }
  0x9b   :  { %1651 = vmatpush1.bf16.msra.mxu0 %v5998_v42  ;;  %v6096_v42 = vld [vmem:[%s8879_s2 + $0x62c] ss:$16 sps:$4 sm:$0xff]  }
  0x9c   :  { %1626 = vmatpush2.bf16.msra.mxu1 %v5995_v41  ;;  %1652 = vmatprep.subr.bf16.mxu0 %v6006_v45  ;;  %v6093_v41 = vld [vmem:[%s8879_s2 + $0x52c] ss:$16 sps:$4 sm:$0xff]   ;;  %v6094_v45 = vld [vmem:[%s8879_s2 + $0x628] ss:$16 sps:$4 sm:$0xff]  }
  0x9d   :  { %1627 = vmatprep.subr.bf16.mxu1 %v6003_v43  ;;  %v6091_v43 = vld [vmem:[%s8879_s2 + $0x528] ss:$16 sps:$4 sm:$0xff]  }
  0x9f   :  { %1653 = vmatpush1.bf16.msra.mxu0 %v6004_v48  ;;  %v6102_v48 = vld [vmem:[%s8879_s2 + $0x60c] ss:$16 sps:$4 sm:$0xff]  }
  0xa0   :  { %1628 = vmatpush2.bf16.msra.mxu1 %v6001_v46  ;;  %1654 = vmatprep.subr.bf16.mxu0 %v6009_v49  ;;  %v6099_v46 = vld [vmem:[%s8879_s2 + $0x50c] ss:$16 sps:$4 sm:$0xff]   ;;  %v6097_v49 = vld [vmem:[%s8879_s2 + $0x508] ss:$16 sps:$4 sm:$0xff]  }
  0xa1   :  { %1679 = vmatprep.subr.bf16.mxu1 %v6012_v50  ;;  %v6100_v50 = vld [vmem:[%s8879_s2 + $0x608] ss:$16 sps:$4 sm:$0xff]  }
  0xa3   :  { %1630 = vmatmul.mubr.bf16.vlgmr.msra.gmra.mxu1 %v6990_v6  ;;  %1655 = vmatpush2.bf16.msra.mxu0 %v6007_v52  ;;  %v6022_v6 = vld [vmem:[%s8879_s2 + $0x4a8] ss:$16 sps:$4 sm:$0xff]   ;;  %v6105_v52 = vld [vmem:[%s8881_s4 + $0xe4] ss:$16 sps:$4 sm:$0xff]  }
  0xa4   :  { %1680 = vmatpush1.bf16.msra.mxu1 %v6010_v53  ;;  %1656 = vmatprep.subr.bf16.mxu0 %v6015_v54  ;;  %v6103_v53 = vld [vmem:[%s8881_s4 + $0xe0] ss:$16 sps:$4 sm:$0xff]   ;;  %v6108_v54 = vld [vmem:[%s8881_s4 + $0xc4] ss:$16 sps:$4 sm:$0xff]  }
  0xa5   :  { %1681 = vmatprep.subr.bf16.mxu1 %v6018_v55  ;;  %1711 = vmatprep.mubr.bf16.mxu1 %v7079_v35  ;;  %v6025_v35 = vld [vmem:[%s8879_s2 + $0x388] ss:$16 sps:$4 sm:$0xff]   ;;  %v6106_v55 = vld [vmem:[%s8881_s4 + $0xc0] ss:$16 sps:$4 sm:$0xff]  }
  0xa7   :  { %1657 = vmatpush2.bf16.msra.mxu0 %v6013_v56  ;;  %v6111_v56 = vld [vmem:[%s8881_s4 + $0xa4] ss:$16 sps:$4 sm:$0xff]  }
  0xa8   :  { %1682 = vmatpush1.bf16.msra.mxu1 %v6016_v47  ;;  %1658 = vmatprep.subr.bf16.mxu0 %v6021_v57  ;;  %v6109_v47 = vld [vmem:[%s8881_s4 + $0xa0] ss:$16 sps:$4 sm:$0xff]  }
  0xa9   :  { %1683 = vmatprep.subr.bf16.mxu1 %v6024_v58  ;;  %v6175_v57 = vld [vmem:[%s8881_s4 + $0x2e0] ss:$16 sps:$4 sm:$0xff]   ;;  %v6177_v58 = vld [vmem:[%s8881_s4 + $0x2e4] ss:$16 sps:$4 sm:$0xff]  }
  0xab   :  { %1659 = vmatpush2.bf16.msra.mxu0 %v6019_v59  ;;  %v6117_v59 = vld [vmem:[%s8881_s4 + $0x64] ss:$16 sps:$4 sm:$0xff]  }
  0xac   :  { %1684 = vmatpush1.bf16.msra.mxu1 %v6022_v6  ;;  %1660 = vmatprep.subr.bf16.mxu0 %v6027_v60  ;;  %v6115_v6 = vld [vmem:[%s8881_s4 + $0x60] ss:$16 sps:$4 sm:$0xff]  }
  0xad   :  { %1685 = vmatprep.subr.bf16.mxu1 %v6030_v61  ;;  %v6181_v60 = vld [vmem:[%s8881_s4 + $0x2c0] ss:$16 sps:$4 sm:$0xff]   ;;  %v6183_v61 = vld [vmem:[%s8881_s4 + $0x2c4] ss:$16 sps:$4 sm:$0xff]  }
  0xaf   :  { %1661 = vmatpush2.bf16.msra.mxu0 %v6025_v35  ;;  %v6120_v35 = vld [vmem:[%s8881_s4 + $0x44] ss:$16 sps:$4 sm:$0xff]  }
  0xb0   :  { %1686 = vmatpush1.bf16.msra.mxu1 %v6028_v62  ;;  %1662 = vmatprep.subr.bf16.mxu0 %v6033_v63  ;;  %v6118_v62 = vld [vmem:[%s8881_s4 + $0x40] ss:$16 sps:$4 sm:$0xff]  }
  0xb1   :  { %1687 = vmatprep.subr.bf16.mxu1 %v6036_v0  ;;  %v6187_v63 = vld [vmem:[%s8881_s4 + $0x2a0] ss:$16 sps:$4 sm:$0xff]   ;;  %v6189_v0 = vld [vmem:[%s8881_s4 + $0x2a4] ss:$16 sps:$4 sm:$0xff]  }
  0xb3   :  { %1663 = vmatpush2.bf16.msra.mxu0 %v6031_v1  ;;  %v6123_v1 = vld [vmem:[%s8881_s4 + $0x24] ss:$16 sps:$4 sm:$0xff]  }
  0xb4   :  { %1688 = vmatpush1.bf16.msra.mxu1 %v6034_v2  ;;  %1664 = vmatprep.subr.bf16.mxu0 %v6039_v3  ;;  %v6121_v2 = vld [vmem:[%s8881_s4 + $0x20] ss:$16 sps:$4 sm:$0xff]  }
  0xb5   :  { %1689 = vmatprep.subr.bf16.mxu1 %v6042_v4  ;;  %v6193_v3 = vld [vmem:[%s8881_s4 + $0x280] ss:$16 sps:$4 sm:$0xff]   ;;  %v6195_v4 = vld [vmem:[%s8881_s4 + $0x284] ss:$16 sps:$4 sm:$0xff]  }
  0xb7   :  { %1665 = vmatpush2.bf16.msra.mxu0 %v6037_v5  ;;  %v6126_v5 = vld [vmem:[%s8881_s4 + $0x4] ss:$16 sps:$4 sm:$0xff]  }
  0xb8   :  { %1690 = vmatpush1.bf16.msra.mxu1 %v6040_v8  ;;  %1666 = vmatprep.subr.bf16.mxu0 %v6045_v9  ;;  %v6124_v8 = vld [vmem:[%s8881_s4] ss:$16 sps:$4 sm:$0xff]  }
  0xb9   :  { %1691 = vmatprep.subr.bf16.mxu1 %v6048_v10  ;;  %v6199_v9 = vld [vmem:[%s8881_s4 + $0x260] ss:$16 sps:$4 sm:$0xff]   ;;  %v6201_v10 = vld [vmem:[%s8881_s4 + $0x264] ss:$16 sps:$4 sm:$0xff]  }
  0xbb   :  { %1667 = vmatpush2.bf16.msra.mxu0 %v6043_v11  ;;  %v6129_v11 = vld [vmem:[%s8881_s4 + $0x1e4] ss:$16 sps:$4 sm:$0xff]  }
  0xbc   :  { %1692 = vmatpush1.bf16.msra.mxu1 %v6046_v12  ;;  %1668 = vmatprep.subr.bf16.mxu0 %v6051_v13  ;;  %v6127_v12 = vld [vmem:[%s8881_s4 + $0x1e0] ss:$16 sps:$4 sm:$0xff]  }
  0xbd   :  { %1693 = vmatprep.subr.bf16.mxu1 %v6054_v14  ;;  %v6205_v13 = vld [vmem:[%s8881_s4 + $0x240] ss:$16 sps:$4 sm:$0xff]   ;;  %v6207_v14 = vld [vmem:[%s8881_s4 + $0x244] ss:$16 sps:$4 sm:$0xff]  }
  0xbf   :  { %1669 = vmatpush2.bf16.msra.mxu0 %v6049_v17  ;;  %v6132_v17 = vld [vmem:[%s8881_s4 + $0x1c4] ss:$16 sps:$4 sm:$0xff]  }
  0xc0   :  { %1694 = vmatpush1.bf16.msra.mxu1 %v6052_v18  ;;  %1720 = vmatprep.subr.bf16.mxu0 %v6060_v20  ;;  %v6130_v20 = vld [vmem:[%s8881_s4 + $0x1c0] ss:$16 sps:$4 sm:$0xff]  }
  0xc1   :  { %1695 = vmatprep.subr.bf16.mxu1 %v6057_v19 }
  0xc2   :  { %1671 = vmatmul.mubr.bf16.vlgmr.msra.gmra.mxu0 %v6992_v7  ;;  %v6070_v7 = vld [vmem:[%s8879_s2 + $0x6a8] ss:$16 sps:$4 sm:$0xff]  }
  0xc3   :  { %1721 = vmatpush1.bf16.msra.mxu0 %v6058_v22  ;;  %1752 = vmatprep.mubr.bf16.mxu0 %v6719_v16  ;;  %v6076_v16 = vld [vmem:[%s8879_s2 + $0x688] ss:$16 sps:$4 sm:$0xff]  }
  0xc4   :  { %1696 = vmatpush2.bf16.msra.mxu1 %v6055_v21  ;;  %1722 = vmatprep.subr.bf16.mxu0 %v6066_v24  ;;  %v6213_v24 = vld [vmem:[%s8881_s4 + $0x224] ss:$16 sps:$4 sm:$0xff]  }
  0xc5   :  { %1697 = vmatprep.subr.bf16.mxu1 %v6063_v23  ;;  %v6135_v23 = vld [vmem:[%s8881_s4 + $0x1a4] ss:$16 sps:$4 sm:$0xff]  }
  0xc7   :  { %1723 = vmatpush1.bf16.msra.mxu0 %v6064_v26 }
  0xc8   :  { %1698 = vmatpush2.bf16.msra.mxu1 %v6061_v25  ;;  %1724 = vmatprep.subr.bf16.mxu0 %v6072_v51  ;;  %v6211_v25 = vld [vmem:[%s8881_s4 + $0x220] ss:$16 sps:$4 sm:$0xff]  }
  0xc9   :  { %1699 = vmatprep.subr.bf16.mxu1 %v6069_v27  ;;  %v6133_v51 = vld [vmem:[%s8881_s4 + $0x1a0] ss:$16 sps:$4 sm:$0xff]  }
  0xcb   :  { %1725 = vmatpush1.bf16.msra.mxu0 %v6070_v7 }
  0xcc   :  { %1700 = vmatpush2.bf16.msra.mxu1 %v6067_v28  ;;  %1726 = vmatprep.subr.bf16.mxu0 %v6078_v30  ;;  %v6217_v30 = vld [vmem:[%s8881_s4 + $0x200] ss:$16 sps:$4 sm:$0xff]  }
  0xcd   :  { %1701 = vmatprep.subr.bf16.mxu1 %v6075_v29  ;;  %v6138_v29 = vld [vmem:[%s8881_s4 + $0x184] ss:$16 sps:$4 sm:$0xff]  }
  0xcf   :  { %1727 = vmatpush1.bf16.msra.mxu0 %v6076_v16  ;;  %v6136_v16 = vld [vmem:[%s8881_s4 + $0x180] ss:$16 sps:$4 sm:$0xff]  }
  0xd0   :  { %1702 = vmatpush2.bf16.msra.mxu1 %v6073_v31  ;;  %1728 = vmatprep.subr.bf16.mxu0 %v6084_v33  ;;  %v6219_v31 = vld [vmem:[%s8881_s4 + $0x204] ss:$16 sps:$4 sm:$0xff]  }
  0xd1   :  { %1703 = vmatprep.subr.bf16.mxu1 %v6081_v32  ;;  %v6223_v32 = vld [vmem:[%s8881_s4 + $0x3e0] ss:$16 sps:$4 sm:$0xff]   ;;  %v6225_v33 = vld [vmem:[%s8881_s4 + $0x3e4] ss:$16 sps:$4 sm:$0xff]  }
  0xd3   :  { %1729 = vmatpush1.bf16.msra.mxu0 %v6082_v36  ;;  %v6228_v36 = vld [vmem:[%s8881_s4 + $0x3c4] ss:$16 sps:$4 sm:$0xff]  }
  0xd4   :  { %1704 = vmatpush2.bf16.msra.mxu1 %v6079_v34  ;;  %1730 = vmatprep.subr.bf16.mxu0 %v6090_v38  ;;  %v6141_v34 = vld [vmem:[%s8881_s4 + $0x164] ss:$16 sps:$4 sm:$0xff]   ;;  %v6226_v38 = vld [vmem:[%s8881_s4 + $0x3c0] ss:$16 sps:$4 sm:$0xff]  }
  0xd5   :  { %1705 = vmatprep.subr.bf16.mxu1 %v6087_v37  ;;  %v6139_v37 = vld [vmem:[%s8881_s4 + $0x160] ss:$16 sps:$4 sm:$0xff]  }
  0xd7   :  { %1731 = vmatpush1.bf16.msra.mxu0 %v6088_v40  ;;  %v6231_v40 = vld [vmem:[%s8881_s4 + $0x3a4] ss:$16 sps:$4 sm:$0xff]  }
  0xd8   :  { %1706 = vmatpush2.bf16.msra.mxu1 %v6085_v39  ;;  %1732 = vmatprep.subr.bf16.mxu0 %v6096_v42  ;;  %v6144_v39 = vld [vmem:[%s8881_s4 + $0x144] ss:$16 sps:$4 sm:$0xff]   ;;  %v6229_v42 = vld [vmem:[%s8881_s4 + $0x3a0] ss:$16 sps:$4 sm:$0xff]  }
  0xd9   :  { %1707 = vmatprep.subr.bf16.mxu1 %v6093_v41  ;;  %v6142_v41 = vld [vmem:[%s8881_s4 + $0x140] ss:$16 sps:$4 sm:$0xff]  }
  0xdb   :  { %1733 = vmatpush1.bf16.msra.mxu0 %v6094_v45  ;;  %v6234_v45 = vld [vmem:[%s8881_s4 + $0x384] ss:$16 sps:$4 sm:$0xff]  }
  0xdc   :  { %1708 = vmatpush2.bf16.msra.mxu1 %v6091_v43  ;;  %1734 = vmatprep.subr.bf16.mxu0 %v6102_v48  ;;  %v6147_v43 = vld [vmem:[%s8881_s4 + $0x124] ss:$16 sps:$4 sm:$0xff]   ;;  %v6232_v48 = vld [vmem:[%s8881_s4 + $0x380] ss:$16 sps:$4 sm:$0xff]  }
  0xdd   :  { %1709 = vmatprep.subr.bf16.mxu1 %v6099_v46  ;;  %v6145_v46 = vld [vmem:[%s8881_s4 + $0x120] ss:$16 sps:$4 sm:$0xff]  }
  0xdf   :  { %1735 = vmatpush1.bf16.msra.mxu0 %v6100_v50  ;;  %v6237_v50 = vld [vmem:[%s8881_s4 + $0x364] ss:$16 sps:$4 sm:$0xff]  }
  0xe0   :  { %1710 = vmatpush2.bf16.msra.mxu1 %v6097_v49  ;;  %2559 = vmatprep.subr.bf16.mxu0 %v6105_v52  ;;  %v6150_v49 = vld [vmem:[%s8881_s4 + $0x104] ss:$16 sps:$4 sm:$0xff]   ;;  %v6148_v52 = vld [vmem:[%s8881_s4 + $0x100] ss:$16 sps:$4 sm:$0xff]  }
  0xe1   :  { %2600 = vmatprep.subr.bf16.mxu1 %v6177_v58 }
  0xe2   :  { %1753 = vmatmul.mubr.bf16.vlgmr.msra.gmra.mxu0 %v7109_v44  ;;  %v6114_v44 = vld [vmem:[%s8881_s4 + $0x84] ss:$16 sps:$4 sm:$0xff]  }
  0xe3   :  { %1712 = vmatmul.mubr.bf16.vlgmr.msra.gmra.mxu1 %v7208_v15  ;;  %2560 = vmatpush1.bf16.msra.mxu0 %v6103_v53  ;;  %v6112_v15 = vld [vmem:[%s8881_s4 + $0x80] ss:$16 sps:$4 sm:$0xff]  }
  0xe4   :  { %2561 = vmatprep.subr.bf16.mxu0 %v6108_v54  ;;  %2601 = vmatpush1.bf16.msra.mxu1 %v6175_v57  ;;  %v6235_v53 = vld [vmem:[%s8881_s4 + $0x360] ss:$16 sps:$4 sm:$0xff]   ;;  %v6153_v54 = vld [vmem:[%s8881_s4 + $0xec] ss:$16 sps:$4 sm:$0xff]  }
  0xe5   :  { %2602 = vmatprep.subr.bf16.mxu1 %v6183_v61  ;;  %v6241_v57 = vld [vmem:[%s8881_s4 + $0x320] ss:$16 sps:$4 sm:$0xff]   ;;  %v6249_v61 = vld [vmem:[%s8881_s4 + $0x2ec] ss:$16 sps:$4 sm:$0xff]  }
  0xe7   :  { %2562 = vmatpush1.bf16.msra.mxu0 %v6106_v55  ;;  %v6240_v55 = vld [vmem:[%s8881_s4 + $0x344] ss:$16 sps:$4 sm:$0xff]  }
  0xe8   :  { %2563 = vmatprep.subr.bf16.mxu0 %v6111_v56  ;;  %2603 = vmatpush1.bf16.msra.mxu1 %v6181_v60  ;;  %v6238_v56 = vld [vmem:[%s8881_s4 + $0x340] ss:$16 sps:$4 sm:$0xff]  }
  0xe9   :  { %2604 = vmatprep.subr.bf16.mxu1 %v6189_v0  ;;  %v6244_v60 = vld [vmem:[%s8881_s4 + $0x300] ss:$16 sps:$4 sm:$0xff]  }
  0xea   :  { %v7714_v0 = vld [vmem:[%s8882_s3] sm:$0xf] }
  0xeb   :  { %2564 = vmatpush1.bf16.msra.mxu0 %v6109_v47 }
  0xec   :  { %2565 = vmatprep.subr.bf16.mxu0 %v6114_v44  ;;  %2605 = vmatpush1.bf16.msra.mxu1 %v6187_v63 }
  0xed   :  { %2606 = vmatprep.subr.bf16.mxu1 %v6195_v4 }
  0xef   :  { %2566 = vmatpush1.bf16.msra.mxu0 %v6112_v15  ;;  %v6243_v15 = vld [vmem:[%s8881_s4 + $0x324] ss:$16 sps:$4 sm:$0xff]  }
  0xf0   :  { %2567 = vmatprep.subr.bf16.mxu0 %v6117_v59  ;;  %2607 = vmatpush1.bf16.msra.mxu1 %v6193_v3 }
  0xf1   :  { %2608 = vmatprep.subr.bf16.mxu1 %v6201_v10 }
  0xf3   :  { %2568 = vmatpush1.bf16.msra.mxu0 %v6115_v6  ;;  %v6246_v6 = vld [vmem:[%s8881_s4 + $0x304] ss:$16 sps:$4 sm:$0xff]  }
  0xf4   :  { %2569 = vmatprep.subr.bf16.mxu0 %v6120_v35  ;;  %2609 = vmatpush1.bf16.msra.mxu1 %v6199_v9  ;;  %v268_v35 = vlaneseq }
  0xf5   :  { %2610 = vmatprep.subr.bf16.mxu1 %v6207_v14 }
  0xf7   :  { %2570 = vmatpush1.bf16.msra.mxu0 %v6118_v62  ;;  %v7706_v62 = vshrl.u32 %v268_v35, 7 }
  0xf8   :  { %2571 = vmatprep.subr.bf16.mxu0 %v6123_v1  ;;  %2611 = vmatpush1.bf16.msra.mxu1 %v6205_v13 }
  0xf9   :  { %2612 = vmatprep.subr.bf16.mxu1 %v6213_v24  ;;  %v7709_v63 = vsub.s32 0, %v7706_v62  ;;  %v7717_v1 = vsub.s32 1, %v7706_v62 }
  0xfb   :  { %2572 = vmatpush1.bf16.msra.mxu0 %v6121_v2  ;;  %v271_v2 = vrot.slane %v7714_v0, %v7709_v63  ;;  %v275_v3 = vrot.slane %v7714_v0, %v7717_v1 }
  0xfc   :  { %2573 = vmatprep.subr.bf16.mxu0 %v6126_v5  ;;  %2613 = vmatpush1.bf16.msra.mxu1 %v6211_v25 }
  0xfd   :  { %2614 = vmatprep.subr.bf16.mxu1 %v6219_v31  ;;  %v6168_v31 = vld [vmem:[%s8881_s4 + $0x4c] ss:$16 sps:$4 sm:$0xff]  }
  0xff   :  { %2574 = vmatpush1.bf16.msra.mxu0 %v6124_v8 }
 0x100   :  { %2575 = vmatprep.subr.bf16.mxu0 %v6129_v11  ;;  %2615 = vmatpush1.bf16.msra.mxu1 %v6217_v30  ;;  %v6163_v30 = vld [vmem:[%s8881_s4 + $0x68] ss:$16 sps:$4 sm:$0xff]  }
 0x101   :  { %2616 = vmatprep.subr.bf16.mxu1 %v6225_v33 }
 0x102   :  { %v7593_v18 = vpop.f32.mrf.mxu0 }
 0x103   :  { %v7595_v19 = vpop.f32.mrf.mxu1  ;;  %2576 = vmatpush2.bf16.msra.mxu0 %v6127_v12  ;;  %v1468_v4 = vadd.f32 %v7593_v18, %v271_v2  ;;  %v6151_v18 = vld [vmem:[%s8881_s4 + $0xe8] ss:$16 sps:$4 sm:$0xff]  }
 0x104   :  { %v7600_v21 = vpop.f32.mrf.mxu0  ;;  %2577 = vmatprep.subr.bf16.mxu0 %v6132_v17  ;;  %2617 = vmatpush2.bf16.msra.mxu1 %v6223_v32  ;;  %v6171_v32 = vld [vmem:[%s8881_s4 + $0x2c] ss:$16 sps:$4 sm:$0xff]  }
 0x105   :  { %v7602_v22 = vpop.f32.mrf.mxu1  ;;  %2618 = vmatprep.subr.bf16.mxu1 %v6228_v36  ;;  %v1470_v5 = vadd.f32 %v7600_v21, %v275_v3  ;;  %v1509_v8 = vadd.f32 %v7595_v19, %v1468_v4  ;;  %v6156_v19 = vld [vmem:[%s8881_s4 + $0xcc] ss:$16 sps:$4 sm:$0xff]  }
 0x106   :  { %v1471_v26 = vpop.f32.mrf.mxu0 }
 0x107   :  { %v1512_v27 = vpop.f32.mrf.mxu1  ;;  %2578 = vmatpush2.bf16.msra.mxu0 %v6130_v20  ;;  %v1511_v10 = vadd.f32 %v7602_v22, %v1470_v5  ;;  %v6154_v22 = vld [vmem:[%s8881_s4 + $0xc8] ss:$16 sps:$4 sm:$0xff]  }
 0x108   :  { %v1472_v28 = vpop.f32.mrf.mxu0  ;;  %2579 = vmatprep.subr.bf16.mxu0 %v6135_v23  ;;  %2619 = vmatpush2.bf16.msra.mxu1 %v6226_v38  ;;  %v6159_v27 = vld [vmem:[%s8881_s4 + $0xac] ss:$16 sps:$4 sm:$0xff]  }
 0x109   :  { %v1513_v7 = vpop.f32.mrf.mxu1  ;;  %2620 = vmatprep.subr.bf16.mxu1 %v6231_v40  ;;  %v6162_v28 = vld [vmem:[%s8881_s4 + $0x8c] ss:$16 sps:$4 sm:$0xff]  }
 0x10a   :  { %v6160_v7 = vld [vmem:[%s8881_s4 + $0x88] ss:$16 sps:$4 sm:$0xff]  }
 0x10b   :  { %2580 = vmatpush2.bf16.msra.mxu0 %v6133_v51  ;;  %v6157_v51 = vld [vmem:[%s8881_s4 + $0xa8] ss:$16 sps:$4 sm:$0xff]  }
 0x10c   :  { %2581 = vmatprep.subr.bf16.mxu0 %v6138_v29  ;;  %2621 = vmatpush2.bf16.msra.mxu1 %v6229_v42  ;;  %v6165_v29 = vld [vmem:[%s8881_s4 + $0x6c] ss:$16 sps:$4 sm:$0xff]   ;;  %v6178_v42 = vld [vmem:[%s8881_s4 + $0x1e8] ss:$16 sps:$4 sm:$0xff]  }
 0x10d   :  { %2622 = vmatprep.subr.bf16.mxu1 %v6234_v45  ;;  %v6184_v45 = vld [vmem:[%s8881_s4 + $0x1c8] ss:$16 sps:$4 sm:$0xff]  }
 0x10f   :  { %2582 = vmatpush2.bf16.msra.mxu0 %v6136_v16  ;;  %v6166_v16 = vld [vmem:[%s8881_s4 + $0x48] ss:$16 sps:$4 sm:$0xff]  }
 0x110   :  { %2583 = vmatprep.subr.bf16.mxu0 %v6141_v34  ;;  %2623 = vmatpush2.bf16.msra.mxu1 %v6232_v48  ;;  %v6169_v34 = vld [vmem:[%s8881_s4 + $0x28] ss:$16 sps:$4 sm:$0xff]  }
 0x111   :  { %2624 = vmatprep.subr.bf16.mxu1 %v6237_v50  ;;  %v6190_v48 = vld [vmem:[%s8881_s4 + $0x1a8] ss:$16 sps:$4 sm:$0xff]  }
 0x112   :  { %v6196_v50 = vld [vmem:[%s8881_s4 + $0x188] ss:$16 sps:$4 sm:$0xff]  }
 0x113   :  { %2584 = vmatpush2.bf16.msra.mxu0 %v6139_v37  ;;  %v6174_v37 = vld [vmem:[%s8881_s4 + $0xc] ss:$16 sps:$4 sm:$0xff]  }
 0x114   :  { %2585 = vmatprep.subr.bf16.mxu0 %v6144_v39  ;;  %2625 = vmatpush2.bf16.msra.mxu1 %v6235_v53  ;;  %v6172_v39 = vld [vmem:[%s8881_s4 + $0x8] ss:$16 sps:$4 sm:$0xff]  }
 0x115   :  { %2626 = vmatprep.subr.bf16.mxu1 %v6240_v55  ;;  %v6202_v53 = vld [vmem:[%s8881_s4 + $0x168] ss:$16 sps:$4 sm:$0xff]  }
 0x116   :  { %v6208_v55 = vld [vmem:[%s8881_s4 + $0x148] ss:$16 sps:$4 sm:$0xff]  }
 0x117   :  { %2586 = vmatpush2.bf16.msra.mxu0 %v6142_v41  ;;  %v6180_v41 = vld [vmem:[%s8881_s4 + $0x1ec] ss:$16 sps:$4 sm:$0xff]  }
 0x118   :  { %2587 = vmatprep.subr.bf16.mxu0 %v6147_v43  ;;  %2627 = vmatpush2.bf16.msra.mxu1 %v6238_v56  ;;  %v6186_v43 = vld [vmem:[%s8881_s4 + $0x1cc] ss:$16 sps:$4 sm:$0xff]  }
 0x119   :  { %2628 = vmatprep.subr.bf16.mxu1 %v6243_v15  ;;  %v6216_v56 = vld [vmem:[%s8881_s4 + $0x12c] ss:$16 sps:$4 sm:$0xff]  }
 0x11b   :  { %2588 = vmatpush2.bf16.msra.mxu0 %v6145_v46  ;;  %v6192_v46 = vld [vmem:[%s8881_s4 + $0x1ac] ss:$16 sps:$4 sm:$0xff]  }
 0x11c   :  { %2589 = vmatprep.subr.bf16.mxu0 %v6150_v49  ;;  %2629 = vmatpush2.bf16.msra.mxu1 %v6241_v57  ;;  %v6198_v49 = vld [vmem:[%s8881_s4 + $0x18c] ss:$16 sps:$4 sm:$0xff]  }
 0x11d   :  { %2630 = vmatprep.subr.bf16.mxu1 %v6246_v6  ;;  %v6222_v57 = vld [vmem:[%s8881_s4 + $0x10c] ss:$16 sps:$4 sm:$0xff]  }
 0x11f   :  { %2590 = vmatpush2.bf16.msra.mxu0 %v6148_v52  ;;  %v6204_v52 = vld [vmem:[%s8881_s4 + $0x16c] ss:$16 sps:$4 sm:$0xff]  }
 0x120   :  { %2641 = vmatprep.subr.bf16.mxu0 %v6153_v54  ;;  %2631 = vmatpush2.bf16.msra.mxu1 %v6244_v60  ;;  %v6210_v54 = vld [vmem:[%s8881_s4 + $0x14c] ss:$16 sps:$4 sm:$0xff]   ;;  %v7825_v60 = vsub.s32 2, %v7706_v62 }
 0x121   :  { %2682 = vmatprep.subr.bf16.mxu1 %v6249_v61  ;;  %v7828_v61 = vsub.s32 3, %v7706_v62 }
 0x122   :  { %v279_v35 = vrot.slane %v7714_v0, %v7825_v60 }
 0x123   :  { %v1590_v47 = vpop.f32.mrf.mxu1  ;;  %v283_v2 = vrot.slane %v7714_v0, %v7828_v61  ;;  %v6247_v0 = vld [vmem:[%s8881_s4 + $0x2e8] ss:$16 sps:$4 sm:$0xff]  }
 0x125   :  { %v1592_v44 = vpop.f32.mrf.mxu1 }
 0x127   :  { %v1594_v58 = vpop.f32.mrf.mxu1 }
 0x129   :  { %v1595_v59 = vpop.f32.mrf.mxu1 }
 0x12a   :  { %v6220_v59 = vld [vmem:[%s8881_s4 + $0x108] ss:$16 sps:$4 sm:$0xff]  }
 0x142   :  { %v1549_v9 = vpop.f32.mrf.mxu0 }
 0x143   :  { %v1550_v11 = vadd.f32 %v1549_v9, %v1509_v8 }
 0x144   :  { %v1551_v12 = vpop.f32.mrf.mxu0 }
 0x145   :  { %v1591_v13 = vadd.f32 %v1590_v47, %v1550_v11  ;;  %v1552_v14 = vadd.f32 %v1551_v12, %v1511_v10 }
 0x146   :  { %v1553_v17 = vpop.f32.mrf.mxu0 }
 0x147   :  { %v1593_v20 = vadd.f32 %v1592_v44, %v1552_v14  ;;  %v1761_v23 = vmax.f32 %v1591_v13, 0.0  ;;  %v6214_v44 = vld [vmem:[%s8881_s4 + $0x128] ss:$16 sps:$4 sm:$0xff]  }
 0x148   :  { %v1554_v24 = vpop.f32.mrf.mxu0 }
 0x149   :  { %v1762_v25 = vmax.f32 %v1593_v20, 0.0  ;;  %v7730_v21 = vpack.c.bf16 %v1761_v23, %v1761_v23 }
 0x14b   :  { %v1766_v26 = vpack.c.bf16 %v1762_v25, %v1762_v25 }
 0x14d   :  { %2591 = vmatprep.mubr.bf16.mxu0 %v1766_v26 }
 0x14e   :  { %2592 = vmatmul.mubr.bf16.vlgmr.msra.gmra.mxu0 %v7730_v21 }
 0x14f   :  { %2642 = vmatpush1.bf16.msra.mxu0 %v6151_v18  ;;  %2673 = vmatprep.mubr.bf16.mxu0 %v1766_v26 }
 0x150   :  { %2643 = vmatprep.subr.bf16.mxu0 %v6156_v19 }
 0x153   :  { %2644 = vmatpush1.bf16.msra.mxu0 %v6154_v22 }
 0x154   :  { %2645 = vmatprep.subr.bf16.mxu0 %v6159_v27  ;;  %v6252_v27 = vld [vmem:[%s8881_s4 + $0x2cc] ss:$16 sps:$4 sm:$0xff]  }
 0x157   :  { %2646 = vmatpush1.bf16.msra.mxu0 %v6157_v51  ;;  %v6250_v51 = vld [vmem:[%s8881_s4 + $0x2c8] ss:$16 sps:$4 sm:$0xff]  }
 0x158   :  { %2647 = vmatprep.subr.bf16.mxu0 %v6162_v28  ;;  %v6255_v28 = vld [vmem:[%s8881_s4 + $0x2ac] ss:$16 sps:$4 sm:$0xff]  }
 0x15b   :  { %2648 = vmatpush1.bf16.msra.mxu0 %v6160_v7  ;;  %v6253_v7 = vld [vmem:[%s8881_s4 + $0x2a8] ss:$16 sps:$4 sm:$0xff]  }
 0x15c   :  { %2649 = vmatprep.subr.bf16.mxu0 %v6165_v29  ;;  %v6258_v29 = vld [vmem:[%s8881_s4 + $0x28c] ss:$16 sps:$4 sm:$0xff]  }
 0x15f   :  { %2650 = vmatpush1.bf16.msra.mxu0 %v6163_v30  ;;  %v6256_v30 = vld [vmem:[%s8881_s4 + $0x288] ss:$16 sps:$4 sm:$0xff]  }
 0x160   :  { %2651 = vmatprep.subr.bf16.mxu0 %v6168_v31  ;;  %v6261_v31 = vld [vmem:[%s8881_s4 + $0x26c] ss:$16 sps:$4 sm:$0xff]  }
 0x163   :  { %v1631_v33 = vpop.f32.mrf.mxu1  ;;  %2652 = vmatpush1.bf16.msra.mxu0 %v6166_v16  ;;  %v6259_v16 = vld [vmem:[%s8881_s4 + $0x268] ss:$16 sps:$4 sm:$0xff]  }
 0x164   :  { %2653 = vmatprep.subr.bf16.mxu0 %v6171_v32  ;;  %v1632_v3 = vadd.f32 %v1631_v33, %v279_v35  ;;  %v6264_v32 = vld [vmem:[%s8881_s4 + $0x24c] ss:$16 sps:$4 sm:$0xff]   ;;  %v6262_v33 = vld [vmem:[%s8881_s4 + $0x248] ss:$16 sps:$4 sm:$0xff]  }
 0x165   :  { %v1633_v36 = vpop.f32.mrf.mxu1  ;;  %v6304_v35 = vld [vmem:[%s8883_s6 + $0xc8] ss:$16 sps:$4 sm:$0xff]  }
 0x166   :  { %v1634_v4 = vadd.f32 %v1633_v36, %v283_v2  ;;  %v6265_v36 = vld [vmem:[%s8881_s4 + $0x228] ss:$16 sps:$4 sm:$0xff]   ;;  %v6306_v2 = vld [vmem:[%s8883_s6 + $0xcc] ss:$16 sps:$4 sm:$0xff]  }
 0x167   :  { %v1635_v38 = vpop.f32.mrf.mxu1  ;;  %2654 = vmatpush1.bf16.msra.mxu0 %v6169_v34  ;;  %v6267_v34 = vld [vmem:[%s8881_s4 + $0x22c] ss:$16 sps:$4 sm:$0xff]  }
 0x168   :  { %2655 = vmatprep.subr.bf16.mxu0 %v6174_v37  ;;  %v6270_v37 = vld [vmem:[%s8881_s4 + $0x20c] ss:$16 sps:$4 sm:$0xff]   ;;  %v6268_v38 = vld [vmem:[%s8881_s4 + $0x208] ss:$16 sps:$4 sm:$0xff]  }
 0x169   :  { %v1636_v40 = vpop.f32.mrf.mxu1 }
 0x16a   :  { %v6271_v40 = vld [vmem:[%s8881_s4 + $0x3e8] ss:$16 sps:$4 sm:$0xff]  }
 0x16b   :  { %2656 = vmatpush1.bf16.msra.mxu0 %v6172_v39  ;;  %v6273_v39 = vld [vmem:[%s8881_s4 + $0x3ec] ss:$16 sps:$4 sm:$0xff]  }
 0x16c   :  { %2657 = vmatprep.subr.bf16.mxu0 %v6180_v41  ;;  %v6276_v41 = vld [vmem:[%s8881_s4 + $0x3cc] ss:$16 sps:$4 sm:$0xff]  }
 0x16f   :  { %2658 = vmatpush2.bf16.msra.mxu0 %v6178_v42  ;;  %v6274_v42 = vld [vmem:[%s8881_s4 + $0x3c8] ss:$16 sps:$4 sm:$0xff]  }
 0x170   :  { %2659 = vmatprep.subr.bf16.mxu0 %v6186_v43  ;;  %v6279_v43 = vld [vmem:[%s8881_s4 + $0x3ac] ss:$16 sps:$4 sm:$0xff]  }
 0x173   :  { %2660 = vmatpush2.bf16.msra.mxu0 %v6184_v45  ;;  %v6277_v45 = vld [vmem:[%s8881_s4 + $0x3a8] ss:$16 sps:$4 sm:$0xff]  }
 0x174   :  { %2661 = vmatprep.subr.bf16.mxu0 %v6192_v46  ;;  %v6282_v46 = vld [vmem:[%s8881_s4 + $0x38c] ss:$16 sps:$4 sm:$0xff]  }
 0x177   :  { %2662 = vmatpush2.bf16.msra.mxu0 %v6190_v48  ;;  %v6280_v48 = vld [vmem:[%s8881_s4 + $0x388] ss:$16 sps:$4 sm:$0xff]  }
 0x178   :  { %2663 = vmatprep.subr.bf16.mxu0 %v6198_v49  ;;  %v6285_v49 = vld [vmem:[%s8881_s4 + $0x36c] ss:$16 sps:$4 sm:$0xff]  }
 0x17b   :  { %2664 = vmatpush2.bf16.msra.mxu0 %v6196_v50  ;;  %v6283_v50 = vld [vmem:[%s8881_s4 + $0x368] ss:$16 sps:$4 sm:$0xff]  }
 0x17c   :  { %2665 = vmatprep.subr.bf16.mxu0 %v6204_v52  ;;  %v6288_v52 = vld [vmem:[%s8881_s4 + $0x34c] ss:$16 sps:$4 sm:$0xff]  }
 0x17f   :  { %2666 = vmatpush2.bf16.msra.mxu0 %v6202_v53  ;;  %v6286_v53 = vld [vmem:[%s8881_s4 + $0x348] ss:$16 sps:$4 sm:$0xff]  }
 0x180   :  { %2667 = vmatprep.subr.bf16.mxu0 %v6210_v54  ;;  %v6291_v54 = vld [vmem:[%s8881_s4 + $0x32c] ss:$16 sps:$4 sm:$0xff]  }
 0x182   :  { %v1672_v47 = vpop.f32.mrf.mxu0 }
 0x183   :  { %2668 = vmatpush2.bf16.msra.mxu0 %v6208_v55  ;;  %v1673_v5 = vadd.f32 %v1672_v47, %v1632_v3  ;;  %v6289_v55 = vld [vmem:[%s8881_s4 + $0x328] ss:$16 sps:$4 sm:$0xff]   ;;  %v6309_v3 = vld [vmem:[%s8883_s6 + $0xa4] ss:$16 sps:$4 sm:$0xff]  }
 0x184   :  { %v1674_v15 = vpop.f32.mrf.mxu0  ;;  %2669 = vmatprep.subr.bf16.mxu0 %v6216_v56  ;;  %v6294_v56 = vld [vmem:[%s8881_s4 + $0x30c] ss:$16 sps:$4 sm:$0xff]   ;;  %v6292_v47 = vld [vmem:[%s8881_s4 + $0x308] ss:$16 sps:$4 sm:$0xff]  }
 0x185   :  { %v1675_v10 = vadd.f32 %v1674_v15, %v1634_v4  ;;  %v6297_v15 = vld [vmem:[%s8883_s6 + $0xe4] ss:$16 sps:$4 sm:$0xff]   ;;  %v6307_v4 = vld [vmem:[%s8883_s6 + $0xa0] ss:$16 sps:$4 sm:$0xff]  }
 0x186   :  { %v1676_v58 = vpop.f32.mrf.mxu0 }
 0x187   :  { %2670 = vmatpush2.bf16.msra.mxu0 %v6214_v44  ;;  %v6295_v44 = vld [vmem:[%s8883_s6 + $0xe0] ss:$16 sps:$4 sm:$0xff]   ;;  %v6300_v58 = vld [vmem:[%s8883_s6 + $0xec] ss:$16 sps:$4 sm:$0xff]  }
 0x188   :  { %v1677_v6 = vpop.f32.mrf.mxu0  ;;  %2671 = vmatprep.subr.bf16.mxu0 %v6222_v57  ;;  %v6298_v57 = vld [vmem:[%s8883_s6 + $0xe8] ss:$16 sps:$4 sm:$0xff]  }
 0x189   :  { %v6303_v6 = vld [vmem:[%s8883_s6 + $0xc4] ss:$16 sps:$4 sm:$0xff]  }
 0x18b   :  { %2672 = vmatpush2.bf16.msra.mxu0 %v6220_v59  ;;  %v6301_v59 = vld [vmem:[%s8883_s6 + $0xc0] ss:$16 sps:$4 sm:$0xff]  }
 0x18c   :  { %3147 = vmatprep.subr.bf16.mxu0 %v6297_v15 }
 0x18e   :  { %2674 = vmatmul.mubr.bf16.vlgmr.msra.gmra.mxu0 %v7730_v21 }
 0x18f   :  { %3148 = vmatpush1.bf16.msra.mxu0 %v6295_v44  ;;  %v6376_v44 = vld [vmem:[%s8883_s6 + $0x148] ss:$16 sps:$4 sm:$0xff]  }
 0x190   :  { %3149 = vmatprep.subr.bf16.mxu0 %v6303_v6  ;;  %v6379_v6 = vld [vmem:[%s8883_s6 + $0x120] ss:$16 sps:$4 sm:$0xff]  }
 0x193   :  { %3150 = vmatpush1.bf16.msra.mxu0 %v6301_v59 }
 0x194   :  { %3151 = vmatprep.subr.bf16.mxu0 %v6309_v3  ;;  %v6387_v3 = vld [vmem:[%s8883_s6 + $0x104] ss:$16 sps:$4 sm:$0xff]  }
 0x197   :  { %3152 = vmatpush1.bf16.msra.mxu0 %v6307_v4  ;;  %v6390_v4 = vld [vmem:[%s8883_s6 + $0x10c] ss:$16 sps:$4 sm:$0xff]  }
 0x1a2   :  { %v1754_v9 = vpop.f32.mrf.mxu0 }
 0x1a3   :  { %v1713_v8 = vpop.f32.mrf.mxu1 }
 0x1a4   :  { %v1714_v11 = vadd.f32 %v1713_v8, %v1673_v5  ;;  %v1756_v13 = vpop.f32.mrf.mxu0  ;;  %v6312_v5 = vld [vmem:[%s8883_s6 + $0xac] ss:$16 sps:$4 sm:$0xff]   ;;  %v6310_v8 = vld [vmem:[%s8883_s6 + $0xa8] ss:$16 sps:$4 sm:$0xff]  }
 0x1a5   :  { %v1715_v12 = vpop.f32.mrf.mxu1 }
 0x1a6   :  { %v1755_v14 = vadd.f32 %v1754_v9, %v1714_v11  ;;  %v1716_v17 = vadd.f32 %v1715_v12, %v1675_v10  ;;  %v1758_v23 = vpop.f32.mrf.mxu0  ;;  %v6315_v9 = vld [vmem:[%s8883_s6 + $0x84] ss:$16 sps:$4 sm:$0xff]   ;;  %v6318_v10 = vld [vmem:[%s8883_s6 + $0x8c] ss:$16 sps:$4 sm:$0xff]   ;;  %v6313_v11 = vld [vmem:[%s8883_s6 + $0x80] ss:$16 sps:$4 sm:$0xff]  }
 0x1a7   :  { %v1717_v20 = vpop.f32.mrf.mxu1  ;;  %v6316_v12 = vld [vmem:[%s8883_s6 + $0x88] ss:$16 sps:$4 sm:$0xff]   ;;  %3153 = vmatprep.subr.bf16.mxu0 %v6315_v9 }
 0x1a8   :  { %v1757_v24 = vadd.f32 %v1756_v13, %v1716_v17  ;;  %v1763_v25 = vmax.f32 %v1755_v14, 0.0  ;;  %v1759_v18 = vpop.f32.mrf.mxu0  ;;  %v6321_v13 = vld [vmem:[%s8883_s6 + $0x64] ss:$16 sps:$4 sm:$0xff]   ;;  %v6324_v14 = vld [vmem:[%s8883_s6 + $0x6c] ss:$16 sps:$4 sm:$0xff]   ;;  %3154 = vmatpush1.bf16.msra.mxu0 %v6313_v11 }
 0x1a9   :  { %v1718_v26 = vpop.f32.mrf.mxu1  ;;  %v6319_v17 = vld [vmem:[%s8883_s6 + $0x60] ss:$16 sps:$4 sm:$0xff]   ;;  %v6322_v20 = vld [vmem:[%s8883_s6 + $0x68] ss:$16 sps:$4 sm:$0xff]   ;;  %3155 = vmatprep.subr.bf16.mxu0 %v6321_v13  ;;  %v6327_v18 = vld [vmem:[%s8883_s6 + $0x44] ss:$16 sps:$4 sm:$0xff]  }
 0x1aa   :  { %v1764_v21 = vmax.f32 %v1757_v24, 0.0  ;;  %v7837_v22 = vpack.c.bf16 %v1763_v25, %v1763_v25  ;;  %v6388_v9 = vld [vmem:[%s8883_s6 + $0x108] ss:$16 sps:$4 sm:$0xff]  }
 0x1ab   :  { %v6396_v11 = vld [vmem:[%s8884_s8 + $0x50c] ss:$28 sps:$4 sm:$0xff]  }
 0x1ac   :  { %v1768_v19 = vpack.c.bf16 %v1764_v21, %v1764_v21  ;;  %3156 = vmatpush1.bf16.msra.mxu0 %v6319_v17  ;;  %v6330_v21 = vld [vmem:[%s8883_s6 + $0x4c] ss:$16 sps:$4 sm:$0xff]  }
 0x1ad   :  { %3157 = vmatprep.subr.bf16.mxu0 %v6327_v18 }
 0x1ae   :  { %2632 = vmatprep.mubr.bf16.mxu1 %v1768_v19 }
 0x1af   :  { %2633 = vmatmul.mubr.bf16.vlgmr.msra.gmra.mxu1 %v7837_v22 }
 0x1b0   :  { %2683 = vmatpush1.bf16.msra.mxu1 %v6247_v0  ;;  %2714 = vmatprep.mubr.bf16.mxu1 %v1768_v19  ;;  %v6325_v19 = vld [vmem:[%s8883_s6 + $0x40] ss:$16 sps:$4 sm:$0xff]   ;;  %v6328_v0 = vld [vmem:[%s8883_s6 + $0x48] ss:$16 sps:$4 sm:$0xff]  }
 0x1b1   :  { %2684 = vmatprep.subr.bf16.mxu1 %v6252_v27  ;;  %3158 = vmatpush1.bf16.msra.mxu0 %v6325_v19  ;;  %v6336_v27 = vld [vmem:[%s8883_s6 + $0x2c] ss:$16 sps:$4 sm:$0xff]  }
 0x1b4   :  { %2685 = vmatpush1.bf16.msra.mxu1 %v6250_v51  ;;  %v6331_v51 = vld [vmem:[%s8883_s6 + $0x20] ss:$16 sps:$4 sm:$0xff]  }
 0x1b5   :  { %2686 = vmatprep.subr.bf16.mxu1 %v6255_v28  ;;  %v6334_v28 = vld [vmem:[%s8883_s6 + $0x28] ss:$16 sps:$4 sm:$0xff]  }
 0x1b8   :  { %2687 = vmatpush1.bf16.msra.mxu1 %v6253_v7  ;;  %v6339_v7 = vld [vmem:[%s8883_s6 + $0x4] ss:$16 sps:$4 sm:$0xff]  }
 0x1b9   :  { %2688 = vmatprep.subr.bf16.mxu1 %v6258_v29  ;;  %v6342_v29 = vld [vmem:[%s8883_s6 + $0xc] ss:$16 sps:$4 sm:$0xff]  }
 0x1bc   :  { %2689 = vmatpush1.bf16.msra.mxu1 %v6256_v30  ;;  %v6337_v30 = vld [vmem:[%s8883_s6] ss:$16 sps:$4 sm:$0xff]  }
 0x1bd   :  { %2690 = vmatprep.subr.bf16.mxu1 %v6261_v31  ;;  %v6340_v31 = vld [vmem:[%s8883_s6 + $0x8] ss:$16 sps:$4 sm:$0xff]  }
 0x1c0   :  { %2691 = vmatpush1.bf16.msra.mxu1 %v6259_v16  ;;  %v6345_v16 = vld [vmem:[%s8883_s6 + $0x1e4] ss:$16 sps:$4 sm:$0xff]  }
 0x1c1   :  { %2692 = vmatprep.subr.bf16.mxu1 %v6264_v32  ;;  %v6348_v32 = vld [vmem:[%s8883_s6 + $0x1ec] ss:$16 sps:$4 sm:$0xff]  }
 0x1c4   :  { %2693 = vmatpush1.bf16.msra.mxu1 %v6262_v33  ;;  %v6343_v33 = vld [vmem:[%s8883_s6 + $0x1e0] ss:$16 sps:$4 sm:$0xff]  }
 0x1c5   :  { %2694 = vmatprep.subr.bf16.mxu1 %v6267_v34  ;;  %v6346_v34 = vld [vmem:[%s8883_s6 + $0x1e8] ss:$16 sps:$4 sm:$0xff]  }
 0x1c8   :  { %2695 = vmatpush1.bf16.msra.mxu1 %v6265_v36  ;;  %v6351_v36 = vld [vmem:[%s8883_s6 + $0x1c4] ss:$16 sps:$4 sm:$0xff]  }
 0x1c9   :  { %2696 = vmatprep.subr.bf16.mxu1 %v6270_v37  ;;  %v6354_v37 = vld [vmem:[%s8883_s6 + $0x1cc] ss:$16 sps:$4 sm:$0xff]  }
 0x1cc   :  { %2697 = vmatpush1.bf16.msra.mxu1 %v6268_v38  ;;  %v6349_v38 = vld [vmem:[%s8883_s6 + $0x1c0] ss:$16 sps:$4 sm:$0xff]  }
 0x1cd   :  { %2698 = vmatprep.subr.bf16.mxu1 %v6273_v39  ;;  %v6352_v39 = vld [vmem:[%s8883_s6 + $0x1c8] ss:$16 sps:$4 sm:$0xff]  }
 0x1d0   :  { %2699 = vmatpush2.bf16.msra.mxu1 %v6271_v40  ;;  %v6357_v40 = vld [vmem:[%s8883_s6 + $0x1a4] ss:$16 sps:$4 sm:$0xff]  }
 0x1d1   :  { %2700 = vmatprep.subr.bf16.mxu1 %v6276_v41  ;;  %v6360_v41 = vld [vmem:[%s8883_s6 + $0x1ac] ss:$16 sps:$4 sm:$0xff]  }
 0x1d4   :  { %2701 = vmatpush2.bf16.msra.mxu1 %v6274_v42  ;;  %v6355_v42 = vld [vmem:[%s8883_s6 + $0x1a0] ss:$16 sps:$4 sm:$0xff]  }
 0x1d5   :  { %2702 = vmatprep.subr.bf16.mxu1 %v6279_v43  ;;  %v6358_v43 = vld [vmem:[%s8883_s6 + $0x1a8] ss:$16 sps:$4 sm:$0xff]  }
 0x1d8   :  { %2703 = vmatpush2.bf16.msra.mxu1 %v6277_v45  ;;  %v6363_v45 = vld [vmem:[%s8883_s6 + $0x184] ss:$16 sps:$4 sm:$0xff]  }
 0x1d9   :  { %2704 = vmatprep.subr.bf16.mxu1 %v6282_v46  ;;  %v6366_v46 = vld [vmem:[%s8883_s6 + $0x18c] ss:$16 sps:$4 sm:$0xff]  }
 0x1dc   :  { %2705 = vmatpush2.bf16.msra.mxu1 %v6280_v48  ;;  %v6361_v48 = vld [vmem:[%s8883_s6 + $0x180] ss:$16 sps:$4 sm:$0xff]  }
 0x1dd   :  { %2706 = vmatprep.subr.bf16.mxu1 %v6285_v49  ;;  %v6364_v49 = vld [vmem:[%s8883_s6 + $0x188] ss:$16 sps:$4 sm:$0xff]  }
 0x1e0   :  { %2707 = vmatpush2.bf16.msra.mxu1 %v6283_v50  ;;  %v6369_v50 = vld [vmem:[%s8883_s6 + $0x164] ss:$16 sps:$4 sm:$0xff]  }
 0x1e1   :  { %2708 = vmatprep.subr.bf16.mxu1 %v6288_v52  ;;  %v6372_v52 = vld [vmem:[%s8883_s6 + $0x16c] ss:$16 sps:$4 sm:$0xff]  }
 0x1e4   :  { %2709 = vmatpush2.bf16.msra.mxu1 %v6286_v53  ;;  %v6367_v53 = vld [vmem:[%s8883_s6 + $0x160] ss:$16 sps:$4 sm:$0xff]  }
 0x1e5   :  { %2710 = vmatprep.subr.bf16.mxu1 %v6291_v54  ;;  %v6370_v54 = vld [vmem:[%s8883_s6 + $0x168] ss:$16 sps:$4 sm:$0xff]  }
 0x1e8   :  { %2711 = vmatpush2.bf16.msra.mxu1 %v6289_v55  ;;  %v6375_v55 = vld [vmem:[%s8883_s6 + $0x144] ss:$16 sps:$4 sm:$0xff]  }
 0x1e9   :  { %2712 = vmatprep.subr.bf16.mxu1 %v6294_v56  ;;  %v6378_v56 = vld [vmem:[%s8883_s6 + $0x14c] ss:$16 sps:$4 sm:$0xff]  }
 0x1ec   :  { %2713 = vmatpush2.bf16.msra.mxu1 %v6292_v47  ;;  %v6373_v47 = vld [vmem:[%s8883_s6 + $0x140] ss:$16 sps:$4 sm:$0xff]  }
 0x1ed   :  { %3188 = vmatprep.subr.bf16.mxu1 %v6300_v58  ;;  %v6384_v58 = vld [vmem:[%s8883_s6 + $0x12c] ss:$16 sps:$4 sm:$0xff]  }
 0x1ef   :  { %2715 = vmatmul.mubr.bf16.vlgmr.msra.gmra.mxu1 %v7837_v22  ;;  %v6333_v22 = vld [vmem:[%s8883_s6 + $0x24] ss:$16 sps:$4 sm:$0xff]  }
 0x1f0   :  { %3189 = vmatpush1.bf16.msra.mxu1 %v6298_v57  ;;  %3159 = vmatprep.subr.bf16.mxu0 %v6333_v22  ;;  %v6381_v57 = vld [vmem:[%s8883_s6 + $0x124] ss:$16 sps:$4 sm:$0xff]  }
 0x1f1   :  { %3190 = vmatprep.subr.bf16.mxu1 %v6306_v2  ;;  %3160 = vmatpush1.bf16.msra.mxu0 %v6331_v51 }
 0x1f2   :  { %3161 = vmatprep.subr.bf16.mxu0 %v6339_v7 }
 0x1f4   :  { %3191 = vmatpush1.bf16.msra.mxu1 %v6304_v35  ;;  %v6382_v35 = vld [vmem:[%s8883_s6 + $0x128] ss:$16 sps:$4 sm:$0xff]  }
 0x1f5   :  { %3192 = vmatprep.subr.bf16.mxu1 %v6312_v5  ;;  %3162 = vmatpush1.bf16.msra.mxu0 %v6337_v30 }
 0x1f6   :  { %3163 = vmatprep.subr.bf16.mxu0 %v6345_v16 }
 0x1f8   :  { %3193 = vmatpush1.bf16.msra.mxu1 %v6310_v8  ;;  %v6385_v8 = vld [vmem:[%s8883_s6 + $0x100] ss:$16 sps:$4 sm:$0xff]  }
 0x1f9   :  { %3194 = vmatprep.subr.bf16.mxu1 %v6318_v10  ;;  %3164 = vmatpush2.bf16.msra.mxu0 %v6343_v33  ;;  %v6393_v10 = vld [vmem:[%s8884_s8 + $0x18c] ss:$28 sps:$4 sm:$0xff]  }
 0x1fa   :  { %3165 = vmatprep.subr.bf16.mxu0 %v6351_v36 }
 0x1fc   :  { %3195 = vmatpush1.bf16.msra.mxu1 %v6316_v12  ;;  %v1897_v12 = vld [vmem:[%s8885_s5] sm:$0xf] }
 0x1fd   :  { %3196 = vmatprep.subr.bf16.mxu1 %v6324_v14  ;;  %3166 = vmatpush2.bf16.msra.mxu0 %v6349_v38  ;;  %v1902_v13 = vrot.slane %v1897_v12, %v7709_v63  ;;  %v1906_v14 = vrot.slane %v1897_v12, %v7717_v1  ;;  %v1910_v22 = vrot.slane %v1897_v12, %v7825_v60 }
 0x1fe   :  { %3167 = vmatprep.subr.bf16.mxu0 %v6357_v40  ;;  %v2733_v40 = vld [vmem:[%s8887_s1] sm:$0xff] }
 0x200   :  { %3197 = vmatpush1.bf16.msra.mxu1 %v6322_v20 }
 0x201   :  { %3198 = vmatprep.subr.bf16.mxu1 %v6330_v21  ;;  %3168 = vmatpush2.bf16.msra.mxu0 %v6355_v42  ;;  %v2734_v42 = vld [vmem:[%s8887_s1 + $0x8] sm:$0xff] }
 0x202   :  { %3169 = vmatprep.subr.bf16.mxu0 %v6363_v45 }
 0x204   :  { %3199 = vmatpush1.bf16.msra.mxu1 %v6328_v0 }
 0x205   :  { %3200 = vmatprep.subr.bf16.mxu1 %v6336_v27  ;;  %3170 = vmatpush2.bf16.msra.mxu0 %v6361_v48 }
 0x206   :  { %3171 = vmatprep.subr.bf16.mxu0 %v6369_v50 }
 0x208   :  { %3201 = vmatpush1.bf16.msra.mxu1 %v6334_v28 }
 0x209   :  { %3202 = vmatprep.subr.bf16.mxu1 %v6342_v29  ;;  %3172 = vmatpush2.bf16.msra.mxu0 %v6367_v53  ;;  %v6394_v53 = vld [vmem:[%s8884_s8 + $0x508] ss:$28 sps:$4 sm:$0xff]  }
 0x20a   :  { %3173 = vmatprep.subr.bf16.mxu0 %v6375_v55  ;;  %v6399_v55 = vld [vmem:[%s8884_s8 + $0x154] ss:$28 sps:$4 sm:$0xff]  }
 0x20c   :  { %3203 = vmatpush1.bf16.msra.mxu1 %v6340_v31 }
 0x20d   :  { %3204 = vmatprep.subr.bf16.mxu1 %v6348_v32  ;;  %3174 = vmatpush2.bf16.msra.mxu0 %v6373_v47  ;;  %v6397_v47 = vld [vmem:[%s8884_s8 + $0x150] ss:$28 sps:$4 sm:$0xff]  }
 0x20e   :  { %v7991_v23 = vpop.f32.mrf.mxu0  ;;  %3175 = vmatprep.subr.bf16.mxu0 %v6381_v57  ;;  %v6408_v57 = vld [vmem:[%s8884_s8 + $0x49c] ss:$28 sps:$4 sm:$0xff]  }
 0x20f   :  { %v2594_v17 = vadd.f32 %v7991_v23, %v1902_v13  ;;  %v1914_v23 = vrot.slane %v1897_v12, %v7828_v61  ;;  %v6421_v12 = vld [vmem:[%s8884_s8 + $0x70] ss:$28 sps:$4 sm:$0xff]  }
 0x210   :  { %v7993_v24 = vpop.f32.mrf.mxu0  ;;  %3205 = vmatpush2.bf16.msra.mxu1 %v6346_v34  ;;  %v6424_v13 = vld [vmem:[%s8884_s8 + $0x3f0] ss:$28 sps:$4 sm:$0xff]  }
 0x211   :  { %3206 = vmatprep.subr.bf16.mxu1 %v6354_v37  ;;  %3176 = vmatpush2.bf16.msra.mxu0 %v6379_v6  ;;  %v6411_v6 = vld [vmem:[%s8884_s8 + $0xe4] ss:$28 sps:$4 sm:$0xff]  }
 0x212   :  { %v2597_v25 = vpop.f32.mrf.mxu0  ;;  %3177 = vmatprep.subr.bf16.mxu0 %v6387_v3  ;;  %v6412_v3 = vld [vmem:[%s8884_s8 + $0x460] ss:$28 sps:$4 sm:$0xff]  }
 0x213   :  { %v2596_v25 = vadd.f32 %v7993_v24, %v1906_v14  ;;  %v6429_v14 = vld [vmem:[%s8884_s8 + $0x3c] ss:$28 sps:$4 sm:$0xff]  }
 0x214   :  { %v2598_v26 = vpop.f32.mrf.mxu0  ;;  %3207 = vmatpush2.bf16.msra.mxu1 %v6352_v39 }
 0x215   :  { %3208 = vmatprep.subr.bf16.mxu1 %v6360_v41  ;;  %3178 = vmatpush2.bf16.msra.mxu0 %v6385_v8  ;;  %v6415_v8 = vld [vmem:[%s8884_s8 + $0xa8] ss:$28 sps:$4 sm:$0xff]  }
 0x216   :  { %4682 = vmatprep.subr.bf16.mxu0 %v6393_v10  ;;  %v6423_v10 = vld [vmem:[%s8884_s8 + $0x74] ss:$28 sps:$4 sm:$0xff]  }
 0x218   :  { %3209 = vmatpush2.bf16.msra.mxu1 %v6358_v43 }
 0x219   :  { %3210 = vmatprep.subr.bf16.mxu1 %v6366_v46 }
 0x21c   :  { %3211 = vmatpush2.bf16.msra.mxu1 %v6364_v49 }
 0x21d   :  { %3212 = vmatprep.subr.bf16.mxu1 %v6372_v52  ;;  %v6391_v52 = vld [vmem:[%s8884_s8 + $0x188] ss:$28 sps:$4 sm:$0xff]  }
 0x220   :  { %3213 = vmatpush2.bf16.msra.mxu1 %v6370_v54 }
 0x221   :  { %3214 = vmatprep.subr.bf16.mxu1 %v6378_v56  ;;  %v6402_v56 = vld [vmem:[%s8884_s8 + $0x4d4] ss:$28 sps:$4 sm:$0xff]  }
 0x224   :  { %3215 = vmatpush2.bf16.msra.mxu1 %v6376_v44  ;;  %v6400_v44 = vld [vmem:[%s8884_s8 + $0x4d0] ss:$28 sps:$4 sm:$0xff]  }
 0x225   :  { %3216 = vmatprep.subr.bf16.mxu1 %v6384_v58  ;;  %v6403_v58 = vld [vmem:[%s8884_s8 + $0x118] ss:$28 sps:$4 sm:$0xff]  }
 0x228   :  { %3217 = vmatpush2.bf16.msra.mxu1 %v6382_v35  ;;  %v6414_v35 = vld [vmem:[%s8884_s8 + $0x464] ss:$28 sps:$4 sm:$0xff]  }
 0x229   :  { %3218 = vmatprep.subr.bf16.mxu1 %v6390_v4  ;;  %v6417_v4 = vld [vmem:[%s8884_s8 + $0xac] ss:$28 sps:$4 sm:$0xff]  }
 0x22c   :  { %3219 = vmatpush2.bf16.msra.mxu1 %v6388_v9  ;;  %v6418_v9 = vld [vmem:[%s8884_s8 + $0x428] ss:$28 sps:$4 sm:$0xff]  }
 0x22d   :  { %4723 = vmatprep.subr.bf16.mxu1 %v6396_v11  ;;  %v6426_v11 = vld [vmem:[%s8884_s8 + $0x3f4] ss:$28 sps:$4 sm:$0xff]  }
 0x24e   :  { %v2675_v15 = vpop.f32.mrf.mxu0 }
 0x24f   :  { %v2676_v27 = vadd.f32 %v2675_v15, %v1910_v22  ;;  %v6405_v15 = vld [vmem:[%s8884_s8 + $0x11c] ss:$28 sps:$4 sm:$0xff]   ;;  %v6444_v22 = vld [vmem:[%s8884_s8 + $0x6cc] ss:$28 sps:$4 sm:$0xff]  }
 0x250   :  { %v2677_v59 = vpop.f32.mrf.mxu0 }
 0x251   :  { %v2678_v24 = vadd.f32 %v2677_v59, %v1914_v23  ;;  %v6406_v59 = vld [vmem:[%s8884_s8 + $0x498] ss:$28 sps:$4 sm:$0xff]   ;;  %v6439_v23 = vld [vmem:[%s8884_s8 + $0x348] ss:$28 sps:$4 sm:$0xff]  }
 0x252   :  { %v2679_v2 = vpop.f32.mrf.mxu0 }
 0x253   :  { %v6409_v2 = vld [vmem:[%s8884_s8 + $0xe0] ss:$28 sps:$4 sm:$0xff]  }
 0x254   :  { %v2680_v5 = vpop.f32.mrf.mxu0 }
 0x255   :  { %v6420_v5 = vld [vmem:[%s8884_s8 + $0x42c] ss:$28 sps:$4 sm:$0xff]  }
 0x26f   :  { %v2634_v20 = vpop.f32.mrf.mxu1 }
 0x270   :  { %v2635_v26 = vadd.f32 %v2634_v20, %v2594_v17  ;;  %v6432_v17 = vld [vmem:[%s8884_s8 + $0x3bc] ss:$28 sps:$4 sm:$0xff]  }
 0x271   :  { %v2636_v18 = vpop.f32.mrf.mxu1  ;;  %v6427_v20 = vld [vmem:[%s8884_s8 + $0x38] ss:$28 sps:$4 sm:$0xff]  }
 0x272   :  { %5048 = vst [vmem:[%s8886_s11] sm:$0xff] %v2635_v26  ;;  %v2637_v21 = vadd.f32 %v2636_v18, %v2596_v25  ;;  %v6430_v25 = vld [vmem:[%s8884_s8 + $0x3b8] ss:$28 sps:$4 sm:$0xff]   ;;  %v6438_v18 = vld [vmem:[%s8884_s8 + $0x384] ss:$28 sps:$4 sm:$0xff]  }
 0x273   :  { %v2638_v19 = vpop.f32.mrf.mxu1 }
 0x274   :  { %5049 = vst [vmem:[%s8886_s11 + $0x8] sm:$0xff] %v2637_v21  ;;  %v6436_v19 = vld [vmem:[%s8884_s8 + $0x380] ss:$28 sps:$4 sm:$0xff]  }
 0x275   :  { %v2639_v0 = vpop.f32.mrf.mxu1 }
 0x276   :  { %v6441_v0 = vld [vmem:[%s8884_s8 + $0x34c] ss:$28 sps:$4 sm:$0xff]  }
 0x2af   :  { %v2716_v51 = vpop.f32.mrf.mxu1 }
 0x2b0   :  { %v2717_v28 = vadd.f32 %v2716_v51, %v2676_v27  ;;  %v6442_v27 = vld [vmem:[%s8884_s8 + $0x6c8] ss:$28 sps:$4 sm:$0xff]   ;;  %v6447_v51 = vld [vmem:[%s8884_s8 + $0x314] ss:$28 sps:$4 sm:$0xff]  }
 0x2b1   :  { %v2718_v7 = vpop.f32.mrf.mxu1 }
 0x2b2   :  { %v2723_v29 = vmul.f32 -0.6931472, %v2717_v28  ;;  %5050 = vst [vmem:[%s8886_s11 + $0x10] sm:$0xff] %v2717_v28  ;;  %v2719_v30 = vadd.f32 %v2718_v7, %v2678_v24  ;;  %v6450_v24 = vld [vmem:[%s8884_s8 + $0x694] ss:$28 sps:$4 sm:$0xff]  }
 0x2b3   :  { %v2720_v31 = vpop.f32.mrf.mxu1  ;;  %v6445_v28 = vld [vmem:[%s8884_s8 + $0x310] ss:$28 sps:$4 sm:$0xff]  }
 0x2b4   :  { %v2725_v16 = vmul.f32 1.442695, %v2723_v29  ;;  %v2724_v32 = vmul.f32 -0.6931472, %v2719_v30  ;;  %5051 = vst [vmem:[%s8886_s11 + $0x18] sm:$0xff] %v2719_v30 }
 0x2b5   :  { %v2721_v33 = vpop.f32.mrf.mxu1  ;;  %v6448_v7 = vld [vmem:[%s8884_s8 + $0x690] ss:$28 sps:$4 sm:$0xff]   ;;  %v6453_v29 = vld [vmem:[%s8884_s8 + $0x2dc] ss:$28 sps:$4 sm:$0xff]  }
 0x2b6   :  { %6711 = vpow2.f32 %v2725_v16  ;;  %v2727_v34 = vmul.f32 1.442695, %v2724_v32  ;;  %v6456_v30 = vld [vmem:[%s8884_s8 + $0x65c] ss:$28 sps:$4 sm:$0xff]   ;;  %v6459_v32 = vld [vmem:[%s8884_s8 + $0x2a4] ss:$28 sps:$4 sm:$0xff]  }
 0x2b7   :  { %v6451_v31 = vld [vmem:[%s8884_s8 + $0x2d8] ss:$28 sps:$4 sm:$0xff]   ;;  %v6462_v33 = vld [vmem:[%s8884_s8 + $0x624] ss:$28 sps:$4 sm:$0xff]  }
 0x2b8   :  { %6713 = vpow2.f32 %v2727_v34  ;;  %v6454_v16 = vld [vmem:[%s8884_s8 + $0x658] ss:$28 sps:$4 sm:$0xff]   ;;  %v6457_v34 = vld [vmem:[%s8884_s8 + $0x2a0] ss:$28 sps:$4 sm:$0xff]  }
 0x2c3   :  { %v6712_v36 = vpop.eup %6711 }
 0x2c4   :  { %v2729_v37 = vmul.f32 1.442695, %v6712_v36  ;;  %v6460_v36 = vld [vmem:[%s8884_s8 + $0x620] ss:$28 sps:$4 sm:$0xff]  }
 0x2c5   :  { %v6714_v38 = vpop.eup %6713 }
 0x2c6   :  { %6715 = vpow2.f32 %v2729_v37  ;;  %v2731_v39 = vmul.f32 1.442695, %v6714_v38  ;;  %v6465_v37 = vld [vmem:[%s8884_s8 + $0x26c] ss:$28 sps:$4 sm:$0xff]  }
 0x2c7   :  { %v6468_v38 = vld [vmem:[%s8884_s8 + $0x5ec] ss:$28 sps:$4 sm:$0xff]  }
 0x2c8   :  { %6717 = vpow2.f32 %v2731_v39  ;;  %v6463_v39 = vld [vmem:[%s8884_s8 + $0x268] ss:$28 sps:$4 sm:$0xff]  }
 0x2d3   :  { %v6716_v41 = vpop.eup %6715 }
 0x2d4   :  { %v2735_v43 = vmul.f32 %v6716_v41, %v2733_v40  ;;  %v6466_v40 = vld [vmem:[%s8884_s8 + $0x5e8] ss:$28 sps:$4 sm:$0xff]   ;;  %v6471_v41 = vld [vmem:[%s8884_s8 + $0x234] ss:$28 sps:$4 sm:$0xff]  }
 0x2d5   :  { %v6718_v45 = vpop.eup %6717 }
 0x2d6   :  { %v2736_v46 = vmul.f32 %v6718_v45, %v2734_v42  ;;  %v2737_v48 = vadd.f32 %v2735_v43, %v2635_v26  ;;  %v6435_v26 = vld [vmem:[%s8884_s8 + $0x4] ss:$28 sps:$4 sm:$0xff]   ;;  %v6474_v42 = vld [vmem:[%s8884_s8 + $0x5b4] ss:$28 sps:$4 sm:$0xff]  }
 0x2d7   :  { %v6469_v43 = vld [vmem:[%s8884_s8 + $0x230] ss:$28 sps:$4 sm:$0xff]  }
 0x2d8   :  { %v2738_v49 = vadd.f32 %v2736_v46, %v2637_v21  ;;  %v2739_v54 = vpack.c.bf16 %v2737_v48, %v2737_v48  ;;  %v6433_v21 = vld [vmem:[%s8884_s8] ss:$28 sps:$4 sm:$0xff]   ;;  %v6472_v45 = vld [vmem:[%s8884_s8 + $0x5b0] ss:$28 sps:$4 sm:$0xff]  }
 0x2d9   :  { %v6477_v46 = vld [vmem:[%s8884_s8 + $0x1fc] ss:$28 sps:$4 sm:$0xff]  }
 0x2da   :  { %v2740_v50 = vpack.c.bf16 %v2738_v49, %v2738_v49  ;;  %v6480_v48 = vld [vmem:[%s8884_s8 + $0x57c] ss:$28 sps:$4 sm:$0xff]  }
 0x2db   :  { %v6475_v49 = vld [vmem:[%s8884_s8 + $0x1f8] ss:$28 sps:$4 sm:$0xff]  }
 0x2dc   :  { %3179 = vmatprep.mubr.bf16.mxu0 %v2740_v50  ;;  %3220 = vmatprep.mubr.bf16.mxu1 %v2740_v50  ;;  %v6478_v50 = vld [vmem:[%s8884_s8 + $0x578] ss:$28 sps:$4 sm:$0xff]  }
 0x2dd   :  { %3180 = vmatmul.mubr.bf16.vlgmr.msra.gmra.mxu0 %v2739_v54  ;;  %3221 = vmatmul.mubr.bf16.vlgmr.msra.gmra.mxu1 %v2739_v54  ;;  %v6481_v54 = vld [vmem:[%s8884_s8 + $0x1c0] ss:$28 sps:$4 sm:$0xff]  }
 0x2de   :  { %4683 = vmatpush1.bf16.msra.mxu0 %v6391_v52  ;;  %4724 = vmatpush1.bf16.msra.mxu1 %v6394_v53  ;;  %v6483_v52 = vld [vmem:[%s8884_s8 + $0x1c4] ss:$28 sps:$4 sm:$0xff]  }
 0x2df   :  { %4684 = vmatprep.subr.bf16.mxu0 %v6399_v55  ;;  %4725 = vmatprep.subr.bf16.mxu1 %v6402_v56  ;;  %v6486_v53 = vld [vmem:[%s8884_s8 + $0x544] ss:$28 sps:$4 sm:$0xff]   ;;  %v6489_v56 = vld [vmem:[%s8884_s8 + $0x194] ss:$28 sps:$4 sm:$0xff]  }
 0x2e0   :  { %v6484_v55 = vld [vmem:[%s8884_s8 + $0x540] ss:$28 sps:$4 sm:$0xff]  }
 0x2e2   :  { %4685 = vmatpush1.bf16.msra.mxu0 %v6397_v47  ;;  %4726 = vmatpush1.bf16.msra.mxu1 %v6400_v44  ;;  %v6492_v47 = vld [vmem:[%s8884_s8 + $0x514] ss:$28 sps:$4 sm:$0xff]   ;;  %v2805_v44 = vld [vmem:[%s8888_s7] sm:$0xf] }
 0x2e3   :  { %4686 = vmatprep.subr.bf16.mxu0 %v6405_v15  ;;  %4727 = vmatprep.subr.bf16.mxu1 %v6408_v57  ;;  %v2810_v15 = vrot.slane %v2805_v44, %v7709_v63  ;;  %v2818_v57 = vrot.slane %v2805_v44, %v7825_v60 }
 0x2e6   :  { %4687 = vmatpush1.bf16.msra.mxu0 %v6403_v58  ;;  %4728 = vmatpush1.bf16.msra.mxu1 %v6406_v59  ;;  %v2814_v58 = vrot.slane %v2805_v44, %v7717_v1  ;;  %v2822_v59 = vrot.slane %v2805_v44, %v7828_v61  ;;  %v6543_v44 = vld [vmem:[%s8884_s8 + $0x31c] ss:$28 sps:$4 sm:$0xff]  }
 0x2e7   :  { %4688 = vmatprep.subr.bf16.mxu0 %v6411_v6  ;;  %4729 = vmatprep.subr.bf16.mxu1 %v6414_v35 }
 0x2ea   :  { %4689 = vmatpush1.bf16.msra.mxu0 %v6409_v2  ;;  %4730 = vmatpush1.bf16.msra.mxu1 %v6412_v3 }
 0x2eb   :  { %4690 = vmatprep.subr.bf16.mxu0 %v6417_v4  ;;  %4731 = vmatprep.subr.bf16.mxu1 %v6420_v5 }
 0x2ee   :  { %4691 = vmatpush1.bf16.msra.mxu0 %v6415_v8  ;;  %4732 = vmatpush1.bf16.msra.mxu1 %v6418_v9 }
 0x2ef   :  { %4692 = vmatprep.subr.bf16.mxu0 %v6423_v10  ;;  %4733 = vmatprep.subr.bf16.mxu1 %v6426_v11 }
 0x2f2   :  { %4693 = vmatpush1.bf16.msra.mxu0 %v6421_v12  ;;  %4734 = vmatpush1.bf16.msra.mxu1 %v6424_v13 }
 0x2f3   :  { %4694 = vmatprep.subr.bf16.mxu0 %v6429_v14  ;;  %4735 = vmatprep.subr.bf16.mxu1 %v6432_v17 }
 0x2f6   :  { %4695 = vmatpush1.bf16.msra.mxu0 %v6427_v20  ;;  %4736 = vmatpush1.bf16.msra.mxu1 %v6430_v25 }
 0x2f7   :  { %4696 = vmatprep.subr.bf16.mxu0 %v6435_v26  ;;  %4737 = vmatprep.subr.bf16.mxu1 %v6438_v18 }
 0x2fa   :  { %4697 = vmatpush1.bf16.msra.mxu0 %v6433_v21  ;;  %4738 = vmatpush1.bf16.msra.mxu1 %v6436_v19  ;;  %v6487_v21 = vld [vmem:[%s8884_s8 + $0x190] ss:$28 sps:$4 sm:$0xff]  }
 0x2fb   :  { %4698 = vmatprep.subr.bf16.mxu0 %v6441_v0  ;;  %4739 = vmatprep.subr.bf16.mxu1 %v6444_v22  ;;  %v6490_v19 = vld [vmem:[%s8884_s8 + $0x510] ss:$28 sps:$4 sm:$0xff]  }
 0x2fe   :  { %4699 = vmatpush2.bf16.msra.mxu0 %v6439_v23  ;;  %4740 = vmatpush2.bf16.msra.mxu1 %v6442_v27  ;;  %v6495_v23 = vld [vmem:[%s8884_s8 + $0x15c] ss:$28 sps:$4 sm:$0xff]  }
 0x2ff   :  { %4700 = vmatprep.subr.bf16.mxu0 %v6447_v51  ;;  %4741 = vmatprep.subr.bf16.mxu1 %v6450_v24  ;;  %v6498_v27 = vld [vmem:[%s8884_s8 + $0x4dc] ss:$28 sps:$4 sm:$0xff]  }
 0x300   :  { %v6493_v51 = vld [vmem:[%s8884_s8 + $0x158] ss:$28 sps:$4 sm:$0xff]  }
 0x301   :  { %v6496_v24 = vld [vmem:[%s8884_s8 + $0x4d8] ss:$28 sps:$4 sm:$0xff]  }
 0x302   :  { %4701 = vmatpush2.bf16.msra.mxu0 %v6445_v28  ;;  %4742 = vmatpush2.bf16.msra.mxu1 %v6448_v7  ;;  %v6501_v28 = vld [vmem:[%s8884_s8 + $0x124] ss:$28 sps:$4 sm:$0xff]  }
 0x303   :  { %4702 = vmatprep.subr.bf16.mxu0 %v6453_v29  ;;  %4743 = vmatprep.subr.bf16.mxu1 %v6456_v30  ;;  %v6504_v7 = vld [vmem:[%s8884_s8 + $0x4a4] ss:$28 sps:$4 sm:$0xff]  }
 0x304   :  { %v6499_v29 = vld [vmem:[%s8884_s8 + $0x120] ss:$28 sps:$4 sm:$0xff]  }
 0x305   :  { %v6502_v30 = vld [vmem:[%s8884_s8 + $0x4a0] ss:$28 sps:$4 sm:$0xff]  }
 0x306   :  { %4703 = vmatpush2.bf16.msra.mxu0 %v6451_v31  ;;  %4744 = vmatpush2.bf16.msra.mxu1 %v6454_v16  ;;  %v6507_v31 = vld [vmem:[%s8884_s8 + $0xec] ss:$28 sps:$4 sm:$0xff]  }
 0x307   :  { %4704 = vmatprep.subr.bf16.mxu0 %v6459_v32  ;;  %4745 = vmatprep.subr.bf16.mxu1 %v6462_v33  ;;  %v6510_v16 = vld [vmem:[%s8884_s8 + $0x46c] ss:$28 sps:$4 sm:$0xff]  }
 0x308   :  { %v6505_v32 = vld [vmem:[%s8884_s8 + $0xe8] ss:$28 sps:$4 sm:$0xff]  }
 0x309   :  { %v6508_v33 = vld [vmem:[%s8884_s8 + $0x468] ss:$28 sps:$4 sm:$0xff]  }
 0x30a   :  { %4705 = vmatpush2.bf16.msra.mxu0 %v6457_v34  ;;  %4746 = vmatpush2.bf16.msra.mxu1 %v6460_v36  ;;  %v6513_v34 = vld [vmem:[%s8884_s8 + $0xb4] ss:$28 sps:$4 sm:$0xff]  }
 0x30b   :  { %4706 = vmatprep.subr.bf16.mxu0 %v6465_v37  ;;  %4747 = vmatprep.subr.bf16.mxu1 %v6468_v38  ;;  %v6516_v36 = vld [vmem:[%s8884_s8 + $0x434] ss:$28 sps:$4 sm:$0xff]  }
 0x30c   :  { %v6511_v37 = vld [vmem:[%s8884_s8 + $0xb0] ss:$28 sps:$4 sm:$0xff]  }
 0x30d   :  { %v6514_v38 = vld [vmem:[%s8884_s8 + $0x430] ss:$28 sps:$4 sm:$0xff]  }
 0x30e   :  { %4707 = vmatpush2.bf16.msra.mxu0 %v6463_v39  ;;  %4748 = vmatpush2.bf16.msra.mxu1 %v6466_v40  ;;  %v6519_v39 = vld [vmem:[%s8884_s8 + $0x7c] ss:$28 sps:$4 sm:$0xff]  }
 0x30f   :  { %4708 = vmatprep.subr.bf16.mxu0 %v6471_v41  ;;  %4749 = vmatprep.subr.bf16.mxu1 %v6474_v42  ;;  %v6522_v40 = vld [vmem:[%s8884_s8 + $0x3fc] ss:$28 sps:$4 sm:$0xff]  }
 0x310   :  { %v6517_v41 = vld [vmem:[%s8884_s8 + $0x78] ss:$28 sps:$4 sm:$0xff]  }
 0x311   :  { %v6520_v42 = vld [vmem:[%s8884_s8 + $0x3f8] ss:$28 sps:$4 sm:$0xff]  }
 0x312   :  { %4709 = vmatpush2.bf16.msra.mxu0 %v6469_v43  ;;  %4750 = vmatpush2.bf16.msra.mxu1 %v6472_v45  ;;  %v6525_v43 = vld [vmem:[%s8884_s8 + $0x44] ss:$28 sps:$4 sm:$0xff]  }
 0x313   :  { %4710 = vmatprep.subr.bf16.mxu0 %v6477_v46  ;;  %4751 = vmatprep.subr.bf16.mxu1 %v6480_v48  ;;  %v6528_v45 = vld [vmem:[%s8884_s8 + $0x3c4] ss:$28 sps:$4 sm:$0xff]  }
 0x314   :  { %v6523_v46 = vld [vmem:[%s8884_s8 + $0x40] ss:$28 sps:$4 sm:$0xff]  }
 0x315   :  { %v6526_v48 = vld [vmem:[%s8884_s8 + $0x3c0] ss:$28 sps:$4 sm:$0xff]  }
 0x316   :  { %4711 = vmatpush2.bf16.msra.mxu0 %v6475_v49  ;;  %4752 = vmatpush2.bf16.msra.mxu1 %v6478_v50  ;;  %v6531_v49 = vld [vmem:[%s8884_s8 + $0xc] ss:$28 sps:$4 sm:$0xff]  }
 0x317   :  { %4712 = vmatprep.subr.bf16.mxu0 %v6483_v52  ;;  %4753 = vmatprep.subr.bf16.mxu1 %v6486_v53  ;;  %v6534_v50 = vld [vmem:[%s8884_s8 + $0x38c] ss:$28 sps:$4 sm:$0xff]  }
 0x318   :  { %v6529_v52 = vld [vmem:[%s8884_s8 + $0x8] ss:$28 sps:$4 sm:$0xff]  }
 0x319   :  { %v6532_v53 = vld [vmem:[%s8884_s8 + $0x388] ss:$28 sps:$4 sm:$0xff]  }
 0x31a   :  { %4713 = vmatpush2.bf16.msra.mxu0 %v6481_v54  ;;  %4754 = vmatpush2.bf16.msra.mxu1 %v6484_v55  ;;  %v6537_v54 = vld [vmem:[%s8884_s8 + $0x354] ss:$28 sps:$4 sm:$0xff]  }
 0x31b   :  { %4764 = vmatprep.subr.bf16.mxu0 %v6489_v56  ;;  %4805 = vmatprep.subr.bf16.mxu1 %v6492_v47  ;;  %v6540_v55 = vld [vmem:[%s8884_s8 + $0x6d4] ss:$28 sps:$4 sm:$0xff]  }
 0x31c   :  { %v6535_v56 = vld [vmem:[%s8884_s8 + $0x350] ss:$28 sps:$4 sm:$0xff]  }
 0x31d   :  { %v6538_v47 = vld [vmem:[%s8884_s8 + $0x6d0] ss:$28 sps:$4 sm:$0xff]  }
 0x39d   :  { %v3181_v6 = vpop.f32.mrf.mxu0  ;;  %v3222_v35 = vpop.f32.mrf.mxu1 }
 0x39e   :  { %v3182_v2 = vadd.f32 %v3181_v6, %v2810_v15  ;;  %v3223_v3 = vadd.f32 %v3222_v35, %v2818_v57  ;;  %v6546_v15 = vld [vmem:[%s8884_s8 + $0x69c] ss:$28 sps:$4 sm:$0xff]   ;;  %v6552_v6 = vld [vmem:[%s8884_s8 + $0x664] ss:$28 sps:$4 sm:$0xff]  }
 0x39f   :  { %v3183_v4 = vpop.f32.mrf.mxu0  ;;  %v3224_v5 = vpop.f32.mrf.mxu1  ;;  %v6541_v57 = vld [vmem:[%s8884_s8 + $0x318] ss:$28 sps:$4 sm:$0xff]   ;;  %v6547_v35 = vld [vmem:[%s8884_s8 + $0x2e0] ss:$28 sps:$4 sm:$0xff]  }
 0x3a0   :  { %v3184_v8 = vadd.f32 %v3183_v4, %v2814_v58  ;;  %v3225_v9 = vadd.f32 %v3224_v5, %v2822_v59  ;;  %v3229_v10 = vmax.f32 %v3182_v2, 0.0  ;;  %v3231_v11 = vmax.f32 %v3223_v3, 0.0  ;;  %v6544_v58 = vld [vmem:[%s8884_s8 + $0x698] ss:$28 sps:$4 sm:$0xff]   ;;  %v6549_v59 = vld [vmem:[%s8884_s8 + $0x2e4] ss:$28 sps:$4 sm:$0xff]  }
 0x3a1   :  { %v3185_v12 = vpop.f32.mrf.mxu0  ;;  %v3226_v13 = vpop.f32.mrf.mxu1  ;;  %v6550_v2 = vld [vmem:[%s8884_s8 + $0x660] ss:$28 sps:$4 sm:$0xff]   ;;  %v6555_v3 = vld [vmem:[%s8884_s8 + $0x2ac] ss:$28 sps:$4 sm:$0xff]  }
 0x3a2   :  { %v3230_v14 = vmax.f32 %v3184_v8, 0.0  ;;  %v3232_v17 = vmax.f32 %v3225_v9, 0.0  ;;  %v8369_v0 = vpack.c.bf16 %v3229_v10, %v3229_v10  ;;  %v8371_v22 = vpack.c.bf16 %v3231_v11, %v3231_v11  ;;  %v6558_v4 = vld [vmem:[%s8884_s8 + $0x62c] ss:$28 sps:$4 sm:$0xff]   ;;  %v6561_v9 = vld [vmem:[%s8884_s8 + $0x274] ss:$28 sps:$4 sm:$0xff]  }
 0x3a3   :  { %v3186_v20 = vpop.f32.mrf.mxu0  ;;  %v3227_v25 = vpop.f32.mrf.mxu1  ;;  %v6553_v5 = vld [vmem:[%s8884_s8 + $0x2a8] ss:$28 sps:$4 sm:$0xff]   ;;  %v6564_v10 = vld [vmem:[%s8884_s8 + $0x5f4] ss:$28 sps:$4 sm:$0xff]   ;;  %v6567_v13 = vld [vmem:[%s8884_s8 + $0x23c] ss:$28 sps:$4 sm:$0xff]  }
 0x3a4   :  { %v8359_v26 = vpack.c.bf16 %v3230_v14, %v3230_v14  ;;  %v8361_v18 = vpack.c.bf16 %v3232_v17, %v3232_v17  ;;  %v6556_v8 = vld [vmem:[%s8884_s8 + $0x628] ss:$28 sps:$4 sm:$0xff]   ;;  %v6559_v11 = vld [vmem:[%s8884_s8 + $0x270] ss:$28 sps:$4 sm:$0xff]   ;;  %v6570_v14 = vld [vmem:[%s8884_s8 + $0x5bc] ss:$28 sps:$4 sm:$0xff]  }
 0x3a5   :  { %v6562_v12 = vld [vmem:[%s8884_s8 + $0x5f0] ss:$28 sps:$4 sm:$0xff]   ;;  %v6565_v17 = vld [vmem:[%s8884_s8 + $0x238] ss:$28 sps:$4 sm:$0xff]   ;;  %v6573_v25 = vld [vmem:[%s8884_s8 + $0x204] ss:$28 sps:$4 sm:$0xff]  }
 0x3a6   :  { %4714 = vmatprep.mubr.bf16.mxu0 %v8359_v26  ;;  %4755 = vmatprep.mubr.bf16.mxu1 %v8361_v18  ;;  %v6568_v20 = vld [vmem:[%s8884_s8 + $0x5b8] ss:$28 sps:$4 sm:$0xff]  }
 0x3a7   :  { %4715 = vmatmul.mubr.bf16.vlgmr.msra.gmra.mxu0 %v8369_v0  ;;  %4756 = vmatmul.mubr.bf16.vlgmr.msra.gmra.mxu1 %v8371_v22 }
 0x3a8   :  { %4765 = vmatpush1.bf16.msra.mxu0 %v6487_v21  ;;  %4806 = vmatpush1.bf16.msra.mxu1 %v6490_v19  ;;  %v6576_v21 = vld [vmem:[%s8884_s8 + $0x584] ss:$28 sps:$4 sm:$0xff]  }
 0x3a9   :  { %4796 = vmatprep.mubr.bf16.mxu0 %v8359_v26  ;;  %4837 = vmatprep.mubr.bf16.mxu1 %v8361_v18  ;;  %v6571_v19 = vld [vmem:[%s8884_s8 + $0x200] ss:$28 sps:$4 sm:$0xff]  }
 0x3aa   :  { %4766 = vmatprep.subr.bf16.mxu0 %v6495_v23  ;;  %4807 = vmatprep.subr.bf16.mxu1 %v6498_v27  ;;  %v6574_v23 = vld [vmem:[%s8884_s8 + $0x580] ss:$28 sps:$4 sm:$0xff]   ;;  %v6579_v27 = vld [vmem:[%s8884_s8 + $0x1cc] ss:$28 sps:$4 sm:$0xff]  }
 0x3ac   :  { %4767 = vmatpush1.bf16.msra.mxu0 %v6493_v51  ;;  %4808 = vmatpush1.bf16.msra.mxu1 %v6496_v24  ;;  %v6582_v51 = vld [vmem:[%s8884_s8 + $0x54c] ss:$28 sps:$4 sm:$0xff]  }
 0x3ad   :  { %4768 = vmatprep.subr.bf16.mxu0 %v6501_v28  ;;  %4809 = vmatprep.subr.bf16.mxu1 %v6504_v7  ;;  %v6577_v24 = vld [vmem:[%s8884_s8 + $0x1c8] ss:$28 sps:$4 sm:$0xff]   ;;  %v6585_v7 = vld [vmem:[%s8884_s8 + $0x19c] ss:$28 sps:$4 sm:$0xff]  }
 0x3ae   :  { %v6580_v28 = vld [vmem:[%s8884_s8 + $0x548] ss:$28 sps:$4 sm:$0xff]  }
 0x3b0   :  { %4769 = vmatpush1.bf16.msra.mxu0 %v6499_v29  ;;  %4810 = vmatpush1.bf16.msra.mxu1 %v6502_v30  ;;  %v6588_v29 = vld [vmem:[%s8884_s8 + $0x51c] ss:$28 sps:$4 sm:$0xff]  }
 0x3b1   :  { %4770 = vmatprep.subr.bf16.mxu0 %v6507_v31  ;;  %4811 = vmatprep.subr.bf16.mxu1 %v6510_v16  ;;  %v6583_v30 = vld [vmem:[%s8884_s8 + $0x198] ss:$28 sps:$4 sm:$0xff]   ;;  %v6591_v16 = vld [vmem:[%s8884_s8 + $0x164] ss:$28 sps:$4 sm:$0xff]  }
 0x3b2   :  { %v6586_v31 = vld [vmem:[%s8884_s8 + $0x518] ss:$28 sps:$4 sm:$0xff]  }
 0x3b4   :  { %4771 = vmatpush1.bf16.msra.mxu0 %v6505_v32  ;;  %4812 = vmatpush1.bf16.msra.mxu1 %v6508_v33  ;;  %v6594_v32 = vld [vmem:[%s8884_s8 + $0x4e4] ss:$28 sps:$4 sm:$0xff]  }
 0x3b5   :  { %4772 = vmatprep.subr.bf16.mxu0 %v6513_v34  ;;  %4813 = vmatprep.subr.bf16.mxu1 %v6516_v36  ;;  %v6589_v33 = vld [vmem:[%s8884_s8 + $0x160] ss:$28 sps:$4 sm:$0xff]   ;;  %v6597_v36 = vld [vmem:[%s8884_s8 + $0x12c] ss:$28 sps:$4 sm:$0xff]  }
 0x3b6   :  { %v6592_v34 = vld [vmem:[%s8884_s8 + $0x4e0] ss:$28 sps:$4 sm:$0xff]  }
 0x3b8   :  { %4773 = vmatpush1.bf16.msra.mxu0 %v6511_v37  ;;  %4814 = vmatpush1.bf16.msra.mxu1 %v6514_v38  ;;  %v6600_v37 = vld [vmem:[%s8884_s8 + $0x4ac] ss:$28 sps:$4 sm:$0xff]  }
 0x3b9   :  { %4774 = vmatprep.subr.bf16.mxu0 %v6519_v39  ;;  %4815 = vmatprep.subr.bf16.mxu1 %v6522_v40  ;;  %v6595_v38 = vld [vmem:[%s8884_s8 + $0x128] ss:$28 sps:$4 sm:$0xff]   ;;  %v6603_v40 = vld [vmem:[%s8884_s8 + $0xf4] ss:$28 sps:$4 sm:$0xff]  }
 0x3ba   :  { %v6598_v39 = vld [vmem:[%s8884_s8 + $0x4a8] ss:$28 sps:$4 sm:$0xff]  }
 0x3bc   :  { %4775 = vmatpush1.bf16.msra.mxu0 %v6517_v41  ;;  %4816 = vmatpush1.bf16.msra.mxu1 %v6520_v42  ;;  %v6606_v41 = vld [vmem:[%s8884_s8 + $0x474] ss:$28 sps:$4 sm:$0xff]  }
 0x3bd   :  { %4776 = vmatprep.subr.bf16.mxu0 %v6525_v43  ;;  %4817 = vmatprep.subr.bf16.mxu1 %v6528_v45  ;;  %v6601_v42 = vld [vmem:[%s8884_s8 + $0xf0] ss:$28 sps:$4 sm:$0xff]   ;;  %v6609_v45 = vld [vmem:[%s8884_s8 + $0xbc] ss:$28 sps:$4 sm:$0xff]  }
 0x3be   :  { %v6604_v43 = vld [vmem:[%s8884_s8 + $0x470] ss:$28 sps:$4 sm:$0xff]  }
 0x3c0   :  { %4777 = vmatpush1.bf16.msra.mxu0 %v6523_v46  ;;  %4818 = vmatpush1.bf16.msra.mxu1 %v6526_v48  ;;  %v6612_v46 = vld [vmem:[%s8884_s8 + $0x43c] ss:$28 sps:$4 sm:$0xff]  }
 0x3c1   :  { %4778 = vmatprep.subr.bf16.mxu0 %v6531_v49  ;;  %4819 = vmatprep.subr.bf16.mxu1 %v6534_v50  ;;  %v6607_v48 = vld [vmem:[%s8884_s8 + $0xb8] ss:$28 sps:$4 sm:$0xff]   ;;  %v6615_v50 = vld [vmem:[%s8884_s8 + $0x84] ss:$28 sps:$4 sm:$0xff]  }
 0x3c2   :  { %v6610_v49 = vld [vmem:[%s8884_s8 + $0x438] ss:$28 sps:$4 sm:$0xff]  }
 0x3c4   :  { %4779 = vmatpush1.bf16.msra.mxu0 %v6529_v52  ;;  %4820 = vmatpush1.bf16.msra.mxu1 %v6532_v53  ;;  %v6618_v52 = vld [vmem:[%s8884_s8 + $0x404] ss:$28 sps:$4 sm:$0xff]  }
 0x3c5   :  { %4780 = vmatprep.subr.bf16.mxu0 %v6537_v54  ;;  %4821 = vmatprep.subr.bf16.mxu1 %v6540_v55  ;;  %v6613_v53 = vld [vmem:[%s8884_s8 + $0x80] ss:$28 sps:$4 sm:$0xff]   ;;  %v6621_v55 = vld [vmem:[%s8884_s8 + $0x4c] ss:$28 sps:$4 sm:$0xff]  }
 0x3c6   :  { %v6616_v54 = vld [vmem:[%s8884_s8 + $0x400] ss:$28 sps:$4 sm:$0xff]  }
 0x3c8   :  { %4781 = vmatpush2.bf16.msra.mxu0 %v6535_v56  ;;  %4822 = vmatpush2.bf16.msra.mxu1 %v6538_v47  ;;  %v6624_v56 = vld [vmem:[%s8884_s8 + $0x3cc] ss:$28 sps:$4 sm:$0xff]  }
 0x3c9   :  { %4782 = vmatprep.subr.bf16.mxu0 %v6543_v44  ;;  %4823 = vmatprep.subr.bf16.mxu1 %v6546_v15  ;;  %v6619_v47 = vld [vmem:[%s8884_s8 + $0x48] ss:$28 sps:$4 sm:$0xff]   ;;  %v6627_v15 = vld [vmem:[%s8884_s8 + $0x14] ss:$28 sps:$4 sm:$0xff]  }
 0x3ca   :  { %v6622_v44 = vld [vmem:[%s8884_s8 + $0x3c8] ss:$28 sps:$4 sm:$0xff]  }
 0x3cc   :  { %4783 = vmatpush2.bf16.msra.mxu0 %v6541_v57  ;;  %4824 = vmatpush2.bf16.msra.mxu1 %v6544_v58  ;;  %v6630_v57 = vld [vmem:[%s8884_s8 + $0x394] ss:$28 sps:$4 sm:$0xff]  }
 0x3cd   :  { %4784 = vmatprep.subr.bf16.mxu0 %v6549_v59  ;;  %4825 = vmatprep.subr.bf16.mxu1 %v6552_v6  ;;  %v6625_v58 = vld [vmem:[%s8884_s8 + $0x10] ss:$28 sps:$4 sm:$0xff]   ;;  %v6633_v6 = vld [vmem:[%s8884_s8 + $0x35c] ss:$28 sps:$4 sm:$0xff]  }
 0x3ce   :  { %v6628_v59 = vld [vmem:[%s8884_s8 + $0x390] ss:$28 sps:$4 sm:$0xff]  }
 0x3d0   :  { %4785 = vmatpush2.bf16.msra.mxu0 %v6547_v35  ;;  %4826 = vmatpush2.bf16.msra.mxu1 %v6550_v2  ;;  %v6636_v35 = vld [vmem:[%s8884_s8 + $0x6dc] ss:$28 sps:$4 sm:$0xff]  }
 0x3d1   :  { %4786 = vmatprep.subr.bf16.mxu0 %v6555_v3  ;;  %4827 = vmatprep.subr.bf16.mxu1 %v6558_v4  ;;  %v6631_v2 = vld [vmem:[%s8884_s8 + $0x358] ss:$28 sps:$4 sm:$0xff]   ;;  %v6639_v4 = vld [vmem:[%s8884_s8 + $0x324] ss:$28 sps:$4 sm:$0xff]  }
 0x3d2   :  { %v6634_v3 = vld [vmem:[%s8884_s8 + $0x6d8] ss:$28 sps:$4 sm:$0xff]  }
 0x3d4   :  { %4787 = vmatpush2.bf16.msra.mxu0 %v6553_v5  ;;  %4828 = vmatpush2.bf16.msra.mxu1 %v6556_v8  ;;  %v6642_v5 = vld [vmem:[%s8884_s8 + $0x6a4] ss:$28 sps:$4 sm:$0xff]  }
 0x3d5   :  { %4788 = vmatprep.subr.bf16.mxu0 %v6561_v9  ;;  %4829 = vmatprep.subr.bf16.mxu1 %v6564_v10  ;;  %v6637_v8 = vld [vmem:[%s8884_s8 + $0x320] ss:$28 sps:$4 sm:$0xff]   ;;  %v6645_v10 = vld [vmem:[%s8884_s8 + $0x2ec] ss:$28 sps:$4 sm:$0xff]  }
 0x3d6   :  { %v6640_v9 = vld [vmem:[%s8884_s8 + $0x6a0] ss:$28 sps:$4 sm:$0xff]  }
 0x3d8   :  { %4789 = vmatpush2.bf16.msra.mxu0 %v6559_v11  ;;  %4830 = vmatpush2.bf16.msra.mxu1 %v6562_v12  ;;  %v6648_v11 = vld [vmem:[%s8884_s8 + $0x66c] ss:$28 sps:$4 sm:$0xff]  }
 0x3d9   :  { %4790 = vmatprep.subr.bf16.mxu0 %v6567_v13  ;;  %4831 = vmatprep.subr.bf16.mxu1 %v6570_v14  ;;  %v6643_v12 = vld [vmem:[%s8884_s8 + $0x2e8] ss:$28 sps:$4 sm:$0xff]   ;;  %v6651_v14 = vld [vmem:[%s8884_s8 + $0x2b4] ss:$28 sps:$4 sm:$0xff]  }
 0x3da   :  { %v6646_v13 = vld [vmem:[%s8884_s8 + $0x668] ss:$28 sps:$4 sm:$0xff]  }
 0x3dc   :  { %4791 = vmatpush2.bf16.msra.mxu0 %v6565_v17  ;;  %4832 = vmatpush2.bf16.msra.mxu1 %v6568_v20  ;;  %v6654_v17 = vld [vmem:[%s8884_s8 + $0x634] ss:$28 sps:$4 sm:$0xff]  }
 0x3dd   :  { %4792 = vmatprep.subr.bf16.mxu0 %v6573_v25  ;;  %4833 = vmatprep.subr.bf16.mxu1 %v6576_v21  ;;  %v6649_v20 = vld [vmem:[%s8884_s8 + $0x2b0] ss:$28 sps:$4 sm:$0xff]   ;;  %v6657_v21 = vld [vmem:[%s8884_s8 + $0x27c] ss:$28 sps:$4 sm:$0xff]  }
 0x3de   :  { %v6652_v25 = vld [vmem:[%s8884_s8 + $0x630] ss:$28 sps:$4 sm:$0xff]  }
 0x3e0   :  { %4793 = vmatpush2.bf16.msra.mxu0 %v6571_v19  ;;  %4834 = vmatpush2.bf16.msra.mxu1 %v6574_v23  ;;  %v6660_v19 = vld [vmem:[%s8884_s8 + $0x5fc] ss:$28 sps:$4 sm:$0xff]  }
 0x3e1   :  { %4794 = vmatprep.subr.bf16.mxu0 %v6579_v27  ;;  %4835 = vmatprep.subr.bf16.mxu1 %v6582_v51  ;;  %v6655_v23 = vld [vmem:[%s8884_s8 + $0x278] ss:$28 sps:$4 sm:$0xff]   ;;  %v6663_v51 = vld [vmem:[%s8884_s8 + $0x244] ss:$28 sps:$4 sm:$0xff]  }
 0x3e2   :  { %v6658_v27 = vld [vmem:[%s8884_s8 + $0x5f8] ss:$28 sps:$4 sm:$0xff]  }
 0x3e4   :  { %4795 = vmatpush2.bf16.msra.mxu0 %v6577_v24  ;;  %4836 = vmatpush2.bf16.msra.mxu1 %v6580_v28  ;;  %v6666_v24 = vld [vmem:[%s8884_s8 + $0x5c4] ss:$28 sps:$4 sm:$0xff]  }
 0x3e5   :  { %4846 = vmatprep.subr.bf16.mxu0 %v6585_v7  ;;  %4887 = vmatprep.subr.bf16.mxu1 %v6588_v29  ;;  %v6661_v28 = vld [vmem:[%s8884_s8 + $0x240] ss:$28 sps:$4 sm:$0xff]   ;;  %v6669_v29 = vld [vmem:[%s8884_s8 + $0x20c] ss:$28 sps:$4 sm:$0xff]  }
 0x3e6   :  { %v6664_v7 = vld [vmem:[%s8884_s8 + $0x5c0] ss:$28 sps:$4 sm:$0xff]  }
 0x3e7   :  { %4797 = vmatmul.mubr.bf16.vlgmr.msra.gmra.mxu0 %v8369_v0  ;;  %4838 = vmatmul.mubr.bf16.vlgmr.msra.gmra.mxu1 %v8371_v22 }
 0x3e8   :  { %4847 = vmatpush1.bf16.msra.mxu0 %v6583_v30  ;;  %4878 = vmatprep.mubr.bf16.mxu0 %v8359_v26  ;;  %v6672_v30 = vld [vmem:[%s8884_s8 + $0x58c] ss:$28 sps:$4 sm:$0xff]  }
 0x3e9   :  { %4888 = vmatpush1.bf16.msra.mxu1 %v6586_v31  ;;  %4919 = vmatprep.mubr.bf16.mxu1 %v8361_v18  ;;  %v6667_v31 = vld [vmem:[%s8884_s8 + $0x208] ss:$28 sps:$4 sm:$0xff]  }
 0x3ea   :  { %4848 = vmatprep.subr.bf16.mxu0 %v6591_v16  ;;  %4889 = vmatprep.subr.bf16.mxu1 %v6594_v32  ;;  %v6670_v16 = vld [vmem:[%s8884_s8 + $0x588] ss:$28 sps:$4 sm:$0xff]   ;;  %v6675_v32 = vld [vmem:[%s8884_s8 + $0x1d4] ss:$28 sps:$4 sm:$0xff]  }
 0x3ec   :  { %4849 = vmatpush1.bf16.msra.mxu0 %v6589_v33  ;;  %v6678_v33 = vld [vmem:[%s8884_s8 + $0x554] ss:$28 sps:$4 sm:$0xff]  }
 0x3ed   :  { %4890 = vmatpush1.bf16.msra.mxu1 %v6592_v34  ;;  %4850 = vmatprep.subr.bf16.mxu0 %v6597_v36  ;;  %v6673_v34 = vld [vmem:[%s8884_s8 + $0x1d0] ss:$28 sps:$4 sm:$0xff]  }
 0x3ee   :  { %4891 = vmatprep.subr.bf16.mxu1 %v6600_v37  ;;  %v6676_v36 = vld [vmem:[%s8884_s8 + $0x550] ss:$28 sps:$4 sm:$0xff]   ;;  %v6679_v37 = vld [vmem:[%s8884_s8 + $0x360] ss:$28 sps:$4 sm:$0xff]  }
 0x3f0   :  { %4851 = vmatpush1.bf16.msra.mxu0 %v6595_v38  ;;  %v6680_v38 = vld [vmem:[%s8884_s8 + $0x6e0] ss:$28 sps:$4 sm:$0xff]  }
 0x3f1   :  { %4892 = vmatpush1.bf16.msra.mxu1 %v6598_v39  ;;  %4852 = vmatprep.subr.bf16.mxu0 %v6603_v40  ;;  %v6681_v39 = vld [vmem:[%s8884_s8 + $0x1a0] ss:$28 sps:$4 sm:$0xff]  }
 0x3f2   :  { %4893 = vmatprep.subr.bf16.mxu1 %v6606_v41  ;;  %v6682_v40 = vld [vmem:[%s8884_s8 + $0x520] ss:$28 sps:$4 sm:$0xff]   ;;  %v6683_v41 = vld [vmem:[%s8884_s8 + $0x328] ss:$28 sps:$4 sm:$0xff]  }
 0x3f4   :  { %4853 = vmatpush1.bf16.msra.mxu0 %v6601_v42  ;;  %v6684_v42 = vld [vmem:[%s8884_s8 + $0x6a8] ss:$28 sps:$4 sm:$0xff]  }
 0x3f5   :  { %4894 = vmatpush1.bf16.msra.mxu1 %v6604_v43  ;;  %4854 = vmatprep.subr.bf16.mxu0 %v6609_v45  ;;  %v6685_v43 = vld [vmem:[%s8884_s8 + $0x168] ss:$28 sps:$4 sm:$0xff]  }
 0x3f6   :  { %4895 = vmatprep.subr.bf16.mxu1 %v6612_v46  ;;  %v6686_v45 = vld [vmem:[%s8884_s8 + $0x4e8] ss:$28 sps:$4 sm:$0xff]   ;;  %v6687_v46 = vld [vmem:[%s8884_s8 + $0x2f0] ss:$28 sps:$4 sm:$0xff]  }
 0x3f8   :  { %4855 = vmatpush1.bf16.msra.mxu0 %v6607_v48  ;;  %v6688_v48 = vld [vmem:[%s8884_s8 + $0x670] ss:$28 sps:$4 sm:$0xff]  }
 0x3f9   :  { %4896 = vmatpush1.bf16.msra.mxu1 %v6610_v49  ;;  %4856 = vmatprep.subr.bf16.mxu0 %v6615_v50  ;;  %v6690_v49 = vld [vmem:[%s8884_s8 + $0x4b0] ss:$28 sps:$4 sm:$0xff]   ;;  %v6692_v50 = vld [vmem:[%s8884_s8 + $0x638] ss:$28 sps:$4 sm:$0xff]  }
 0x3fa   :  { %4897 = vmatprep.subr.bf16.mxu1 %v6618_v52  ;;  %v6693_v52 = vld [vmem:[%s8884_s8 + $0xf8] ss:$28 sps:$4 sm:$0xff]  }
 0x3fc   :  { %4857 = vmatpush1.bf16.msra.mxu0 %v6613_v53  ;;  %v6694_v53 = vld [vmem:[%s8884_s8 + $0x478] ss:$28 sps:$4 sm:$0xff]  }
 0x3fd   :  { %4898 = vmatpush1.bf16.msra.mxu1 %v6616_v54  ;;  %4858 = vmatprep.subr.bf16.mxu0 %v6621_v55  ;;  %v6695_v54 = vld [vmem:[%s8884_s8 + $0x280] ss:$28 sps:$4 sm:$0xff]  }
 0x3fe   :  { %4899 = vmatprep.subr.bf16.mxu1 %v6624_v56  ;;  %v6696_v55 = vld [vmem:[%s8884_s8 + $0x600] ss:$28 sps:$4 sm:$0xff]  }
 0x3ff   :  { %v6697_v56 = vld [vmem:[%s8884_s8 + $0xc0] ss:$28 sps:$4 sm:$0xff]  }
 0x400   :  { %4859 = vmatpush1.bf16.msra.mxu0 %v6619_v47  ;;  %v6698_v47 = vld [vmem:[%s8884_s8 + $0x440] ss:$28 sps:$4 sm:$0xff]  }
 0x401   :  { %4900 = vmatpush1.bf16.msra.mxu1 %v6622_v44  ;;  %4860 = vmatprep.subr.bf16.mxu0 %v6627_v15  ;;  %v6699_v44 = vld [vmem:[%s8884_s8 + $0x248] ss:$28 sps:$4 sm:$0xff]  }
 0x402   :  { %4901 = vmatprep.subr.bf16.mxu1 %v6630_v57  ;;  %v6700_v15 = vld [vmem:[%s8884_s8 + $0x5c8] ss:$28 sps:$4 sm:$0xff]  }
 0x403   :  { %v6701_v57 = vld [vmem:[%s8884_s8 + $0x88] ss:$28 sps:$4 sm:$0xff]  }
 0x404   :  { %4861 = vmatpush1.bf16.msra.mxu0 %v6625_v58  ;;  %v6702_v58 = vld [vmem:[%s8884_s8 + $0x408] ss:$28 sps:$4 sm:$0xff]  }
 0x405   :  { %4902 = vmatpush1.bf16.msra.mxu1 %v6628_v59  ;;  %4862 = vmatprep.subr.bf16.mxu0 %v6633_v6  ;;  %v6703_v59 = vld [vmem:[%s8884_s8 + $0x210] ss:$28 sps:$4 sm:$0xff]  }
 0x406   :  { %4903 = vmatprep.subr.bf16.mxu1 %v6636_v35  ;;  %v6704_v6 = vld [vmem:[%s8884_s8 + $0x590] ss:$28 sps:$4 sm:$0xff]  }
 0x407   :  { %v6705_v35 = vld [vmem:[%s8884_s8 + $0x50] ss:$28 sps:$4 sm:$0xff]  }
 0x408   :  { %4863 = vmatpush2.bf16.msra.mxu0 %v6631_v2  ;;  %v6706_v2 = vld [vmem:[%s8884_s8 + $0x3d0] ss:$28 sps:$4 sm:$0xff]  }
 0x409   :  { %4904 = vmatpush2.bf16.msra.mxu1 %v6634_v3  ;;  %4864 = vmatprep.subr.bf16.mxu0 %v6639_v4  ;;  %v6707_v3 = vld [vmem:[%s8884_s8 + $0x1d8] ss:$28 sps:$4 sm:$0xff]  }
 0x40a   :  { %4905 = vmatprep.subr.bf16.mxu1 %v6642_v5  ;;  %v6708_v4 = vld [vmem:[%s8884_s8 + $0x558] ss:$28 sps:$4 sm:$0xff]  }
 0x40b   :  { %v6709_v5 = vld [vmem:[%s8884_s8 + $0x18] ss:$28 sps:$4 sm:$0xff]  }
 0x40c   :  { %4865 = vmatpush2.bf16.msra.mxu0 %v6637_v8  ;;  %v6710_v8 = vld [vmem:[%s8884_s8 + $0x398] ss:$28 sps:$4 sm:$0xff]  }
 0x40d   :  { %4906 = vmatpush2.bf16.msra.mxu1 %v6640_v9  ;;  %4866 = vmatprep.subr.bf16.mxu0 %v6645_v10  ;;  %v3493_v9 = vld [vmem:[%s8889_s9] sm:$0xff] }
 0x40e   :  { %4907 = vmatprep.subr.bf16.mxu1 %v6648_v11  ;;  %v3498_v10 = vrot.slane %v3493_v9, %v7709_v63  ;;  %v3502_v11 = vrot.slane %v3493_v9, %v7717_v1  ;;  %v3506_v63 = vrot.slane %v3493_v9, %v7825_v60  ;;  %v3510_v1 = vrot.slane %v3493_v9, %v7828_v61 }
 0x40f   :  { %v3513_v60 = vsub.s32 4, %v7706_v62  ;;  %v3517_v61 = vsub.s32 5, %v7706_v62 }
 0x410   :  { %4867 = vmatpush2.bf16.msra.mxu0 %v6643_v12 }
 0x411   :  { %4908 = vmatpush2.bf16.msra.mxu1 %v6646_v13  ;;  %4868 = vmatprep.subr.bf16.mxu0 %v6651_v14 }
 0x412   :  { %4909 = vmatprep.subr.bf16.mxu1 %v6654_v17 }
 0x414   :  { %4869 = vmatpush2.bf16.msra.mxu0 %v6649_v20 }
 0x415   :  { %4910 = vmatpush2.bf16.msra.mxu1 %v6652_v25  ;;  %4870 = vmatprep.subr.bf16.mxu0 %v6657_v21 }
 0x416   :  { %4911 = vmatprep.subr.bf16.mxu1 %v6660_v19 }
 0x418   :  { %4871 = vmatpush2.bf16.msra.mxu0 %v6655_v23 }
 0x419   :  { %4912 = vmatpush2.bf16.msra.mxu1 %v6658_v27  ;;  %4872 = vmatprep.subr.bf16.mxu0 %v6663_v51 }
 0x41a   :  { %4913 = vmatprep.subr.bf16.mxu1 %v6666_v24 }
 0x41c   :  { %4873 = vmatpush2.bf16.msra.mxu0 %v6661_v28 }
 0x41d   :  { %4914 = vmatpush2.bf16.msra.mxu1 %v6664_v7  ;;  %4874 = vmatprep.subr.bf16.mxu0 %v6669_v29 }
 0x41e   :  { %4915 = vmatprep.subr.bf16.mxu1 %v6672_v30 }
 0x420   :  { %4875 = vmatpush2.bf16.msra.mxu0 %v6667_v31 }
 0x421   :  { %4916 = vmatpush2.bf16.msra.mxu1 %v6670_v16  ;;  %4876 = vmatprep.subr.bf16.mxu0 %v6675_v32 }
 0x422   :  { %4917 = vmatprep.subr.bf16.mxu1 %v6678_v33 }
 0x424   :  { %4877 = vmatpush2.bf16.msra.mxu0 %v6673_v34 }
 0x425   :  { %4918 = vmatpush2.bf16.msra.mxu1 %v6676_v36  ;;  %5715 = vmatprep.subr.bf16.mxu0 %v6679_v37 }
 0x426   :  { %5737 = vmatprep.subr.bf16.mxu1 %v6680_v38 }
 0x427   :  { %4879 = vmatmul.mubr.bf16.vlgmr.msra.gmra.mxu0 %v8369_v0 }
 0x428   :  { %4920 = vmatmul.mubr.bf16.vlgmr.msra.gmra.mxu1 %v8371_v22  ;;  %5716 = vmatpush3.bf16.msra.mxu0 %v6681_v39 }
 0x429   :  { %4960 = vmatprep.mubr.bf16.mxu0 %v8359_v26  ;;  %5738 = vmatpush3.bf16.msra.mxu1 %v6682_v40  ;;  %v6689_v26 = vld [vmem:[%s8884_s8 + $0x130] ss:$28 sps:$4 sm:$0xff]  }
 0x42a   :  { %5000 = vmatprep.mubr.bf16.mxu1 %v8361_v18  ;;  %5717 = vmatprep.subr.bf16.mxu0 %v6683_v41  ;;  %v6691_v18 = vld [vmem:[%s8884_s8 + $0x2b8] ss:$28 sps:$4 sm:$0xff]  }
 0x42b   :  { %5739 = vmatprep.subr.bf16.mxu1 %v6684_v42 }
 0x42c   :  { %5718 = vmatpush3.bf16.msra.mxu0 %v6685_v43  ;;  %v3514_v43 = vrot.slane %v3493_v9, %v3513_v60 }
 0x42d   :  { %5740 = vmatpush3.bf16.msra.mxu1 %v6686_v45  ;;  %5719 = vmatprep.subr.bf16.mxu0 %v6687_v46  ;;  %v3518_v45 = vrot.slane %v3493_v9, %v3517_v61 }
 0x42e   :  { %5741 = vmatprep.subr.bf16.mxu1 %v6688_v48 }
 0x430   :  { %5720 = vmatpush3.bf16.msra.mxu0 %v6689_v26 }
 0x431   :  { %5742 = vmatpush3.bf16.msra.mxu1 %v6690_v49  ;;  %5721 = vmatprep.subr.bf16.mxu0 %v6691_v18 }
 0x432   :  { %5743 = vmatprep.subr.bf16.mxu1 %v6692_v50 }
 0x434   :  { %5722 = vmatpush3.bf16.msra.mxu0 %v6693_v52 }
 0x435   :  { %5744 = vmatpush3.bf16.msra.mxu1 %v6694_v53  ;;  %5723 = vmatprep.subr.bf16.mxu0 %v6695_v54 }
 0x436   :  { %5745 = vmatprep.subr.bf16.mxu1 %v6696_v55 }
 0x438   :  { %5724 = vmatpush3.bf16.msra.mxu0 %v6697_v56 }
 0x439   :  { %5746 = vmatpush3.bf16.msra.mxu1 %v6698_v47  ;;  %5725 = vmatprep.subr.bf16.mxu0 %v6699_v44 }
 0x43a   :  { %5747 = vmatprep.subr.bf16.mxu1 %v6700_v15 }
 0x43c   :  { %5726 = vmatpush3.bf16.msra.mxu0 %v6701_v57 }
 0x43d   :  { %5748 = vmatpush3.bf16.msra.mxu1 %v6702_v58  ;;  %5727 = vmatprep.subr.bf16.mxu0 %v6703_v59  ;;  %v3521_v58 = vsub.s32 6, %v7706_v62 }
 0x43e   :  { %5749 = vmatprep.subr.bf16.mxu1 %v6704_v6 }
 0x440   :  { %5728 = vmatpush3.bf16.msra.mxu0 %v6705_v35  ;;  %v3522_v35 = vrot.slane %v3493_v9, %v3521_v58 }
 0x441   :  { %5750 = vmatpush3.bf16.msra.mxu1 %v6706_v2  ;;  %5729 = vmatprep.subr.bf16.mxu0 %v6707_v3 }
 0x442   :  { %5751 = vmatprep.subr.bf16.mxu1 %v6708_v4 }
 0x444   :  { %5730 = vmatpush3.bf16.msra.mxu0 %v6709_v5 }
 0x445   :  { %5752 = vmatpush3.bf16.msra.mxu1 %v6710_v8 }
 0x447   :  { %4961 = vmatmul.mubr.bf16.vlgmr.msra.gmra.mxu0 %v8369_v0 }
 0x448   :  { %5001 = vmatmul.mubr.bf16.vlgmr.msra.gmra.mxu1 %v8371_v22 }
 0x467   :  { %v4716_v12 = vpop.f32.mrf.mxu0  ;;  %v4757_v13 = vpop.f32.mrf.mxu1 }
 0x468   :  { %v4717_v14 = vadd.f32 %v4716_v12, %v3498_v10 }
 0x469   :  { %v4718_v17 = vpop.f32.mrf.mxu0  ;;  %v4759_v20 = vpop.f32.mrf.mxu1 }
 0x46a   :  { %v4758_v25 = vadd.f32 %v4757_v13, %v4717_v14  ;;  %v4719_v21 = vadd.f32 %v4718_v17, %v3502_v11 }
 0x46b   :  { %v4720_v19 = vpop.f32.mrf.mxu0  ;;  %v4761_v23 = vpop.f32.mrf.mxu1 }
 0x46c   :  { %v4760_v0 = vadd.f32 %v4759_v20, %v4719_v21  ;;  %v5008_v51 = vmax.f32 %v4758_v25, 0.0 }
 0x46d   :  { %v4721_v27 = vpop.f32.mrf.mxu0  ;;  %v4762_v22 = vpop.f32.mrf.mxu1 }
 0x46e   :  { %v5009_v24 = vmax.f32 %v4760_v0, 0.0 }
 0x470   :  { %v5711_v28 = vpack.c.bf16 %v5009_v24, %v5008_v51 }
 0x472   :  { %5044 = vst [vmem:[%s8890_s10] sm:$0xff] %v5711_v28 }
 0x4a7   :  { %v4798_v7 = vpop.f32.mrf.mxu0  ;;  %v4839_v29 = vpop.f32.mrf.mxu1 }
 0x4a8   :  { %v4799_v30 = vadd.f32 %v4798_v7, %v3506_v63 }
 0x4a9   :  { %v4800_v31 = vpop.f32.mrf.mxu0  ;;  %v4841_v16 = vpop.f32.mrf.mxu1 }
 0x4aa   :  { %v4840_v32 = vadd.f32 %v4839_v29, %v4799_v30  ;;  %v4801_v33 = vadd.f32 %v4800_v31, %v3510_v1 }
 0x4ab   :  { %v4802_v34 = vpop.f32.mrf.mxu0  ;;  %v4843_v36 = vpop.f32.mrf.mxu1 }
 0x4ac   :  { %v4842_v37 = vadd.f32 %v4841_v16, %v4801_v33  ;;  %v5010_v40 = vmax.f32 %v4840_v32, 0.0 }
 0x4ad   :  { %v4803_v38 = vpop.f32.mrf.mxu0  ;;  %v4844_v39 = vpop.f32.mrf.mxu1 }
 0x4ae   :  { %v5011_v41 = vmax.f32 %v4842_v37, 0.0 }
 0x4b0   :  { %v5712_v42 = vpack.c.bf16 %v5011_v41, %v5010_v40 }
 0x4b2   :  { %5045 = vst [vmem:[%s8890_s10 + $0x8] sm:$0xff] %v5712_v42 }
 0x4e7   :  { %v4880_v46 = vpop.f32.mrf.mxu0 }
 0x4e8   :  { %v4881_v48 = vadd.f32 %v4880_v46, %v3514_v43  ;;  %v4921_v26 = vpop.f32.mrf.mxu1 }
 0x4e9   :  { %v4882_v49 = vpop.f32.mrf.mxu0 }
 0x4ea   :  { %v4922_v18 = vadd.f32 %v4921_v26, %v4881_v48  ;;  %v4883_v50 = vadd.f32 %v4882_v49, %v3518_v45  ;;  %v4923_v52 = vpop.f32.mrf.mxu1 }
 0x4eb   :  { %v4884_v53 = vpop.f32.mrf.mxu0 }
 0x4ec   :  { %v4924_v54 = vadd.f32 %v4923_v52, %v4883_v50  ;;  %v4925_v55 = vpop.f32.mrf.mxu1  ;;  %v5012_v47 = vmax.f32 %v4922_v18, 0.0 }
 0x4ed   :  { %v4885_v56 = vpop.f32.mrf.mxu0 }
 0x4ee   :  { %v5013_v44 = vmax.f32 %v4924_v54, 0.0  ;;  %v4926_v15 = vpop.f32.mrf.mxu1 }
 0x4f0   :  { %v5713_v57 = vpack.c.bf16 %v5013_v44, %v5012_v47 }
 0x4f2   :  { %5046 = vst [vmem:[%s8890_s10 + $0x10] sm:$0xff] %v5713_v57 }
 0x507   :  { %v5731_v59 = vpop.f32.mrf.mxu0 }
 0x508   :  { %v5753_v6 = vpop.f32.mrf.mxu1 }
 0x509   :  { %v5732_v2 = vpop.f32.mrf.mxu0 }
 0x50a   :  { %v5733_v3 = vadd.f32 %v5732_v2, %v5731_v59  ;;  %v5754_v4 = vpop.f32.mrf.mxu1 }
 0x50b   :  { %v5734_v5 = vpop.f32.mrf.mxu0  ;;  %v5755_v10 = vadd.f32 %v5754_v4, %v5753_v6 }
 0x50c   :  { %v4963_v8 = vadd.f32 %v5733_v3, %v3522_v35  ;;  %v5756_v11 = vpop.f32.mrf.mxu1 }
 0x50d   :  { %v5735_v12 = vpop.f32.mrf.mxu0 }
 0x50e   :  { %v5003_v13 = vadd.f32 %v5755_v10, %v4963_v8  ;;  %v5757_v14 = vpop.f32.mrf.mxu1 }
 0x510   :  { %v5014_v17 = vmax.f32 %v5003_v13, 0.0 }
 0x512   :  { %v5714_v20 = vpack.c.bf16 %v5014_v17, %v5014_v17 }
 0x514   :  { %5047 = vst [vmem:[%s8890_s10 + $0x18] sm:$0xf] %v5714_v20 }

</bundles_post_ra>
